<compile_context>
chip_gen: v7x
topology: tpu7x:2x2x1
jax: 0.10.0
libtpu: 0.0.40
codegen_flags: <defaults>
</compile_context>

<pallas_src>
import functools

import jax
import jax.numpy as jnp
from jax.experimental import pallas as pl
from jax.experimental.pallas import tpu as pltpu

# ----------------------------- small synthetic config -----------------------------
VOCAB = 256
HIDDEN = 128                 # llm hidden size (multiple of 128 -> lane-dense)
N_HEADS = 4
HEAD_DIM = HIDDEN // N_HEADS
INTERMEDIATE = 512
N_LAYERS = 2
VISION_HIDDEN = 128          # "vision_hidden_size"
ADAPTER_INTER = 2 * VISION_HIDDEN
QUERY_LENGTH = 4             # real model: 257 (clip) / 576 / 1024 (siglip)
PATCH = 8
IMG_SIZE = 16
IMG_CHANNELS = 3
PATCH_DIM = IMG_CHANNELS * PATCH * PATCH          # 192
PATCH_DIM_PAD = 256                               # padded to a multiple of 128
SEQ = 16                     # total flattened tokens (vLLM-style)
IMAGE_START_TOKEN_ID = VOCAB - 1
LN_EPS = 1e-5
ROPE_THETA = 10000.0
DTYPE = jnp.float32          # activations / LN params / biases
W_DTYPE = jnp.bfloat16       # matmul weights stored in HBM as bf16

_LAYER_PARAM_ORDER = ("ln1_g", "ln1_b", "wqkv", "bqkv", "wo", "bo",
                      "ln2_g", "ln2_b", "w_fc", "b_fc", "w_proj", "b_proj")


# ------------------------------- in-kernel helpers ---------------------------------
def _ln(x, g, b, eps):
    """LayerNorm in f32 on a [tokens, features] slab (reductions on the lane axis)."""
    mu = jnp.mean(x, axis=-1, keepdims=True)
    var = jnp.mean(jnp.square(x - mu), axis=-1, keepdims=True)
    return (x - mu) * jax.lax.rsqrt(var + eps) * g + b


def _gelu_tanh(x):
    # gelu_pytorch_tanh
    return 0.5 * x * (1.0 + jnp.tanh(0.7978845608028654 * (x + 0.044715 * x * x * x)))


# ---------------------------------- Pallas kernels ---------------------------------
def _decoder_stack_kernel(h_ref, cos_ref, sin_ref,
                          ln1g_ref, ln1b_ref, wqkv_ref, bqkv_ref, wo_ref, bo_ref,
                          ln2g_ref, ln2b_ref, wfc_ref, bfc_ref, wpj_ref, bpj_ref,
                          fg_ref, fb_ref,
                          o_ref, h_scr,
                          *, n_heads, head_dim, eps):
    """One grid step == one full decoder layer; residual h lives in VMEM scratch.

    Last grid step additionally applies the final LayerNorm and writes the
    (VMEM-resident) output block.
    """
    f32 = jnp.float32
    bf16 = jnp.bfloat16
    layer = pl.program_id(0)

    @pl.when(layer == 0)
    def _():
        h_scr[...] = h_ref[...].astype(f32)

    h = h_scr[...]                                       # (S, H) f32 carry
    S, H = h.shape
    half = head_dim // 2
    scale = 1.0 / (head_dim ** 0.5)

    # ---------------- attention block: LN -> QKV -> RoPE -> attn -> O-proj ----------
    x = _ln(h, ln1g_ref[0].astype(f32), ln1b_ref[0].astype(f32), eps)
    qkv = jnp.dot(x.astype(bf16), wqkv_ref[0],
                  preferred_element_type=f32) + bqkv_ref[0].astype(f32)   # (S, 3H)

    # RoPE (NeoX half-split) on the fused q|k slab in one pass.
    # rotate_half within each head block of `head_dim` lanes is built from two
    # full-lane-width rolls (256-wide, 128-aligned) + a per-lane select; the
    # rolled values that cross a head boundary are never selected by the mask.
    qk = qkv[:, :2 * H]                                  # (S, 2H) f32
    lane = jax.lax.broadcasted_iota(jnp.int32, (1, 2 * H), 1)
    first_half = (lane % head_dim) < half
    fwd = pltpu.roll(qk, shift=half, axis=1)             # qk[l - half]
    bwd = pltpu.roll(qk, shift=2 * H - half, axis=1)     # qk[l + half]
    rot = jnp.where(first_half, -bwd, fwd)
    qk = qk * cos_ref[...].astype(f32) + rot * sin_ref[...].astype(f32)

    # Single bf16 cast per operand, then batched-head (nH, S, D) layout.
    qk_b = qk.astype(bf16)
    v_b = qkv[:, 2 * H:].astype(bf16)
    q3 = jnp.stack([qk_b[:, hh * head_dim:(hh + 1) * head_dim]
                    for hh in range(n_heads)], axis=0)
    k3 = jnp.stack([qk_b[:, H + hh * head_dim:H + (hh + 1) * head_dim]
                    for hh in range(n_heads)], axis=0)
    v3 = jnp.stack([v_b[:, hh * head_dim:(hh + 1) * head_dim]
                    for hh in range(n_heads)], axis=0)

    # Batched-head attention; scores stay f32 so the -1e30 causal fill is safe.
    s = jnp.einsum('hqd,hkd->hqk', q3, k3, preferred_element_type=f32) * scale
    row = jax.lax.broadcasted_iota(jnp.int32, (S, S), 0)
    col = jax.lax.broadcasted_iota(jnp.int32, (S, S), 1)
    s = jnp.where((row >= col)[None], s, -1e30)
    m = jnp.max(s, axis=-1, keepdims=True)
    p = jnp.exp(s - m)
    p = p * pl.reciprocal(jnp.sum(p, axis=-1, keepdims=True), approx=True)
    ctx = jnp.einsum('hqk,hkd->hqd', p.astype(bf16), v3,
                     preferred_element_type=f32)          # (nH, S, D) f32

    # O-projection: accumulate each head through its wo row-slice (no lane concat).
    wo = wo_ref[0]                                        # (H, H) bf16
    ctx_b = ctx.astype(bf16)
    y = jnp.zeros((S, H), f32)
    for hh in range(n_heads):                             # static unroll, f32 accumulator
        lo = hh * head_dim
        y = y + jnp.dot(ctx_b[hh], wo[lo:lo + head_dim, :],
                        preferred_element_type=f32)
    h = h + y + bo_ref[0].astype(f32)

    # ---------------- MLP block: LN -> c_fc -> gelu_pytorch_tanh -> c_proj ----------
    x2 = _ln(h, ln2g_ref[0].astype(f32), ln2b_ref[0].astype(f32), eps)
    u = jnp.dot(x2.astype(bf16), wfc_ref[0],
                preferred_element_type=f32) + bfc_ref[0].astype(f32)
    u = _gelu_tanh(u)
    y2 = jnp.dot(u.astype(bf16), wpj_ref[0],
                 preferred_element_type=f32) + bpj_ref[0].astype(f32)
    h = h + y2

    h_scr[...] = h                                        # carry to next layer

    @pl.when(layer == pl.num_programs(0) - 1)
    def _():
        o_ref[...] = _ln(h, fg_ref[...].astype(f32), fb_ref[...].astype(f32),
                         eps).astype(o_ref.dtype)


def _vision_adapter_kernel(px_ref, pw_ref, pb_ref, eg_ref, eb_ref,
                           fw_ref, fb_ref, jw_ref, jb_ref, ag_ref, ab_ref,
                           o_ref, *, eps):
    """Fused vision path: patch-embed matmul -> LN -> Adapter c_fc -> Swish -> c_proj -> LN."""
    f32 = jnp.float32
    bf16 = jnp.bfloat16
    # TODO(synk): full CLIP/SigLIP transformer tower omitted; patch-embed + norm stands in.
    x = jnp.dot(px_ref[...].astype(bf16), pw_ref[...],
                preferred_element_type=f32) + pb_ref[...].astype(f32)
    x = _ln(x, eg_ref[...].astype(f32), eb_ref[...].astype(f32), eps)
    u = jnp.dot(x.astype(bf16), fw_ref[...],
                preferred_element_type=f32) + fb_ref[...].astype(f32)
    u = u * jax.nn.sigmoid(u)                              # Swish
    y = jnp.dot(u.astype(bf16), jw_ref[...],
                preferred_element_type=f32) + jb_ref[...].astype(f32)
    y = _ln(y, ag_ref[...].astype(f32), ab_ref[...].astype(f32), eps)
    o_ref[...] = y.astype(o_ref.dtype)


# ------------------------------- pallas_call wrappers --------------------------------
def _single_block_call(kernel, out_shape, *args, dtype=DTYPE):
    """Single-block pallas_call: whole operands resident in VMEM (fits at toy sizes)."""
    in_specs = [pl.BlockSpec(a.shape, lambda i, _n=a.ndim: (0,) * _n) for a in args]
    return pl.pallas_call(
        kernel,
        out_shape=jax.ShapeDtypeStruct(out_shape, dtype),
        grid=(1,),
        in_specs=in_specs,
        out_specs=pl.BlockSpec(out_shape, lambda i: (0,) * len(out_shape)),
        compiler_params=pltpu.CompilerParams(dimension_semantics=("arbitrary",)),
    )(*args)


def run_decoder_stack(h, cos2, sin2, layers, final_g, final_b):
    """Whole decoder stack (+ final LN) in ONE pallas_call, grid over layers."""
    S, H = h.shape
    n_layers = layers["wqkv"].shape[0]

    in_specs = [
        pl.BlockSpec((S, H), lambda l: (0, 0)),            # h (read at layer 0)
        pl.BlockSpec(cos2.shape, lambda l: (0, 0)),        # cos (S, 2H)
        pl.BlockSpec(sin2.shape, lambda l: (0, 0)),        # sin (S, 2H)
    ]
    stacked_args = []
    for name in _LAYER_PARAM_ORDER:                        # leading layer axis
        arr = layers[name]
        in_specs.append(pl.BlockSpec((1,) + arr.shape[1:], lambda l: (l, 0, 0)))
        stacked_args.append(arr)
    in_specs += [pl.BlockSpec(final_g.shape, lambda l: (0, 0)),
                 pl.BlockSpec(final_b.shape, lambda l: (0, 0))]

    return pl.pallas_call(
        functools.partial(_decoder_stack_kernel, n_heads=N_HEADS,
                          head_dim=HEAD_DIM, eps=LN_EPS),
        out_shape=jax.ShapeDtypeStruct((S, H), DTYPE),
        grid=(n_layers,),
        in_specs=in_specs,
        # Output block is VMEM-resident across the (sequential) layer axis;
        # written once at the last layer.
        out_specs=pl.BlockSpec((S, H), lambda l: (0, 0)),
        scratch_shapes=[pltpu.VMEM((S, H), jnp.float32)],   # residual carry
        compiler_params=pltpu.CompilerParams(dimension_semantics=("arbitrary",)),
    )(h, cos2, sin2, *stacked_args, final_g, final_b)


# ----------------------------------- model pieces ----------------------------------
def rope_tables(positions, head_dim, n_heads, theta=ROPE_THETA):
    """Full-width cos/sin tables tiled across the fused q|k slab: (S, 2*HIDDEN)."""
    half = head_dim // 2
    inv_freq = 1.0 / (theta ** (jnp.arange(half, dtype=jnp.float32) / half))
    freqs = positions.astype(jnp.float32)[:, None] * inv_freq[None, :]   # (S, half)
    cos = jnp.concatenate([jnp.cos(freqs), jnp.cos(freqs)], axis=-1)     # (S, head_dim)
    sin = jnp.concatenate([jnp.sin(freqs), jnp.sin(freqs)], axis=-1)
    cos2 = jnp.tile(cos, (1, 2 * n_heads)).astype(DTYPE)                 # (S, 2H)
    sin2 = jnp.tile(sin, (1, 2 * n_heads)).astype(DTYPE)
    return cos2, sin2


def image_to_patches(pixel_values):
    """(B, C, H, W) NCHW -> non-overlapping patches, K padded 192 -> 256 (lane-aligned)."""
    B = pixel_values.shape[0]
    x = pixel_values.reshape(B, IMG_CHANNELS, IMG_SIZE // PATCH, PATCH,
                             IMG_SIZE // PATCH, PATCH)
    x = jnp.transpose(x, (0, 2, 4, 1, 3, 5)).reshape(B * QUERY_LENGTH, PATCH_DIM)
    return jnp.pad(x, ((0, 0), (0, PATCH_DIM_PAD - PATCH_DIM)))


def embed_image(pixel_values, params):
    """image_encoder + Adapter, fused into a single Pallas kernel."""
    patches = image_to_patches(pixel_values)
    ie, ad = params["image_encoder"], params["adapter"]
    return _single_block_call(
        functools.partial(_vision_adapter_kernel, eps=LN_EPS),
        (patches.shape[0], HIDDEN),
        patches,
        ie["patch_w"], ie["patch_b"], ie["enc_ln_g"], ie["enc_ln_b"],
        ad["a_fc_w"], ad["a_fc_b"], ad["a_proj_w"], ad["a_proj_b"],
        ad["a_ln_g"], ad["a_ln_b"])


def starvector2_forward(params, input_ids, positions, pixel_values=None):
    """Mirrors StarVector2Model.forward (prefill, no KV cache)."""
    # _parse_and_validate_image_input: squeeze dim 1 of a 5-D pixel tensor of size 1
    if pixel_values is not None and pixel_values.ndim == 5 and pixel_values.shape[1] == 1:
        pixel_values = jnp.squeeze(pixel_values, axis=1)

    inputs_embeds = jnp.take(params["embed_tokens"], input_ids, axis=0)    # (T, H)

    if pixel_values is not None:
        vis_flat = embed_image(pixel_values, params).astype(inputs_embeds.dtype)
        mask = input_ids == IMAGE_START_TOKEN_ID
        # inputs_embeds[mask] = visual_embeddings.view(-1, H)  (row-major order of hits)
        idx = jnp.clip(jnp.cumsum(mask.astype(jnp.int32)) - 1, 0, vis_flat.shape[0] - 1)
        inputs_embeds = jnp.where(mask[:, None], vis_flat[idx], inputs_embeds)

    cos2, sin2 = rope_tables(positions, HEAD_DIM, N_HEADS)
    return run_decoder_stack(inputs_embeds, cos2, sin2, params["layers"],
                             params["final_ln_g"], params["final_ln_b"])


# --------------------------------- parameter init ----------------------------------
def init_params(key):
    keys = iter(jax.random.split(key, 64))

    def w(shape, dtype=W_DTYPE, scale=0.02):
        return (jax.random.normal(next(keys), shape, dtype=jnp.float32) * scale).astype(dtype)

    def b(shape, scale=0.01):
        return jax.random.normal(next(keys), shape, dtype=DTYPE) * scale

    def ones(shape):
        return jnp.ones(shape, DTYPE)

    def zeros(shape):
        return jnp.zeros(shape, DTYPE)

    # patch-embed weight padded on K (192 -> 256) with zeros to stay lane-aligned.
    patch_w = jnp.zeros((PATCH_DIM_PAD, VISION_HIDDEN), jnp.float32)
    patch_w = patch_w.at[:PATCH_DIM].set(
        jax.random.normal(next(keys), (PATCH_DIM, VISION_HIDDEN), jnp.float32) * 0.02)

    L = N_LAYERS
    params = {
        "embed_tokens": jax.random.normal(next(keys), (VOCAB, HIDDEN), DTYPE) * 0.02,
        "image_encoder": {
            "patch_w": patch_w.astype(W_DTYPE),
            "patch_b": b((1, VISION_HIDDEN)),
            "enc_ln_g": ones((1, VISION_HIDDEN)),
            "enc_ln_b": zeros((1, VISION_HIDDEN)),
        },
        "adapter": {
            "a_fc_w": w((VISION_HIDDEN, ADAPTER_INTER)),
            "a_fc_b": b((1, ADAPTER_INTER)),
            "a_proj_w": w((ADAPTER_INTER, HIDDEN)),
            "a_proj_b": b((1, HIDDEN)),
            "a_ln_g": ones((1, HIDDEN)),
            "a_ln_b": zeros((1, HIDDEN)),
        },
        "final_ln_g": ones((1, HIDDEN)),
        "final_ln_b": zeros((1, HIDDEN)),
        # Per-layer params stacked with a leading layer axis (grid over layers).
        "layers": {
            "ln1_g": ones((L, 1, HIDDEN)), "ln1_b": zeros((L, 1, HIDDEN)),
            # wq/wk/wv fused into one (H, 3H) weight so one MXU pass computes QKV.
            "wqkv": w((L, HIDDEN, 3 * HIDDEN)), "bqkv": b((L, 1, 3 * HIDDEN)),
            "wo": w((L, HIDDEN, HIDDEN)), "bo": b((L, 1, HIDDEN)),
            "ln2_g": ones((L, 1, HIDDEN)), "ln2_b": zeros((L, 1, HIDDEN)),
            "w_fc": w((L, HIDDEN, INTERMEDIATE)), "b_fc": b((L, 1, INTERMEDIATE)),
            "w_proj": w((L, INTERMEDIATE, HIDDEN)), "b_proj": b((L, 1, HIDDEN)),
        },
    }
    return params


# --------------------------------------- main ---------------------------------------
if __name__ == "__main__":
    root = jax.random.PRNGKey(0)
    pkey, dkey = jax.random.split(root)
    params = init_params(pkey)

    k_txt, k_img = jax.random.split(dkey)
    # 1 image * QUERY_LENGTH image-start tokens followed by text tokens (flattened vLLM style)
    txt_ids = jax.random.randint(k_txt, (SEQ - QUERY_LENGTH,), 0, VOCAB - 1, dtype=jnp.int32)
    input_ids = jnp.concatenate(
        [jnp.full((QUERY_LENGTH,), IMAGE_START_TOKEN_ID, dtype=jnp.int32), txt_ids])
    positions = jnp.arange(SEQ, dtype=jnp.int32)
    # 5-D pixel tensor with a singleton dim-1, as vLLM passes it (squeezed in forward)
    pixel_values = jax.random.normal(
        k_img, (1, 1, IMG_CHANNELS, IMG_SIZE, IMG_SIZE), dtype=DTYPE)

    fwd = jax.jit(starvector2_forward)
    hidden_states = fwd(params, input_ids, positions, pixel_values=pixel_values)
    jax.block_until_ready(hidden_states)
    assert hidden_states.shape == (SEQ, HIDDEN)
    assert bool(jnp.all(jnp.isfinite(hidden_states)))
    print("KERNEL_OK")
</pallas_src>

<mosaic_0001>
module attributes {stable_mosaic.version = 11 : i64} {
  func.func @_vision_adapter_kernel(%arg0: i32, %arg1: memref<4x256xf32, #tpu.memory_space<vmem>>, %arg2: memref<256x128xbf16, #tpu.memory_space<vmem>>, %arg3: memref<1x128xf32, #tpu.memory_space<vmem>>, %arg4: memref<1x128xf32, #tpu.memory_space<vmem>>, %arg5: memref<1x128xf32, #tpu.memory_space<vmem>>, %arg6: memref<128x256xbf16, #tpu.memory_space<vmem>>, %arg7: memref<1x256xf32, #tpu.memory_space<vmem>>, %arg8: memref<256x128xbf16, #tpu.memory_space<vmem>>, %arg9: memref<1x128xf32, #tpu.memory_space<vmem>>, %arg10: memref<1x128xf32, #tpu.memory_space<vmem>>, %arg11: memref<1x128xf32, #tpu.memory_space<vmem>>, %arg12: memref<4x128xf32, #tpu.memory_space<vmem>>) attributes {dimension_semantics = [#tpu.dimension_semantics<arbitrary>], iteration_bounds = array<i64: 1>, scalar_prefetch = 0 : i64, scratch_operands = 0 : i64, tpu.core_type = #tpu.core_type<tc>, window_params = [{pipeline_mode = #tpu.pipeline_mode<synchronous>, transform_indices = @transform_0, window_bounds = array<i64: 4, 256>}, {pipeline_mode = #tpu.pipeline_mode<synchronous>, transform_indices = @transform_1, window_bounds = array<i64: 256, 128>}, {pipeline_mode = #tpu.pipeline_mode<synchronous>, transform_indices = @transform_2, window_bounds = array<i64: 1, 128>}, {pipeline_mode = #tpu.pipeline_mode<synchronous>, transform_indices = @transform_3, window_bounds = array<i64: 1, 128>}, {pipeline_mode = #tpu.pipeline_mode<synchronous>, transform_indices = @transform_4, window_bounds = array<i64: 1, 128>}, {pipeline_mode = #tpu.pipeline_mode<synchronous>, transform_indices = @transform_5, window_bounds = array<i64: 128, 256>}, {pipeline_mode = #tpu.pipeline_mode<synchronous>, transform_indices = @transform_6, window_bounds = array<i64: 1, 256>}, {pipeline_mode = #tpu.pipeline_mode<synchronous>, transform_indices = @transform_7, window_bounds = array<i64: 256, 128>}, {pipeline_mode = #tpu.pipeline_mode<synchronous>, transform_indices = @transform_8, window_bounds = array<i64: 1, 128>}, {pipeline_mode = #tpu.pipeline_mode<synchronous>, transform_indices = @transform_9, window_bounds = array<i64: 1, 128>}, {pipeline_mode = #tpu.pipeline_mode<synchronous>, transform_indices = @transform_10, window_bounds = array<i64: 1, 128>}, {pipeline_mode = #tpu.pipeline_mode<synchronous>, transform_indices = @transform_11, window_bounds = array<i64: 4, 128>}]} {
    %c0 = arith.constant 0 : index
    %c0_0 = arith.constant 0 : index
    %0 = vector.load %arg1[%c0, %c0_0] : memref<4x256xf32, #tpu.memory_space<vmem>>, vector<4x256xf32>
    %1 = arith.truncf %0 : vector<4x256xf32> to vector<4x256xbf16>
    %c0_1 = arith.constant 0 : index
    %c0_2 = arith.constant 0 : index
    %2 = vector.load %arg2[%c0_1, %c0_2] : memref<256x128xbf16, #tpu.memory_space<vmem>>, vector<256x128xbf16>
    %cst = arith.constant dense<0.000000e+00> : vector<4x128xf32>
    %3 = tpu.matmul %1, %2, %cst {dimension_numbers = #tpu.dot_dimension_numbers<[1], [0], [0], [1], [0, 0, 1, 1], [], []>} : vector<4x256xbf16>, vector<256x128xbf16>, vector<4x128xf32> -> vector<4x128xf32>
    %c0_3 = arith.constant 0 : index
    %c0_4 = arith.constant 0 : index
    %4 = vector.load %arg3[%c0_3, %c0_4] : memref<1x128xf32, #tpu.memory_space<vmem>>, vector<1x128xf32>
    %5 = vector.broadcast %4 : vector<1x128xf32> to vector<4x128xf32>
    %6 = arith.addf %3, %5 : vector<4x128xf32>
    %c0_5 = arith.constant 0 : index
    %c0_6 = arith.constant 0 : index
    %7 = vector.load %arg4[%c0_5, %c0_6] : memref<1x128xf32, #tpu.memory_space<vmem>>, vector<1x128xf32>
    %c0_7 = arith.constant 0 : index
    %c0_8 = arith.constant 0 : index
    %8 = vector.load %arg5[%c0_7, %c0_8] : memref<1x128xf32, #tpu.memory_space<vmem>>, vector<1x128xf32>
    %cst_9 = arith.constant dense<0.000000e+00> : vector<4xf32>
    %9 = vector.multi_reduction <add>, %6, %cst_9 [1] : vector<4x128xf32> to vector<4xf32>
    %10 = vector.shape_cast %9 : vector<4xf32> to vector<4x1xf32>
    %cst_10 = arith.constant 1.280000e+02 : f32
    %11 = vector.broadcast %cst_10 : f32 to vector<4x1xf32>
    %12 = arith.divf %10, %11 : vector<4x1xf32>
    %13 = vector.broadcast %12 : vector<4x1xf32> to vector<4x128xf32>
    %14 = arith.subf %6, %13 : vector<4x128xf32>
    %15 = arith.mulf %14, %14 : vector<4x128xf32>
    %cst_11 = arith.constant dense<0.000000e+00> : vector<4xf32>
    %16 = vector.multi_reduction <add>, %15, %cst_11 [1] : vector<4x128xf32> to vector<4xf32>
    %17 = vector.shape_cast %16 : vector<4xf32> to vector<4x1xf32>
    %cst_12 = arith.constant 1.280000e+02 : f32
    %18 = vector.broadcast %cst_12 : f32 to vector<4x1xf32>
    %19 = arith.divf %17, %18 : vector<4x1xf32>
    %20 = vector.broadcast %12 : vector<4x1xf32> to vector<4x128xf32>
    %21 = arith.subf %6, %20 : vector<4x128xf32>
    %cst_13 = arith.constant 9.99999974E-6 : f32
    %22 = vector.broadcast %cst_13 : f32 to vector<4x1xf32>
    %23 = arith.addf %19, %22 : vector<4x1xf32>
    %24 = math.rsqrt %23 : vector<4x1xf32>
    %25 = vector.broadcast %24 : vector<4x1xf32> to vector<4x128xf32>
    %26 = arith.mulf %21, %25 : vector<4x128xf32>
    %27 = vector.broadcast %7 : vector<1x128xf32> to vector<4x128xf32>
    %28 = arith.mulf %26, %27 : vector<4x128xf32>
    %29 = vector.broadcast %8 : vector<1x128xf32> to vector<4x128xf32>
    %30 = arith.addf %28, %29 : vector<4x128xf32>
    %31 = arith.truncf %30 : vector<4x128xf32> to vector<4x128xbf16>
    %c0_14 = arith.constant 0 : index
    %c0_15 = arith.constant 0 : index
    %32 = vector.load %arg6[%c0_14, %c0_15] : memref<128x256xbf16, #tpu.memory_space<vmem>>, vector<128x256xbf16>
    %cst_16 = arith.constant dense<0.000000e+00> : vector<4x256xf32>
    %33 = tpu.matmul %31, %32, %cst_16 {dimension_numbers = #tpu.dot_dimension_numbers<[1], [0], [0], [1], [0, 0, 1, 1], [], []>} : vector<4x128xbf16>, vector<128x256xbf16>, vector<4x256xf32> -> vector<4x256xf32>
    %c0_17 = arith.constant 0 : index
    %c0_18 = arith.constant 0 : index
    %34 = vector.load %arg7[%c0_17, %c0_18] : memref<1x256xf32, #tpu.memory_space<vmem>>, vector<1x256xf32>
    %35 = vector.broadcast %34 : vector<1x256xf32> to vector<4x256xf32>
    %36 = arith.addf %33, %35 : vector<4x256xf32>
    %37 = arith.negf %36 : vector<4x256xf32>
    %38 = math.exp %37 : vector<4x256xf32>
    %cst_19 = arith.constant 1.000000e+00 : f32
    %39 = vector.broadcast %cst_19 : f32 to vector<4x256xf32>
    %40 = arith.addf %39, %38 : vector<4x256xf32>
    %41 = arith.divf %39, %40 : vector<4x256xf32>
    %42 = arith.mulf %36, %41 : vector<4x256xf32>
    %43 = arith.truncf %42 : vector<4x256xf32> to vector<4x256xbf16>
    %c0_20 = arith.constant 0 : index
    %c0_21 = arith.constant 0 : index
    %44 = vector.load %arg8[%c0_20, %c0_21] : memref<256x128xbf16, #tpu.memory_space<vmem>>, vector<256x128xbf16>
    %cst_22 = arith.constant dense<0.000000e+00> : vector<4x128xf32>
    %45 = tpu.matmul %43, %44, %cst_22 {dimension_numbers = #tpu.dot_dimension_numbers<[1], [0], [0], [1], [0, 0, 1, 1], [], []>} : vector<4x256xbf16>, vector<256x128xbf16>, vector<4x128xf32> -> vector<4x128xf32>
    %c0_23 = arith.constant 0 : index
    %c0_24 = arith.constant 0 : index
    %46 = vector.load %arg9[%c0_23, %c0_24] : memref<1x128xf32, #tpu.memory_space<vmem>>, vector<1x128xf32>
    %47 = vector.broadcast %46 : vector<1x128xf32> to vector<4x128xf32>
    %48 = arith.addf %45, %47 : vector<4x128xf32>
    %c0_25 = arith.constant 0 : index
    %c0_26 = arith.constant 0 : index
    %49 = vector.load %arg10[%c0_25, %c0_26] : memref<1x128xf32, #tpu.memory_space<vmem>>, vector<1x128xf32>
    %c0_27 = arith.constant 0 : index
    %c0_28 = arith.constant 0 : index
    %50 = vector.load %arg11[%c0_27, %c0_28] : memref<1x128xf32, #tpu.memory_space<vmem>>, vector<1x128xf32>
    %cst_29 = arith.constant dense<0.000000e+00> : vector<4xf32>
    %51 = vector.multi_reduction <add>, %48, %cst_29 [1] : vector<4x128xf32> to vector<4xf32>
    %52 = vector.shape_cast %51 : vector<4xf32> to vector<4x1xf32>
    %cst_30 = arith.constant 1.280000e+02 : f32
    %53 = vector.broadcast %cst_30 : f32 to vector<4x1xf32>
    %54 = arith.divf %52, %53 : vector<4x1xf32>
    %55 = vector.broadcast %54 : vector<4x1xf32> to vector<4x128xf32>
    %56 = arith.subf %48, %55 : vector<4x128xf32>
    %57 = arith.mulf %56, %56 : vector<4x128xf32>
    %cst_31 = arith.constant dense<0.000000e+00> : vector<4xf32>
    %58 = vector.multi_reduction <add>, %57, %cst_31 [1] : vector<4x128xf32> to vector<4xf32>
    %59 = vector.shape_cast %58 : vector<4xf32> to vector<4x1xf32>
    %cst_32 = arith.constant 1.280000e+02 : f32
    %60 = vector.broadcast %cst_32 : f32 to vector<4x1xf32>
    %61 = arith.divf %59, %60 : vector<4x1xf32>
    %62 = vector.broadcast %54 : vector<4x1xf32> to vector<4x128xf32>
    %63 = arith.subf %48, %62 : vector<4x128xf32>
    %cst_33 = arith.constant 9.99999974E-6 : f32
    %64 = vector.broadcast %cst_33 : f32 to vector<4x1xf32>
    %65 = arith.addf %61, %64 : vector<4x1xf32>
    %66 = math.rsqrt %65 : vector<4x1xf32>
    %67 = vector.broadcast %66 : vector<4x1xf32> to vector<4x128xf32>
    %68 = arith.mulf %63, %67 : vector<4x128xf32>
    %69 = vector.broadcast %49 : vector<1x128xf32> to vector<4x128xf32>
    %70 = arith.mulf %68, %69 : vector<4x128xf32>
    %71 = vector.broadcast %50 : vector<1x128xf32> to vector<4x128xf32>
    %72 = arith.addf %70, %71 : vector<4x128xf32>
    %c0_34 = arith.constant 0 : index
    %c0_35 = arith.constant 0 : index
    %73 = vector.load %arg12[%c0_34, %c0_35] : memref<4x128xf32, #tpu.memory_space<vmem>>, vector<4x128xf32>
    tpu.vector_store %arg12[%c0_34, %c0_35], %72 {strides = array<i32>} : memref<4x128xf32, #tpu.memory_space<vmem>>, vector<4x128xf32>,
    return
  }
  func.func @transform_0(%arg0: i32) -> (i32, i32) {
    %c0_i32 = arith.constant 0 : i32
    %c0_i32_0 = arith.constant 0 : i32
    %c0_i32_1 = arith.constant 0 : i32
    return %c0_i32, %c0_i32_0 : i32, i32
  }
  func.func @transform_1(%arg0: i32) -> (i32, i32) {
    %c0_i32 = arith.constant 0 : i32
    %c0_i32_0 = arith.constant 0 : i32
    %c0_i32_1 = arith.constant 0 : i32
    return %c0_i32, %c0_i32_0 : i32, i32
  }
  func.func @transform_2(%arg0: i32) -> (i32, i32) {
    %c0_i32 = arith.constant 0 : i32
    %c0_i32_0 = arith.constant 0 : i32
    %c0_i32_1 = arith.constant 0 : i32
    return %c0_i32, %c0_i32_0 : i32, i32
  }
  func.func @transform_3(%arg0: i32) -> (i32, i32) {
    %c0_i32 = arith.constant 0 : i32
    %c0_i32_0 = arith.constant 0 : i32
    %c0_i32_1 = arith.constant 0 : i32
    return %c0_i32, %c0_i32_0 : i32, i32
  }
  func.func @transform_4(%arg0: i32) -> (i32, i32) {
    %c0_i32 = arith.constant 0 : i32
    %c0_i32_0 = arith.constant 0 : i32
    %c0_i32_1 = arith.constant 0 : i32
    return %c0_i32, %c0_i32_0 : i32, i32
  }
  func.func @transform_5(%arg0: i32) -> (i32, i32) {
    %c0_i32 = arith.constant 0 : i32
    %c0_i32_0 = arith.constant 0 : i32
    %c0_i32_1 = arith.constant 0 : i32
    return %c0_i32, %c0_i32_0 : i32, i32
  }
  func.func @transform_6(%arg0: i32) -> (i32, i32) {
    %c0_i32 = arith.constant 0 : i32
    %c0_i32_0 = arith.constant 0 : i32
    %c0_i32_1 = arith.constant 0 : i32
    return %c0_i32, %c0_i32_0 : i32, i32
  }
  func.func @transform_7(%arg0: i32) -> (i32, i32) {
    %c0_i32 = arith.constant 0 : i32
    %c0_i32_0 = arith.constant 0 : i32
    %c0_i32_1 = arith.constant 0 : i32
    return %c0_i32, %c0_i32_0 : i32, i32
  }
  func.func @transform_8(%arg0: i32) -> (i32, i32) {
    %c0_i32 = arith.constant 0 : i32
    %c0_i32_0 = arith.constant 0 : i32
    %c0_i32_1 = arith.constant 0 : i32
    return %c0_i32, %c0_i32_0 : i32, i32
  }
  func.func @transform_9(%arg0: i32) -> (i32, i32) {
    %c0_i32 = arith.constant 0 : i32
    %c0_i32_0 = arith.constant 0 : i32
    %c0_i32_1 = arith.constant 0 : i32
    return %c0_i32, %c0_i32_0 : i32, i32
  }
  func.func @transform_10(%arg0: i32) -> (i32, i32) {
    %c0_i32 = arith.constant 0 : i32
    %c0_i32_0 = arith.constant 0 : i32
    %c0_i32_1 = arith.constant 0 : i32
    return %c0_i32, %c0_i32_0 : i32, i32
  }
  func.func @transform_11(%arg0: i32) -> (i32, i32) {
    %c0_i32 = arith.constant 0 : i32
    %c0_i32_0 = arith.constant 0 : i32
    %c0_i32_1 = arith.constant 0 : i32
    return %c0_i32, %c0_i32_0 : i32, i32
  }
}

module attributes {stable_mosaic.version = 11 : i64} {
  func.func @_decoder_stack_kernel(%arg0: i32, %arg1: memref<16x128xf32, #tpu.memory_space<vmem>>, %arg2: memref<16x256xf32, #tpu.memory_space<vmem>>, %arg3: memref<16x256xf32, #tpu.memory_space<vmem>>, %arg4: memref<1x1x128xf32, #tpu.memory_space<vmem>>, %arg5: memref<1x1x128xf32, #tpu.memory_space<vmem>>, %arg6: memref<1x128x384xbf16, #tpu.memory_space<vmem>>, %arg7: memref<1x1x384xf32, #tpu.memory_space<vmem>>, %arg8: memref<1x128x128xbf16, #tpu.memory_space<vmem>>, %arg9: memref<1x1x128xf32, #tpu.memory_space<vmem>>, %arg10: memref<1x1x128xf32, #tpu.memory_space<vmem>>, %arg11: memref<1x1x128xf32, #tpu.memory_space<vmem>>, %arg12: memref<1x128x512xbf16, #tpu.memory_space<vmem>>, %arg13: memref<1x1x512xf32, #tpu.memory_space<vmem>>, %arg14: memref<1x512x128xbf16, #tpu.memory_space<vmem>>, %arg15: memref<1x1x128xf32, #tpu.memory_space<vmem>>, %arg16: memref<1x128xf32, #tpu.memory_space<vmem>>, %arg17: memref<1x128xf32, #tpu.memory_space<vmem>>, %arg18: memref<16x128xf32, #tpu.memory_space<vmem>>, %arg19: memref<16x128xf32, #tpu.memory_space<vmem>>) attributes {dimension_semantics = [#tpu.dimension_semantics<arbitrary>], iteration_bounds = array<i64: 2>, scalar_prefetch = 0 : i64, scratch_operands = 1 : i64, tpu.core_type = #tpu.core_type<tc>, window_params = [{pipeline_mode = #tpu.pipeline_mode<synchronous>, transform_indices = @transform_0, window_bounds = array<i64: 16, 128>}, {pipeline_mode = #tpu.pipeline_mode<synchronous>, transform_indices = @transform_1, window_bounds = array<i64: 16, 256>}, {pipeline_mode = #tpu.pipeline_mode<synchronous>, transform_indices = @transform_2, window_bounds = array<i64: 16, 256>}, {transform_indices = @transform_3, window_bounds = array<i64: 1, 1, 128>}, {transform_indices = @transform_4, window_bounds = array<i64: 1, 1, 128>}, {transform_indices = @transform_5, window_bounds = array<i64: 1, 128, 384>}, {transform_indices = @transform_6, window_bounds = array<i64: 1, 1, 384>}, {transform_indices = @transform_7, window_bounds = array<i64: 1, 128, 128>}, {transform_indices = @transform_8, window_bounds = array<i64: 1, 1, 128>}, {transform_indices = @transform_9, window_bounds = array<i64: 1, 1, 128>}, {transform_indices = @transform_10, window_bounds = array<i64: 1, 1, 128>}, {transform_indices = @transform_11, window_bounds = array<i64: 1, 128, 512>}, {transform_indices = @transform_12, window_bounds = array<i64: 1, 1, 512>}, {transform_indices = @transform_13, window_bounds = array<i64: 1, 512, 128>}, {transform_indices = @transform_14, window_bounds = array<i64: 1, 1, 128>}, {pipeline_mode = #tpu.pipeline_mode<synchronous>, transform_indices = @transform_15, window_bounds = array<i64: 1, 128>}, {pipeline_mode = #tpu.pipeline_mode<synchronous>, transform_indices = @transform_16, window_bounds = array<i64: 1, 128>}, {pipeline_mode = #tpu.pipeline_mode<synchronous>, transform_indices = @transform_17, window_bounds = array<i64: 16, 128>}]} {
    %c0_i32 = arith.constant 0 : i32
    %0 = arith.cmpi eq, %arg0, %c0_i32 : i32
    %1 = arith.extui %0 : i1 to i32
    %c0_i32_0 = arith.constant 0 : i32
    %2 = arith.cmpi ne, %1, %c0_i32_0 : i32
    scf.if %2 {
      %c0_79 = arith.constant 0 : index
      %c0_80 = arith.constant 0 : index
      %212 = vector.load %arg1[%c0_79, %c0_80] : memref<16x128xf32, #tpu.memory_space<vmem>>, vector<16x128xf32>
      %c0_81 = arith.constant 0 : index
      %c0_82 = arith.constant 0 : index
      %213 = vector.load %arg19[%c0_81, %c0_82] : memref<16x128xf32, #tpu.memory_space<vmem>>, vector<16x128xf32>
      tpu.vector_store %arg19[%c0_81, %c0_82], %212 {strides = array<i32>} : memref<16x128xf32, #tpu.memory_space<vmem>>, vector<16x128xf32>,
    } else {
    }
    %c0 = arith.constant 0 : index
    %c0_1 = arith.constant 0 : index
    %3 = vector.load %arg19[%c0, %c0_1] : memref<16x128xf32, #tpu.memory_space<vmem>>, vector<16x128xf32>
    %c0_2 = arith.constant 0 : index
    %c0_3 = arith.constant 0 : index
    %c0_4 = arith.constant 0 : index
    %4 = vector.load %arg4[%c0_2, %c0_3, %c0_4] : memref<1x1x128xf32, #tpu.memory_space<vmem>>, vector<1x1x128xf32>
    %5 = vector.shape_cast %4 : vector<1x1x128xf32> to vector<1x128xf32>
    %c0_5 = arith.constant 0 : index
    %c0_6 = arith.constant 0 : index
    %c0_7 = arith.constant 0 : index
    %6 = vector.load %arg5[%c0_5, %c0_6, %c0_7] : memref<1x1x128xf32, #tpu.memory_space<vmem>>, vector<1x1x128xf32>
    %7 = vector.shape_cast %6 : vector<1x1x128xf32> to vector<1x128xf32>
    %cst = arith.constant dense<0.000000e+00> : vector<16xf32>
    %8 = vector.multi_reduction <add>, %3, %cst [1] : vector<16x128xf32> to vector<16xf32>
    %9 = vector.shape_cast %8 : vector<16xf32> to vector<16x1xf32>
    %cst_8 = arith.constant 1.280000e+02 : f32
    %10 = vector.broadcast %cst_8 : f32 to vector<16x1xf32>
    %11 = arith.divf %9, %10 : vector<16x1xf32>
    %12 = vector.broadcast %11 : vector<16x1xf32> to vector<16x128xf32>
    %13 = arith.subf %3, %12 : vector<16x128xf32>
    %14 = arith.mulf %13, %13 : vector<16x128xf32>
    %cst_9 = arith.constant dense<0.000000e+00> : vector<16xf32>
    %15 = vector.multi_reduction <add>, %14, %cst_9 [1] : vector<16x128xf32> to vector<16xf32>
    %16 = vector.shape_cast %15 : vector<16xf32> to vector<16x1xf32>
    %cst_10 = arith.constant 1.280000e+02 : f32
    %17 = vector.broadcast %cst_10 : f32 to vector<16x1xf32>
    %18 = arith.divf %16, %17 : vector<16x1xf32>
    %19 = vector.broadcast %11 : vector<16x1xf32> to vector<16x128xf32>
    %20 = arith.subf %3, %19 : vector<16x128xf32>
    %cst_11 = arith.constant 9.99999974E-6 : f32
    %21 = vector.broadcast %cst_11 : f32 to vector<16x1xf32>
    %22 = arith.addf %18, %21 : vector<16x1xf32>
    %23 = math.rsqrt %22 : vector<16x1xf32>
    %24 = vector.broadcast %23 : vector<16x1xf32> to vector<16x128xf32>
    %25 = arith.mulf %20, %24 : vector<16x128xf32>
    %26 = vector.broadcast %5 : vector<1x128xf32> to vector<16x128xf32>
    %27 = arith.mulf %25, %26 : vector<16x128xf32>
    %28 = vector.broadcast %7 : vector<1x128xf32> to vector<16x128xf32>
    %29 = arith.addf %27, %28 : vector<16x128xf32>
    %30 = arith.truncf %29 : vector<16x128xf32> to vector<16x128xbf16>
    %c0_12 = arith.constant 0 : index
    %c0_13 = arith.constant 0 : index
    %c0_14 = arith.constant 0 : index
    %31 = vector.load %arg6[%c0_12, %c0_13, %c0_14] : memref<1x128x384xbf16, #tpu.memory_space<vmem>>, vector<1x128x384xbf16>
    %32 = vector.shape_cast %31 : vector<1x128x384xbf16> to vector<128x384xbf16>
    %cst_15 = arith.constant dense<0.000000e+00> : vector<16x384xf32>
    %33 = tpu.matmul %30, %32, %cst_15 {dimension_numbers = #tpu.dot_dimension_numbers<[1], [0], [0], [1], [0, 0, 1, 1], [], []>} : vector<16x128xbf16>, vector<128x384xbf16>, vector<16x384xf32> -> vector<16x384xf32>
    %c0_16 = arith.constant 0 : index
    %c0_17 = arith.constant 0 : index
    %c0_18 = arith.constant 0 : index
    %34 = vector.load %arg7[%c0_16, %c0_17, %c0_18] : memref<1x1x384xf32, #tpu.memory_space<vmem>>, vector<1x1x384xf32>
    %35 = vector.shape_cast %34 : vector<1x1x384xf32> to vector<1x384xf32>
    %36 = vector.broadcast %35 : vector<1x384xf32> to vector<16x384xf32>
    %37 = arith.addf %33, %36 : vector<16x384xf32>
    %38 = vector.extract_strided_slice %37 {offsets = [0, 0], sizes = [16, 256], strides = [1, 1]} : vector<16x384xf32> to vector<16x256xf32>
    %39 = tpu.iota {dimensions = array<i32: 1>} : vector<1x256xi32>
    %c32_i32 = arith.constant 32 : i32
    %c0_i32_19 = arith.constant 0 : i32
    %40 = arith.cmpi eq, %c32_i32, %c0_i32_19 : i32
    %c1_i32 = arith.constant 1 : i32
    %41 = arith.select %40, %c1_i32, %c32_i32 : i32
    %42 = vector.broadcast %41 : i32 to vector<1x256xi32>
    %43 = arith.remsi %39, %42 : vector<1x256xi32>
    %c0_i32_20 = arith.constant 0 : i32
    %44 = vector.broadcast %c0_i32_20 : i32 to vector<1x256xi32>
    %45 = arith.cmpi ne, %43, %44 : vector<1x256xi32>
    %c0_i32_21 = arith.constant 0 : i32
    %46 = vector.broadcast %c0_i32_21 : i32 to vector<1x256xi32>
    %47 = arith.cmpi slt, %43, %46 : vector<1x256xi32>
    %c0_i32_22 = arith.constant 0 : i32
    %48 = arith.cmpi slt, %41, %c0_i32_22 : i32
    %49 = vector.broadcast %48 : i1 to vector<1x256xi1>
    %50 = vector.broadcast %49 : vector<1x256xi1> to vector<1x256xi1>
    %51 = arith.xori %47, %50 : vector<1x256xi1>
    %52 = arith.andi %51, %45 : vector<1x256xi1>
    %53 = vector.broadcast %41 : i32 to vector<1x256xi32>
    %54 = arith.addi %43, %53 : vector<1x256xi32>
    %55 = arith.select %52, %54, %43 : vector<1x256xi1>, vector<1x256xi32>
    %c16_i32 = arith.constant 16 : i32
    %56 = vector.broadcast %c16_i32 : i32 to vector<1x256xi32>
    %57 = arith.cmpi slt, %55, %56 : vector<1x256xi32>
    %c16_i32_23 = arith.constant 16 : i32
    %58 = tpu.dynamic_rotate %38 by %c16_i32_23 dim 1 : vector<16x256xf32>, i32 -> vector<16x256xf32>
    %c240_i32 = arith.constant 240 : i32
    %59 = tpu.dynamic_rotate %38 by %c240_i32 dim 1 : vector<16x256xf32>, i32 -> vector<16x256xf32>
    %cst_24 = arith.constant 0.000000e+00 : f32
    %60 = vector.broadcast %cst_24 : f32 to vector<16x256xf32>
    %61 = arith.subf %60, %59 : vector<16x256xf32>
    %62 = vector.shape_cast %57 : vector<1x256xi1> to vector<1x256xi1>
    %63 = vector.broadcast %62 : vector<1x256xi1> to vector<16x256xi1>
    %64 = arith.select %63, %61, %58 : vector<16x256xi1>, vector<16x256xf32>
    %c0_25 = arith.constant 0 : index
    %c0_26 = arith.constant 0 : index
    %65 = vector.load %arg2[%c0_25, %c0_26] : memref<16x256xf32, #tpu.memory_space<vmem>>, vector<16x256xf32>
    %66 = arith.mulf %38, %65 : vector<16x256xf32>
    %c0_27 = arith.constant 0 : index
    %c0_28 = arith.constant 0 : index
    %67 = vector.load %arg3[%c0_27, %c0_28] : memref<16x256xf32, #tpu.memory_space<vmem>>, vector<16x256xf32>
    %68 = arith.mulf %64, %67 : vector<16x256xf32>
    %69 = arith.addf %66, %68 : vector<16x256xf32>
    %70 = arith.truncf %69 : vector<16x256xf32> to vector<16x256xbf16>
    %71 = vector.extract_strided_slice %37 {offsets = [0, 256], sizes = [16, 128], strides = [1, 1]} : vector<16x384xf32> to vector<16x128xf32>
    %72 = arith.truncf %71 : vector<16x128xf32> to vector<16x128xbf16>
    %73 = vector.extract_strided_slice %70 {offsets = [0, 0], sizes = [16, 32], strides = [1, 1]} : vector<16x256xbf16> to vector<16x32xbf16>
    %74 = vector.extract_strided_slice %70 {offsets = [0, 32], sizes = [16, 32], strides = [1, 1]} : vector<16x256xbf16> to vector<16x32xbf16>
    %75 = vector.extract_strided_slice %70 {offsets = [0, 64], sizes = [16, 32], strides = [1, 1]} : vector<16x256xbf16> to vector<16x32xbf16>
    %76 = vector.extract_strided_slice %70 {offsets = [0, 96], sizes = [16, 32], strides = [1, 1]} : vector<16x256xbf16> to vector<16x32xbf16>
    %77 = vector.shape_cast %73 : vector<16x32xbf16> to vector<1x16x32xbf16>
    %78 = vector.shape_cast %74 : vector<16x32xbf16> to vector<1x16x32xbf16>
    %79 = vector.shape_cast %75 : vector<16x32xbf16> to vector<1x16x32xbf16>
    %80 = vector.shape_cast %76 : vector<16x32xbf16> to vector<1x16x32xbf16>
    %81 = tpu.concatenate %77, %78, %79, %80 in 0 : vector<1x16x32xbf16>, vector<1x16x32xbf16>, vector<1x16x32xbf16>, vector<1x16x32xbf16> -> vector<4x16x32xbf16>
    %82 = vector.extract_strided_slice %70 {offsets = [0, 128], sizes = [16, 32], strides = [1, 1]} : vector<16x256xbf16> to vector<16x32xbf16>
    %83 = vector.extract_strided_slice %70 {offsets = [0, 160], sizes = [16, 32], strides = [1, 1]} : vector<16x256xbf16> to vector<16x32xbf16>
    %84 = vector.extract_strided_slice %70 {offsets = [0, 192], sizes = [16, 32], strides = [1, 1]} : vector<16x256xbf16> to vector<16x32xbf16>
    %85 = vector.extract_strided_slice %70 {offsets = [0, 224], sizes = [16, 32], strides = [1, 1]} : vector<16x256xbf16> to vector<16x32xbf16>
    %86 = vector.shape_cast %82 : vector<16x32xbf16> to vector<1x16x32xbf16>
    %87 = vector.shape_cast %83 : vector<16x32xbf16> to vector<1x16x32xbf16>
    %88 = vector.shape_cast %84 : vector<16x32xbf16> to vector<1x16x32xbf16>
    %89 = vector.shape_cast %85 : vector<16x32xbf16> to vector<1x16x32xbf16>
    %90 = tpu.concatenate %86, %87, %88, %89 in 0 : vector<1x16x32xbf16>, vector<1x16x32xbf16>, vector<1x16x32xbf16>, vector<1x16x32xbf16> -> vector<4x16x32xbf16>
    %91 = vector.extract_strided_slice %72 {offsets = [0, 0], sizes = [16, 32], strides = [1, 1]} : vector<16x128xbf16> to vector<16x32xbf16>
    %92 = vector.extract_strided_slice %72 {offsets = [0, 32], sizes = [16, 32], strides = [1, 1]} : vector<16x128xbf16> to vector<16x32xbf16>
    %93 = vector.extract_strided_slice %72 {offsets = [0, 64], sizes = [16, 32], strides = [1, 1]} : vector<16x128xbf16> to vector<16x32xbf16>
    %94 = vector.extract_strided_slice %72 {offsets = [0, 96], sizes = [16, 32], strides = [1, 1]} : vector<16x128xbf16> to vector<16x32xbf16>
    %95 = vector.shape_cast %91 : vector<16x32xbf16> to vector<1x16x32xbf16>
    %96 = vector.shape_cast %92 : vector<16x32xbf16> to vector<1x16x32xbf16>
    %97 = vector.shape_cast %93 : vector<16x32xbf16> to vector<1x16x32xbf16>
    %98 = vector.shape_cast %94 : vector<16x32xbf16> to vector<1x16x32xbf16>
    %99 = tpu.concatenate %95, %96, %97, %98 in 0 : vector<1x16x32xbf16>, vector<1x16x32xbf16>, vector<1x16x32xbf16>, vector<1x16x32xbf16> -> vector<4x16x32xbf16>
    "tpu.trace_start"() <{level = 10 : i32, message = "hqd,hkd->hqk"}> : () -> ()
    %cst_29 = arith.constant dense<0.000000e+00> : vector<4x16x16xf32>
    %100 = tpu.matmul %81, %90, %cst_29 {dimension_numbers = #tpu.dot_dimension_numbers<[2], [2], [1], [1], [0, 0, 0, 1, 1, 1], [0], [0]>} : vector<4x16x32xbf16>, vector<4x16x32xbf16>, vector<4x16x16xf32> -> vector<4x16x16xf32>
    "tpu.trace_stop"() : () -> ()
    %cst_30 = arith.constant 0.176776692 : f32
    %101 = vector.broadcast %cst_30 : f32 to vector<4x16x16xf32>
    %102 = arith.mulf %100, %101 : vector<4x16x16xf32>
    %103 = tpu.iota {dimensions = array<i32: 0>} : vector<16x16xi32>
    %104 = tpu.iota {dimensions = array<i32: 1>} : vector<16x16xi32>
    %105 = arith.cmpi sge, %103, %104 : vector<16x16xi32>
    %106 = vector.shape_cast %105 : vector<16x16xi1> to vector<1x16x16xi1>
    %cst_31 = arith.constant -1.000000e+30 : f32
    %107 = vector.shape_cast %106 : vector<1x16x16xi1> to vector<1x16x16xi1>
    %108 = vector.broadcast %107 : vector<1x16x16xi1> to vector<4x16x16xi1>
    %109 = vector.broadcast %cst_31 : f32 to vector<4x16x16xf32>
    %110 = arith.select %108, %102, %109 : vector<4x16x16xi1>, vector<4x16x16xf32>
    %cst_32 = arith.constant dense<0xFF800000> : vector<4x16xf32>
    %111 = vector.multi_reduction <maximumf>, %110, %cst_32 [2] : vector<4x16x16xf32> to vector<4x16xf32>
    %112 = vector.shape_cast %111 : vector<4x16xf32> to vector<4x16x1xf32>
    %113 = vector.broadcast %112 : vector<4x16x1xf32> to vector<4x16x16xf32>
    %114 = arith.subf %110, %113 : vector<4x16x16xf32>
    %115 = math.exp %114 : vector<4x16x16xf32>
    %cst_33 = arith.constant dense<0.000000e+00> : vector<4x16xf32>
    %116 = vector.multi_reduction <add>, %115, %cst_33 [2] : vector<4x16x16xf32> to vector<4x16xf32>
    %117 = vector.shape_cast %116 : vector<4x16xf32> to vector<4x16x1xf32>
    %118 = tpu.reciprocal %117 {approx = true} : vector<4x16x1xf32> -> vector<4x16x1xf32>
    %119 = vector.broadcast %118 : vector<4x16x1xf32> to vector<4x16x16xf32>
    %120 = arith.mulf %115, %119 : vector<4x16x16xf32>
    %121 = arith.truncf %120 : vector<4x16x16xf32> to vector<4x16x16xbf16>
    "tpu.trace_start"() <{level = 10 : i32, message = "hqk,hkd->hqd"}> : () -> ()
    %cst_34 = arith.constant dense<0.000000e+00> : vector<4x16x32xf32>
    %122 = tpu.matmul %121, %99, %cst_34 {dimension_numbers = #tpu.dot_dimension_numbers<[2], [1], [1], [2], [0, 0, 0, 1, 1, 2], [0], [0]>} : vector<4x16x16xbf16>, vector<4x16x32xbf16>, vector<4x16x32xf32> -> vector<4x16x32xf32>
    "tpu.trace_stop"() : () -> ()
    %c0_35 = arith.constant 0 : index
    %c0_36 = arith.constant 0 : index
    %c0_37 = arith.constant 0 : index
    %123 = vector.load %arg8[%c0_35, %c0_36, %c0_37] : memref<1x128x128xbf16, #tpu.memory_space<vmem>>, vector<1x128x128xbf16>
    %124 = vector.shape_cast %123 : vector<1x128x128xbf16> to vector<128x128xbf16>
    %125 = arith.truncf %122 : vector<4x16x32xf32> to vector<4x16x32xbf16>
    %cst_38 = arith.constant 0.000000e+00 : f32
    %126 = vector.broadcast %cst_38 : f32 to vector<16x128xf32>
    %127 = vector.extract_strided_slice %125 {offsets = [0, 0, 0], sizes = [1, 16, 32], strides = [1, 1, 1]} : vector<4x16x32xbf16> to vector<1x16x32xbf16>
    %128 = vector.shape_cast %127 : vector<1x16x32xbf16> to vector<16x32xbf16>
    %129 = vector.extract_strided_slice %124 {offsets = [0, 0], sizes = [32, 128], strides = [1, 1]} : vector<128x128xbf16> to vector<32x128xbf16>
    %cst_39 = arith.constant dense<0.000000e+00> : vector<16x128xf32>
    %130 = tpu.matmul %128, %129, %cst_39 {dimension_numbers = #tpu.dot_dimension_numbers<[1], [0], [0], [1], [0, 0, 1, 1], [], []>} : vector<16x32xbf16>, vector<32x128xbf16>, vector<16x128xf32> -> vector<16x128xf32>
    %131 = arith.addf %126, %130 : vector<16x128xf32>
    %132 = vector.extract_strided_slice %125 {offsets = [1, 0, 0], sizes = [1, 16, 32], strides = [1, 1, 1]} : vector<4x16x32xbf16> to vector<1x16x32xbf16>
    %133 = vector.shape_cast %132 : vector<1x16x32xbf16> to vector<16x32xbf16>
    %134 = vector.extract_strided_slice %124 {offsets = [32, 0], sizes = [32, 128], strides = [1, 1]} : vector<128x128xbf16> to vector<32x128xbf16>
    %cst_40 = arith.constant dense<0.000000e+00> : vector<16x128xf32>
    %135 = tpu.matmul %133, %134, %cst_40 {dimension_numbers = #tpu.dot_dimension_numbers<[1], [0], [0], [1], [0, 0, 1, 1], [], []>} : vector<16x32xbf16>, vector<32x128xbf16>, vector<16x128xf32> -> vector<16x128xf32>
    %136 = arith.addf %131, %135 : vector<16x128xf32>
    %137 = vector.extract_strided_slice %125 {offsets = [2, 0, 0], sizes = [1, 16, 32], strides = [1, 1, 1]} : vector<4x16x32xbf16> to vector<1x16x32xbf16>
    %138 = vector.shape_cast %137 : vector<1x16x32xbf16> to vector<16x32xbf16>
    %139 = vector.extract_strided_slice %124 {offsets = [64, 0], sizes = [32, 128], strides = [1, 1]} : vector<128x128xbf16> to vector<32x128xbf16>
    %cst_41 = arith.constant dense<0.000000e+00> : vector<16x128xf32>
    %140 = tpu.matmul %138, %139, %cst_41 {dimension_numbers = #tpu.dot_dimension_numbers<[1], [0], [0], [1], [0, 0, 1, 1], [], []>} : vector<16x32xbf16>, vector<32x128xbf16>, vector<16x128xf32> -> vector<16x128xf32>
    %141 = arith.addf %136, %140 : vector<16x128xf32>
    %142 = vector.extract_strided_slice %125 {offsets = [3, 0, 0], sizes = [1, 16, 32], strides = [1, 1, 1]} : vector<4x16x32xbf16> to vector<1x16x32xbf16>
    %143 = vector.shape_cast %142 : vector<1x16x32xbf16> to vector<16x32xbf16>
    %144 = vector.extract_strided_slice %124 {offsets = [96, 0], sizes = [32, 128], strides = [1, 1]} : vector<128x128xbf16> to vector<32x128xbf16>
    %cst_42 = arith.constant dense<0.000000e+00> : vector<16x128xf32>
    %145 = tpu.matmul %143, %144, %cst_42 {dimension_numbers = #tpu.dot_dimension_numbers<[1], [0], [0], [1], [0, 0, 1, 1], [], []>} : vector<16x32xbf16>, vector<32x128xbf16>, vector<16x128xf32> -> vector<16x128xf32>
    %146 = arith.addf %141, %145 : vector<16x128xf32>
    %147 = arith.addf %3, %146 : vector<16x128xf32>
    %c0_43 = arith.constant 0 : index
    %c0_44 = arith.constant 0 : index
    %c0_45 = arith.constant 0 : index
    %148 = vector.load %arg9[%c0_43, %c0_44, %c0_45] : memref<1x1x128xf32, #tpu.memory_space<vmem>>, vector<1x1x128xf32>
    %149 = vector.shape_cast %148 : vector<1x1x128xf32> to vector<1x128xf32>
    %150 = vector.broadcast %149 : vector<1x128xf32> to vector<16x128xf32>
    %151 = arith.addf %147, %150 : vector<16x128xf32>
    %c0_46 = arith.constant 0 : index
    %c0_47 = arith.constant 0 : index
    %c0_48 = arith.constant 0 : index
    %152 = vector.load %arg10[%c0_46, %c0_47, %c0_48] : memref<1x1x128xf32, #tpu.memory_space<vmem>>, vector<1x1x128xf32>
    %153 = vector.shape_cast %152 : vector<1x1x128xf32> to vector<1x128xf32>
    %c0_49 = arith.constant 0 : index
    %c0_50 = arith.constant 0 : index
    %c0_51 = arith.constant 0 : index
    %154 = vector.load %arg11[%c0_49, %c0_50, %c0_51] : memref<1x1x128xf32, #tpu.memory_space<vmem>>, vector<1x1x128xf32>
    %155 = vector.shape_cast %154 : vector<1x1x128xf32> to vector<1x128xf32>
    %cst_52 = arith.constant dense<0.000000e+00> : vector<16xf32>
    %156 = vector.multi_reduction <add>, %151, %cst_52 [1] : vector<16x128xf32> to vector<16xf32>
    %157 = vector.shape_cast %156 : vector<16xf32> to vector<16x1xf32>
    %cst_53 = arith.constant 1.280000e+02 : f32
    %158 = vector.broadcast %cst_53 : f32 to vector<16x1xf32>
    %159 = arith.divf %157, %158 : vector<16x1xf32>
    %160 = vector.broadcast %159 : vector<16x1xf32> to vector<16x128xf32>
    %161 = arith.subf %151, %160 : vector<16x128xf32>
    %162 = arith.mulf %161, %161 : vector<16x128xf32>
    %cst_54 = arith.constant dense<0.000000e+00> : vector<16xf32>
    %163 = vector.multi_reduction <add>, %162, %cst_54 [1] : vector<16x128xf32> to vector<16xf32>
    %164 = vector.shape_cast %163 : vector<16xf32> to vector<16x1xf32>
    %cst_55 = arith.constant 1.280000e+02 : f32
    %165 = vector.broadcast %cst_55 : f32 to vector<16x1xf32>
    %166 = arith.divf %164, %165 : vector<16x1xf32>
    %167 = vector.broadcast %159 : vector<16x1xf32> to vector<16x128xf32>
    %168 = arith.subf %151, %167 : vector<16x128xf32>
    %cst_56 = arith.constant 9.99999974E-6 : f32
    %169 = vector.broadcast %cst_56 : f32 to vector<16x1xf32>
    %170 = arith.addf %166, %169 : vector<16x1xf32>
    %171 = math.rsqrt %170 : vector<16x1xf32>
    %172 = vector.broadcast %171 : vector<16x1xf32> to vector<16x128xf32>
    %173 = arith.mulf %168, %172 : vector<16x128xf32>
    %174 = vector.broadcast %153 : vector<1x128xf32> to vector<16x128xf32>
    %175 = arith.mulf %173, %174 : vector<16x128xf32>
    %176 = vector.broadcast %155 : vector<1x128xf32> to vector<16x128xf32>
    %177 = arith.addf %175, %176 : vector<16x128xf32>
    %178 = arith.truncf %177 : vector<16x128xf32> to vector<16x128xbf16>
    %c0_57 = arith.constant 0 : index
    %c0_58 = arith.constant 0 : index
    %c0_59 = arith.constant 0 : index
    %179 = vector.load %arg12[%c0_57, %c0_58, %c0_59] : memref<1x128x512xbf16, #tpu.memory_space<vmem>>, vector<1x128x512xbf16>
    %180 = vector.shape_cast %179 : vector<1x128x512xbf16> to vector<128x512xbf16>
    %cst_60 = arith.constant dense<0.000000e+00> : vector<16x512xf32>
    %181 = tpu.matmul %178, %180, %cst_60 {dimension_numbers = #tpu.dot_dimension_numbers<[1], [0], [0], [1], [0, 0, 1, 1], [], []>} : vector<16x128xbf16>, vector<128x512xbf16>, vector<16x512xf32> -> vector<16x512xf32>
    %c0_61 = arith.constant 0 : index
    %c0_62 = arith.constant 0 : index
    %c0_63 = arith.constant 0 : index
    %182 = vector.load %arg13[%c0_61, %c0_62, %c0_63] : memref<1x1x512xf32, #tpu.memory_space<vmem>>, vector<1x1x512xf32>
    %183 = vector.shape_cast %182 : vector<1x1x512xf32> to vector<1x512xf32>
    %184 = vector.broadcast %183 : vector<1x512xf32> to vector<16x512xf32>
    %185 = arith.addf %181, %184 : vector<16x512xf32>
    %cst_64 = arith.constant 5.000000e-01 : f32
    %186 = vector.broadcast %cst_64 : f32 to vector<16x512xf32>
    %187 = arith.mulf %186, %185 : vector<16x512xf32>
    %cst_65 = arith.constant 4.471500e-02 : f32
    %188 = vector.broadcast %cst_65 : f32 to vector<16x512xf32>
    %189 = arith.mulf %188, %185 : vector<16x512xf32>
    %190 = arith.mulf %189, %185 : vector<16x512xf32>
    %191 = arith.mulf %190, %185 : vector<16x512xf32>
    %192 = arith.addf %185, %191 : vector<16x512xf32>
    %cst_66 = arith.constant 0.797884583 : f32
    %193 = vector.broadcast %cst_66 : f32 to vector<16x512xf32>
    %194 = arith.mulf %193, %192 : vector<16x512xf32>
    %195 = math.tanh %194 : vector<16x512xf32>
    %cst_67 = arith.constant 1.000000e+00 : f32
    %196 = vector.broadcast %cst_67 : f32 to vector<16x512xf32>
    %197 = arith.addf %196, %195 : vector<16x512xf32>
    %198 = arith.mulf %187, %197 : vector<16x512xf32>
    %199 = arith.truncf %198 : vector<16x512xf32> to vector<16x512xbf16>
    %c0_68 = arith.constant 0 : index
    %c0_69 = arith.constant 0 : index
    %c0_70 = arith.constant 0 : index
    %200 = vector.load %arg14[%c0_68, %c0_69, %c0_70] : memref<1x512x128xbf16, #tpu.memory_space<vmem>>, vector<1x512x128xbf16>
    %201 = vector.shape_cast %200 : vector<1x512x128xbf16> to vector<512x128xbf16>
    %cst_71 = arith.constant dense<0.000000e+00> : vector<16x128xf32>
    %202 = tpu.matmul %199, %201, %cst_71 {dimension_numbers = #tpu.dot_dimension_numbers<[1], [0], [0], [1], [0, 0, 1, 1], [], []>} : vector<16x512xbf16>, vector<512x128xbf16>, vector<16x128xf32> -> vector<16x128xf32>
    %c0_72 = arith.constant 0 : index
    %c0_73 = arith.constant 0 : index
    %c0_74 = arith.constant 0 : index
    %203 = vector.load %arg15[%c0_72, %c0_73, %c0_74] : memref<1x1x128xf32, #tpu.memory_space<vmem>>, vector<1x1x128xf32>
    %204 = vector.shape_cast %203 : vector<1x1x128xf32> to vector<1x128xf32>
    %205 = vector.broadcast %204 : vector<1x128xf32> to vector<16x128xf32>
    %206 = arith.addf %202, %205 : vector<16x128xf32>
    %207 = arith.addf %151, %206 : vector<16x128xf32>
    %c0_75 = arith.constant 0 : index
    %c0_76 = arith.constant 0 : index
    %208 = vector.load %arg19[%c0_75, %c0_76] : memref<16x128xf32, #tpu.memory_space<vmem>>, vector<16x128xf32>
    tpu.vector_store %arg19[%c0_75, %c0_76], %207 {strides = array<i32>} : memref<16x128xf32, #tpu.memory_space<vmem>>, vector<16x128xf32>,
    %c1_i32_77 = arith.constant 1 : i32
    %209 = arith.cmpi eq, %arg0, %c1_i32_77 : i32
    %210 = arith.extui %209 : i1 to i32
    %c0_i32_78 = arith.constant 0 : i32
    %211 = arith.cmpi ne, %210, %c0_i32_78 : i32
    scf.if %211 {
      %c0_79 = arith.constant 0 : index
      %c0_80 = arith.constant 0 : index
      %212 = vector.load %arg16[%c0_79, %c0_80] : memref<1x128xf32, #tpu.memory_space<vmem>>, vector<1x128xf32>
      %c0_81 = arith.constant 0 : index
      %c0_82 = arith.constant 0 : index
      %213 = vector.load %arg17[%c0_81, %c0_82] : memref<1x128xf32, #tpu.memory_space<vmem>>, vector<1x128xf32>
      %cst_83 = arith.constant dense<0.000000e+00> : vector<16xf32>
      %214 = vector.multi_reduction <add>, %207, %cst_83 [1] : vector<16x128xf32> to vector<16xf32>
      %215 = vector.shape_cast %214 : vector<16xf32> to vector<16x1xf32>
      %cst_84 = arith.constant 1.280000e+02 : f32
      %216 = vector.broadcast %cst_84 : f32 to vector<16x1xf32>
      %217 = arith.divf %215, %216 : vector<16x1xf32>
      %218 = vector.broadcast %217 : vector<16x1xf32> to vector<16x128xf32>
      %219 = arith.subf %207, %218 : vector<16x128xf32>
      %220 = arith.mulf %219, %219 : vector<16x128xf32>
      %cst_85 = arith.constant dense<0.000000e+00> : vector<16xf32>
      %221 = vector.multi_reduction <add>, %220, %cst_85 [1] : vector<16x128xf32> to vector<16xf32>
      %222 = vector.shape_cast %221 : vector<16xf32> to vector<16x1xf32>
      %cst_86 = arith.constant 1.280000e+02 : f32
      %223 = vector.broadcast %cst_86 : f32 to vector<16x1xf32>
      %224 = arith.divf %222, %223 : vector<16x1xf32>
      %225 = vector.broadcast %217 : vector<16x1xf32> to vector<16x128xf32>
      %226 = arith.subf %207, %225 : vector<16x128xf32>
      %cst_87 = arith.constant 9.99999974E-6 : f32
      %227 = vector.broadcast %cst_87 : f32 to vector<16x1xf32>
      %228 = arith.addf %224, %227 : vector<16x1xf32>
      %229 = math.rsqrt %228 : vector<16x1xf32>
      %230 = vector.broadcast %229 : vector<16x1xf32> to vector<16x128xf32>
      %231 = arith.mulf %226, %230 : vector<16x128xf32>
      %232 = vector.broadcast %212 : vector<1x128xf32> to vector<16x128xf32>
      %233 = arith.mulf %231, %232 : vector<16x128xf32>
      %234 = vector.broadcast %213 : vector<1x128xf32> to vector<16x128xf32>
      %235 = arith.addf %233, %234 : vector<16x128xf32>
      %c0_88 = arith.constant 0 : index
      %c0_89 = arith.constant 0 : index
      %236 = vector.load %arg18[%c0_88, %c0_89] : memref<16x128xf32, #tpu.memory_space<vmem>>, vector<16x128xf32>
      tpu.vector_store %arg18[%c0_88, %c0_89], %235 {strides = array<i32>} : memref<16x128xf32, #tpu.memory_space<vmem>>, vector<16x128xf32>,
    } else {
    }
    return
  }
  func.func @transform_0(%arg0: i32) -> (i32, i32) {
    %c0_i32 = arith.constant 0 : i32
    %c0_i32_0 = arith.constant 0 : i32
    %c0_i32_1 = arith.constant 0 : i32
    return %c0_i32, %c0_i32_0 : i32, i32
  }
  func.func @transform_1(%arg0: i32) -> (i32, i32) {
    %c0_i32 = arith.constant 0 : i32
    %c0_i32_0 = arith.constant 0 : i32
    %c0_i32_1 = arith.constant 0 : i32
    return %c0_i32, %c0_i32_0 : i32, i32
  }
  func.func @transform_2(%arg0: i32) -> (i32, i32) {
    %c0_i32 = arith.constant 0 : i32
    %c0_i32_0 = arith.constant 0 : i32
    %c0_i32_1 = arith.constant 0 : i32
    return %c0_i32, %c0_i32_0 : i32, i32
  }
  func.func @transform_3(%arg0: i32) -> (i32, i32, i32) {
    %c0_i32 = arith.constant 0 : i32
    %c0_i32_0 = arith.constant 0 : i32
    %c0_i32_1 = arith.constant 0 : i32
    return %arg0, %c0_i32, %c0_i32_0 : i32, i32, i32
  }
  func.func @transform_4(%arg0: i32) -> (i32, i32, i32) {
    %c0_i32 = arith.constant 0 : i32
    %c0_i32_0 = arith.constant 0 : i32
    %c0_i32_1 = arith.constant 0 : i32
    return %arg0, %c0_i32, %c0_i32_0 : i32, i32, i32
  }
  func.func @transform_5(%arg0: i32) -> (i32, i32, i32) {
    %c0_i32 = arith.constant 0 : i32
    %c0_i32_0 = arith.constant 0 : i32
    %c0_i32_1 = arith.constant 0 : i32
    return %arg0, %c0_i32, %c0_i32_0 : i32, i32, i32
  }
  func.func @transform_6(%arg0: i32) -> (i32, i32, i32) {
    %c0_i32 = arith.constant 0 : i32
    %c0_i32_0 = arith.constant 0 : i32
    %c0_i32_1 = arith.constant 0 : i32
    return %arg0, %c0_i32, %c0_i32_0 : i32, i32, i32
  }
  func.func @transform_7(%arg0: i32) -> (i32, i32, i32) {
    %c0_i32 = arith.constant 0 : i32
    %c0_i32_0 = arith.constant 0 : i32
    %c0_i32_1 = arith.constant 0 : i32
    return %arg0, %c0_i32, %c0_i32_0 : i32, i32, i32
  }
  func.func @transform_8(%arg0: i32) -> (i32, i32, i32) {
    %c0_i32 = arith.constant 0 : i32
    %c0_i32_0 = arith.constant 0 : i32
    %c0_i32_1 = arith.constant 0 : i32
    return %arg0, %c0_i32, %c0_i32_0 : i32, i32, i32
  }
  func.func @transform_9(%arg0: i32) -> (i32, i32, i32) {
    %c0_i32 = arith.constant 0 : i32
    %c0_i32_0 = arith.constant 0 : i32
    %c0_i32_1 = arith.constant 0 : i32
    return %arg0, %c0_i32, %c0_i32_0 : i32, i32, i32
  }
  func.func @transform_10(%arg0: i32) -> (i32, i32, i32) {
    %c0_i32 = arith.constant 0 : i32
    %c0_i32_0 = arith.constant 0 : i32
    %c0_i32_1 = arith.constant 0 : i32
    return %arg0, %c0_i32, %c0_i32_0 : i32, i32, i32
  }
  func.func @transform_11(%arg0: i32) -> (i32, i32, i32) {
    %c0_i32 = arith.constant 0 : i32
    %c0_i32_0 = arith.constant 0 : i32
    %c0_i32_1 = arith.constant 0 : i32
    return %arg0, %c0_i32, %c0_i32_0 : i32, i32, i32
  }
  func.func @transform_12(%arg0: i32) -> (i32, i32, i32) {
    %c0_i32 = arith.constant 0 : i32
    %c0_i32_0 = arith.constant 0 : i32
    %c0_i32_1 = arith.constant 0 : i32
    return %arg0, %c0_i32, %c0_i32_0 : i32, i32, i32
  }
  func.func @transform_13(%arg0: i32) -> (i32, i32, i32) {
    %c0_i32 = arith.constant 0 : i32
    %c0_i32_0 = arith.constant 0 : i32
    %c0_i32_1 = arith.constant 0 : i32
    return %arg0, %c0_i32, %c0_i32_0 : i32, i32, i32
  }
  func.func @transform_14(%arg0: i32) -> (i32, i32, i32) {
    %c0_i32 = arith.constant 0 : i32
    %c0_i32_0 = arith.constant 0 : i32
    %c0_i32_1 = arith.constant 0 : i32
    return %arg0, %c0_i32, %c0_i32_0 : i32, i32, i32
  }
  func.func @transform_15(%arg0: i32) -> (i32, i32) {
    %c0_i32 = arith.constant 0 : i32
    %c0_i32_0 = arith.constant 0 : i32
    %c0_i32_1 = arith.constant 0 : i32
    return %c0_i32, %c0_i32_0 : i32, i32
  }
  func.func @transform_16(%arg0: i32) -> (i32, i32) {
    %c0_i32 = arith.constant 0 : i32
    %c0_i32_0 = arith.constant 0 : i32
    %c0_i32_1 = arith.constant 0 : i32
    return %c0_i32, %c0_i32_0 : i32, i32
  }
  func.func @transform_17(%arg0: i32) -> (i32, i32) {
    %c0_i32 = arith.constant 0 : i32
    %c0_i32_0 = arith.constant 0 : i32
    %c0_i32_1 = arith.constant 0 : i32
    return %c0_i32, %c0_i32_0 : i32, i32
  }
}

</mosaic_0001>

<bundles_post_ra>
// kernel: squeeze.1
= control target key start
LH: loop header
LB: loop body
LE: loop exit
PB: predicated region body
PF: predicated region fallthrough
CT: control target
= control target key end

     0   :  { %vm3_vm0 = vcmask 64512   ;;  %s485_s12 = smov 120   ;;  %s682_s0 = inlined_call_operand.vmem [shape: f32[1,1,3,16,16], index: 0, kind: input, shape index: {}]   ;;  %s683_s1 = inlined_call_operand.vmem [shape: f32[1,3,2,8,2,8], index: 1, kind: output, shape index: {}]  }
   0x1   :  { %v433_v0 = vld [vmem:[%s682_s0 + $0x10] sm:$0xff]   ;;  %v41_v1 = vld [vmem:[%s682_s0] sm:$0xff]   ;;  %v434_v2 = vld [vmem:[%s682_s0 + $0x18] sm:$0xff]  }
   0x2   :  { %60 = vrot.lane.b32.xlu1 %v433_v0, %s485_s12  ;;  %42 = vrot.lane.b32.xlu0 %v41_v1, %s485_s12  ;;  %v432_v3 = vld [vmem:[%s682_s0 + $0x8] sm:$0xff]   ;;  %17 = vst.msk [vmem:[#allocation0 + $0x80] ss:$8 sm:$0xf] %vm3_vm0, %v433_v0   ;;  %v435_v5 = vld [vmem:[%s682_s0 + $0x20] sm:$0xff]  }
   0x3   :  { %v436_v4 = vld [vmem:[%s682_s0 + $0x28] sm:$0xff]   ;;  %19 = vst.msk [vmem:[#allocation0 + $0x80] ss:$8 sm:$0xf0] %vm3_vm0, %v433_v0  }
   0x4   :  { %4 = vst.msk [vmem:[#allocation0] ss:$8 sm:$0xf] %vm3_vm0, %v41_v1   ;;  %5 = vst.msk [vmem:[#allocation0] ss:$8 sm:$0xf0] %vm3_vm0, %v41_v1  }
   0x5   :  { %24 = vst.msk [vmem:[#allocation0 + $0xc0] ss:$8 sm:$0xf] %vm3_vm0, %v434_v2   ;;  %26 = vst.msk [vmem:[#allocation0 + $0xc0] ss:$8 sm:$0xf0] %vm3_vm0, %v434_v2  }
   0x6   :  { %10 = vst.msk [vmem:[#allocation0 + $0x40] ss:$8 sm:$0xf] %vm3_vm0, %v432_v3   ;;  %12 = vst.msk [vmem:[#allocation0 + $0x40] ss:$8 sm:$0xf0] %vm3_vm0, %v432_v3   ;;  %69 = vrot.lane.b32.xlu1 %v434_v2, %s485_s12  ;;  %51 = vrot.lane.b32.xlu0 %v432_v3, %s485_s12 }
   0x7   :  { %38 = vst.msk [vmem:[#allocation0 + $0x140] ss:$8 sm:$0xf] %vm3_vm0, %v436_v4   ;;  %40 = vst.msk [vmem:[#allocation0 + $0x140] ss:$8 sm:$0xf0] %vm3_vm0, %v436_v4  }
   0x8   :  { %31 = vst.msk [vmem:[#allocation0 + $0x100] ss:$8 sm:$0xf] %vm3_vm0, %v435_v5   ;;  %33 = vst.msk [vmem:[#allocation0 + $0x100] ss:$8 sm:$0xf0] %vm3_vm0, %v435_v5  }
   0xa   :  { %87 = vrot.lane.b32.xlu1 %v436_v4, %s485_s12  ;;  %78 = vrot.lane.b32.xlu0 %v435_v5, %s485_s12 }
  0x74   :  { %v61_v6 = vpop.permute.xlu1 %60   ;;  %v43_v7 = vpop.permute.xlu0 %42  }
  0x75   :  { %64 = vst.msk [vmem:[#allocation0 + $0x81] ss:$8 sm:$0xf] %vm3_vm0, %v61_v6   ;;  %66 = vst.msk [vmem:[#allocation0 + $0x81] ss:$8 sm:$0xf0] %vm3_vm0, %v61_v6  }
  0x76   :  { %46 = vst.msk [vmem:[#allocation0 + $0x1] ss:$8 sm:$0xf] %vm3_vm0, %v43_v7   ;;  %48 = vst.msk [vmem:[#allocation0 + $0x1] ss:$8 sm:$0xf0] %vm3_vm0, %v43_v7  }
  0x78   :  { %v70_v8 = vpop.permute.xlu1 %69   ;;  %v52_v9 = vpop.permute.xlu0 %51  }
  0x79   :  { %73 = vst.msk [vmem:[#allocation0 + $0xc1] ss:$8 sm:$0xf] %vm3_vm0, %v70_v8   ;;  %75 = vst.msk [vmem:[#allocation0 + $0xc1] ss:$8 sm:$0xf0] %vm3_vm0, %v70_v8  }
  0x7a   :  { %55 = vst.msk [vmem:[#allocation0 + $0x41] ss:$8 sm:$0xf] %vm3_vm0, %v52_v9   ;;  %57 = vst.msk [vmem:[#allocation0 + $0x41] ss:$8 sm:$0xf0] %vm3_vm0, %v52_v9  }
  0x7c   :  { %v190_v10 = vld [vmem:[#allocation0 + $0x80] sm:$0x3]  ;;  %v196_v11 = vld [vmem:[#allocation0 + $0x88] sm:$0x3]  ;;  %v202_v12 = vld [vmem:[#allocation0 + $0x90] sm:$0x3]  ;;  %v88_v13 = vpop.permute.xlu1 %87   ;;  %v79_v14 = vpop.permute.xlu0 %78  }
  0x7d   :  { %452 = vst [vmem:[%s683_s1 + $0x20] sm:$0x3] %v190_v10  ;;  %453 = vst [vmem:[%s683_s1 + $0x22] sm:$0x3] %v196_v11  ;;  %v208_v15 = vld [vmem:[#allocation0 + $0x98] sm:$0x3] }
  0x7e   :  { %454 = vst [vmem:[%s683_s1 + $0x24] sm:$0x3] %v202_v12  ;;  %v214_v16 = vld [vmem:[#allocation0 + $0xa0] sm:$0x3]  ;;  %v220_v17 = vld [vmem:[#allocation0 + $0xa8] sm:$0x3] }
  0x7f   :  { %91 = vst.msk [vmem:[#allocation0 + $0x141] ss:$8 sm:$0xf] %vm3_vm0, %v88_v13   ;;  %93 = vst.msk [vmem:[#allocation0 + $0x141] ss:$8 sm:$0xf0] %vm3_vm0, %v88_v13  }
  0x80   :  { %82 = vst.msk [vmem:[#allocation0 + $0x101] ss:$8 sm:$0xf] %vm3_vm0, %v79_v14   ;;  %84 = vst.msk [vmem:[#allocation0 + $0x101] ss:$8 sm:$0xf0] %vm3_vm0, %v79_v14  }
  0x81   :  { %455 = vst [vmem:[%s683_s1 + $0x26] sm:$0x3] %v208_v15  ;;  %456 = vst [vmem:[%s683_s1 + $0x28] sm:$0x3] %v214_v16  ;;  %v226_v18 = vld [vmem:[#allocation0 + $0xb0] sm:$0x3] }
  0x82   :  { %457 = vst [vmem:[%s683_s1 + $0x2a] sm:$0x3] %v220_v17  ;;  %v232_v19 = vld [vmem:[#allocation0 + $0xb8] sm:$0x3]  ;;  %v97_v20 = vld [vmem:[#allocation0] sm:$0x3] }
  0x83   :  { %458 = vst [vmem:[%s683_s1 + $0x2c] sm:$0x3] %v226_v18  ;;  %459 = vst [vmem:[%s683_s1 + $0x2e] sm:$0x3] %v232_v19  ;;  %v101_v21 = vld [vmem:[#allocation0 + $0x8] sm:$0x3] }
  0x84   :  { %99 = vst [vmem:[%s683_s1] sm:$0x3] %v97_v20  ;;  %v106_v22 = vld [vmem:[#allocation0 + $0x10] sm:$0x3]  ;;  %v112_v23 = vld [vmem:[#allocation0 + $0x18] sm:$0x3] }
  0x85   :  { %437 = vst [vmem:[%s683_s1 + $0x2] sm:$0x3] %v101_v21  ;;  %438 = vst [vmem:[%s683_s1 + $0x4] sm:$0x3] %v106_v22  ;;  %v118_v24 = vld [vmem:[#allocation0 + $0x20] sm:$0x3] }
  0x86   :  { %439 = vst [vmem:[%s683_s1 + $0x6] sm:$0x3] %v112_v23  ;;  %v124_v25 = vld [vmem:[#allocation0 + $0x28] sm:$0x3]  ;;  %v130_v26 = vld [vmem:[#allocation0 + $0x30] sm:$0x3] }
  0x87   :  { %440 = vst [vmem:[%s683_s1 + $0x8] sm:$0x3] %v118_v24  ;;  %441 = vst [vmem:[%s683_s1 + $0xa] sm:$0x3] %v124_v25  ;;  %v136_v27 = vld [vmem:[#allocation0 + $0x38] sm:$0x3] }
  0x88   :  { %442 = vst [vmem:[%s683_s1 + $0xc] sm:$0x3] %v130_v26  ;;  %v238_v28 = vld [vmem:[#allocation0 + $0xc0] sm:$0x3]  ;;  %v244_v29 = vld [vmem:[#allocation0 + $0xc8] sm:$0x3] }
  0x89   :  { %443 = vst [vmem:[%s683_s1 + $0xe] sm:$0x3] %v136_v27  ;;  %460 = vst [vmem:[%s683_s1 + $0x30] sm:$0x3] %v238_v28  ;;  %v250_v30 = vld [vmem:[#allocation0 + $0xd0] sm:$0x3] }
  0x8a   :  { %461 = vst [vmem:[%s683_s1 + $0x32] sm:$0x3] %v244_v29  ;;  %v256_v31 = vld [vmem:[#allocation0 + $0xd8] sm:$0x3]  ;;  %v262_v32 = vld [vmem:[#allocation0 + $0xe0] sm:$0x3] }
  0x8b   :  { %462 = vst [vmem:[%s683_s1 + $0x34] sm:$0x3] %v250_v30  ;;  %463 = vst [vmem:[%s683_s1 + $0x36] sm:$0x3] %v256_v31  ;;  %v268_v33 = vld [vmem:[#allocation0 + $0xe8] sm:$0x3] }
  0x8c   :  { %464 = vst [vmem:[%s683_s1 + $0x38] sm:$0x3] %v262_v32  ;;  %v274_v34 = vld [vmem:[#allocation0 + $0xf0] sm:$0x3]  ;;  %v280_v35 = vld [vmem:[#allocation0 + $0xf8] sm:$0x3] }
  0x8d   :  { %465 = vst [vmem:[%s683_s1 + $0x3a] sm:$0x3] %v268_v33  ;;  %466 = vst [vmem:[%s683_s1 + $0x3c] sm:$0x3] %v274_v34  ;;  %v142_v36 = vld [vmem:[#allocation0 + $0x40] sm:$0x3] }
  0x8e   :  { %467 = vst [vmem:[%s683_s1 + $0x3e] sm:$0x3] %v280_v35  ;;  %v148_v37 = vld [vmem:[#allocation0 + $0x48] sm:$0x3]  ;;  %v154_v38 = vld [vmem:[#allocation0 + $0x50] sm:$0x3] }
  0x8f   :  { %444 = vst [vmem:[%s683_s1 + $0x10] sm:$0x3] %v142_v36  ;;  %445 = vst [vmem:[%s683_s1 + $0x12] sm:$0x3] %v148_v37  ;;  %v160_v39 = vld [vmem:[#allocation0 + $0x58] sm:$0x3] }
  0x90   :  { %446 = vst [vmem:[%s683_s1 + $0x14] sm:$0x3] %v154_v38  ;;  %v166_v40 = vld [vmem:[#allocation0 + $0x60] sm:$0x3]  ;;  %v172_v41 = vld [vmem:[#allocation0 + $0x68] sm:$0x3] }
  0x91   :  { %447 = vst [vmem:[%s683_s1 + $0x16] sm:$0x3] %v160_v39  ;;  %448 = vst [vmem:[%s683_s1 + $0x18] sm:$0x3] %v166_v40  ;;  %v178_v42 = vld [vmem:[#allocation0 + $0x70] sm:$0x3] }
  0x92   :  { %449 = vst [vmem:[%s683_s1 + $0x1a] sm:$0x3] %v172_v41  ;;  %v184_v43 = vld [vmem:[#allocation0 + $0x78] sm:$0x3]  ;;  %v334_v44 = vld [vmem:[#allocation0 + $0x140] sm:$0x3] }
  0x93   :  { %450 = vst [vmem:[%s683_s1 + $0x1c] sm:$0x3] %v178_v42  ;;  %451 = vst [vmem:[%s683_s1 + $0x1e] sm:$0x3] %v184_v43  ;;  %v340_v45 = vld [vmem:[#allocation0 + $0x148] sm:$0x3] }
  0x94   :  { %476 = vst [vmem:[%s683_s1 + $0x50] sm:$0x3] %v334_v44  ;;  %v346_v46 = vld [vmem:[#allocation0 + $0x150] sm:$0x3]  ;;  %v352_v47 = vld [vmem:[#allocation0 + $0x158] sm:$0x3] }
  0x95   :  { %477 = vst [vmem:[%s683_s1 + $0x52] sm:$0x3] %v340_v45  ;;  %478 = vst [vmem:[%s683_s1 + $0x54] sm:$0x3] %v346_v46  ;;  %v358_v48 = vld [vmem:[#allocation0 + $0x160] sm:$0x3] }
  0x96   :  { %479 = vst [vmem:[%s683_s1 + $0x56] sm:$0x3] %v352_v47  ;;  %v364_v49 = vld [vmem:[#allocation0 + $0x168] sm:$0x3]  ;;  %v370_v50 = vld [vmem:[#allocation0 + $0x170] sm:$0x3] }
  0x97   :  { %480 = vst [vmem:[%s683_s1 + $0x58] sm:$0x3] %v358_v48  ;;  %481 = vst [vmem:[%s683_s1 + $0x5a] sm:$0x3] %v364_v49  ;;  %v376_v51 = vld [vmem:[#allocation0 + $0x178] sm:$0x3] }
  0x98   :  { %482 = vst [vmem:[%s683_s1 + $0x5c] sm:$0x3] %v370_v50  ;;  %v286_v52 = vld [vmem:[#allocation0 + $0x100] sm:$0x3]  ;;  %v292_v53 = vld [vmem:[#allocation0 + $0x108] sm:$0x3] }
  0x99   :  { %483 = vst [vmem:[%s683_s1 + $0x5e] sm:$0x3] %v376_v51  ;;  %468 = vst [vmem:[%s683_s1 + $0x40] sm:$0x3] %v286_v52  ;;  %v298_v54 = vld [vmem:[#allocation0 + $0x110] sm:$0x3] }
  0x9a   :  { %469 = vst [vmem:[%s683_s1 + $0x42] sm:$0x3] %v292_v53  ;;  %v304_v55 = vld [vmem:[#allocation0 + $0x118] sm:$0x3]  ;;  %v310_v56 = vld [vmem:[#allocation0 + $0x120] sm:$0x3] }
  0x9b   :  { %470 = vst [vmem:[%s683_s1 + $0x44] sm:$0x3] %v298_v54  ;;  %471 = vst [vmem:[%s683_s1 + $0x46] sm:$0x3] %v304_v55  ;;  %v316_v57 = vld [vmem:[#allocation0 + $0x128] sm:$0x3] }
  0x9c   :  { %472 = vst [vmem:[%s683_s1 + $0x48] sm:$0x3] %v310_v56  ;;  %v322_v58 = vld [vmem:[#allocation0 + $0x130] sm:$0x3]  ;;  %v328_v59 = vld [vmem:[#allocation0 + $0x138] sm:$0x3] }
  0x9d   :  { %473 = vst [vmem:[%s683_s1 + $0x4a] sm:$0x3] %v316_v57  ;;  %474 = vst [vmem:[%s683_s1 + $0x4c] sm:$0x3] %v322_v58 }
  0x9e   :  { %475 = vst [vmem:[%s683_s1 + $0x4e] sm:$0x3] %v328_v59 }

// kernel: tile.14
= control target key start
LH: loop header
LB: loop body
LE: loop exit
PB: predicated region body
PF: predicated region fallthrough
CT: control target
= control target key end

     0   :  { %vm48_vm0 = vcmask 1047556   ;;  %s227_s14 = smov 96   ;;  %vm3_vm1 = vcmask 261120   ;;  %s228_s20 = smov 64   ;;  %vm52_vm2 = vcmask 1048320   ;;  %vm95_vm3 = vcmask 785920   ;;  %s436_s0 = inlined_call_operand.vmem [shape: f32[16,8,32], index: 0, kind: input, shape index: {}]   ;;  %s437_s1 = inlined_call_operand.vmem [shape: f32[16,256], index: 1, kind: output, shape index: {}]  }
   0x1   :  { %v196_v0 = vld [vmem:[%s436_s0 + $0x43] ss:$8 sm:$0xf]   ;;  %v199_v6 = vld [vmem:[%s436_s0 + $0x47] ss:$8 sm:$0xf]  }
   0x2   :  { %v197_v1 = vld [vmem:[%s436_s0 + $0x43] ss:$8 sm:$0xf0]   ;;  %v200_v7 = vld [vmem:[%s436_s0 + $0x47] ss:$8 sm:$0xf0]  }
   0x3   :  { %v70_v2 = vsel %vm48_vm0, %v197_v1, %v196_v0  ;;  %v191_v3 = vld [vmem:[%s436_s0 + $0x3] ss:$8 sm:$0xf]   ;;  %v81_v8 = vsel %vm48_vm0, %v200_v7, %v199_v6  ;;  %v193_v9 = vld [vmem:[%s436_s0 + $0x7] ss:$8 sm:$0xf]  }
   0x4   :  { %v192_v4 = vld [vmem:[%s436_s0 + $0x3] ss:$8 sm:$0xf0]   ;;  %71 = vrot.lane.b32.xlu1 %v70_v2, %s227_s14  ;;  %v194_v10 = vld [vmem:[%s436_s0 + $0x7] ss:$8 sm:$0xf0]  }
   0x5   :  { %v49_v5 = vsel %vm48_vm0, %v192_v4, %v191_v3  ;;  %v59_v11 = vsel %vm48_vm0, %v194_v10, %v193_v9  ;;  %v204_v12 = vld [vmem:[%s436_s0 + $0x6] ss:$8 sm:$0xf]   ;;  %v202_v14 = vld [vmem:[%s436_s0 + $0x2] ss:$8 sm:$0xf]  }
   0x6   :  { %50 = vrot.lane.b32.xlu0 %v49_v5, %s227_s14  ;;  %v205_v13 = vld [vmem:[%s436_s0 + $0x6] ss:$8 sm:$0xf0]   ;;  %v203_v15 = vld [vmem:[%s436_s0 + $0x2] ss:$8 sm:$0xf0]  }
   0x7   :  { %v102_v16 = vsel %vm48_vm0, %v205_v13, %v204_v12  ;;  %v210_v17 = vld [vmem:[%s436_s0 + $0x46] ss:$8 sm:$0xf]   ;;  %v92_v18 = vsel %vm48_vm0, %v203_v15, %v202_v14  ;;  %v2_v20 = vld [vmem:[%s436_s0] ss:$4 sm:$0xff]   ;;  %vm138_vm4 = vcmask 523520  }
   0x8   :  { %82 = vrot.lane.b32.xlu1 %v81_v8, %s227_s14  ;;  %v211_v19 = vld [vmem:[%s436_s0 + $0x46] ss:$8 sm:$0xf0]   ;;  %v207_v21 = vld [vmem:[%s436_s0 + $0x42] ss:$8 sm:$0xf]  }
   0x9   :  { %v208_v22 = vld [vmem:[%s436_s0 + $0x42] ss:$8 sm:$0xf0]   ;;  %4 = vst.msk [vmem:[%s437_s1] ss:$8 sm:$0x3] %vm3_vm1, %v2_v20   ;;  %v124_v24 = vsel %vm48_vm0, %v211_v19, %v210_v17 }
   0xa   :  { %60 = vrot.lane.b32.xlu0 %v59_v11, %s227_s14  ;;  %173 = vst.msk [vmem:[%s437_s1 - $0xf] ss:$8 sm:$0xc] %vm3_vm1, %v2_v20   ;;  %174 = vst.msk [vmem:[%s437_s1 - $0x1e] ss:$8 sm:$0x30] %vm3_vm1, %v2_v20   ;;  %v113_v27 = vsel %vm48_vm0, %v208_v22, %v207_v21 }
   0xb   :  { %175 = vst.msk [vmem:[%s437_s1 - $0x2d] ss:$8 sm:$0xc0] %vm3_vm1, %v2_v20   ;;  %v215_v23 = vld [vmem:[%s436_s0 + $0x5] ss:$8 sm:$0xf]  }
   0xc   :  { %103 = vrot.lane.b32.xlu1 %v102_v16, %s228_s20  ;;  %v216_v25 = vld [vmem:[%s436_s0 + $0x5] ss:$8 sm:$0xf0]   ;;  %v213_v26 = vld [vmem:[%s436_s0 + $0x1] ss:$8 sm:$0xf]  }
   0xd   :  { %v214_v28 = vld [vmem:[%s436_s0 + $0x1] ss:$8 sm:$0xf0]   ;;  %v176_v29 = vld [vmem:[%s436_s0 + $0x20] ss:$4 sm:$0xff]   ;;  %v145_v32 = vsel %vm48_vm0, %v216_v25, %v215_v23 }
   0xe   :  { %93 = vrot.lane.b32.xlu0 %v92_v18, %s228_s20  ;;  %177 = vst.msk [vmem:[%s437_s1 + $0x4] ss:$8 sm:$0x3] %vm3_vm1, %v176_v29   ;;  %178 = vst.msk [vmem:[%s437_s1 - $0xb] ss:$8 sm:$0xc] %vm3_vm1, %v176_v29   ;;  %v135_v33 = vsel %vm48_vm0, %v214_v28, %v213_v26 }
   0xf   :  { %179 = vst.msk [vmem:[%s437_s1 - $0x1a] ss:$8 sm:$0x30] %vm3_vm1, %v176_v29   ;;  %180 = vst.msk [vmem:[%s437_s1 - $0x29] ss:$8 sm:$0xc0] %vm3_vm1, %v176_v29  }
  0x10   :  { %v181_v30 = vld [vmem:[%s436_s0 + $0x40] ss:$4 sm:$0xff]   ;;  %125 = vrot.lane.b32.xlu1 %v124_v24, %s228_s20  ;;  %v221_v34 = vld [vmem:[%s436_s0 + $0x45] ss:$8 sm:$0xf]  }
  0x11   :  { %v186_v31 = vld [vmem:[%s436_s0 + $0x60] ss:$4 sm:$0xff]   ;;  %182 = vst.msk [vmem:[%s437_s1 + $0x10] ss:$8 sm:$0x3] %vm3_vm1, %v181_v30  }
  0x12   :  { %183 = vst.msk [vmem:[%s437_s1 + $0x1] ss:$8 sm:$0xc] %vm3_vm1, %v181_v30   ;;  %184 = vst.msk [vmem:[%s437_s1 - $0xe] ss:$8 sm:$0x30] %vm3_vm1, %v181_v30   ;;  %114 = vrot.lane.b32.xlu0 %v113_v27, %s228_s20 }
  0x13   :  { %185 = vst.msk [vmem:[%s437_s1 - $0x1d] ss:$8 sm:$0xc0] %vm3_vm1, %v181_v30   ;;  %187 = vst.msk [vmem:[%s437_s1 + $0x14] ss:$8 sm:$0x3] %vm3_vm1, %v186_v31  }
  0x14   :  { %188 = vst.msk [vmem:[%s437_s1 + $0x5] ss:$8 sm:$0xc] %vm3_vm1, %v186_v31   ;;  %189 = vst.msk [vmem:[%s437_s1 - $0xa] ss:$8 sm:$0x30] %vm3_vm1, %v186_v31  }
  0x15   :  { %190 = vst.msk [vmem:[%s437_s1 - $0x19] ss:$8 sm:$0xc0] %vm3_vm1, %v186_v31   ;;  %v222_v35 = vld [vmem:[%s436_s0 + $0x45] ss:$8 sm:$0xf0]  }
  0x16   :  { %v218_v36 = vld [vmem:[%s436_s0 + $0x41] ss:$8 sm:$0xf]   ;;  %v167_v38 = vsel %vm48_vm0, %v222_v35, %v221_v34 }
  0x17   :  { %v219_v37 = vld [vmem:[%s436_s0 + $0x41] ss:$8 sm:$0xf0]   ;;  %s229_s0 = smov 32  }
  0x18   :  { %146 = vrot.lane.b32.xlu1 %v145_v32, %s229_s0  ;;  %136 = vrot.lane.b32.xlu0 %v135_v33, %s229_s0  ;;  %v156_v39 = vsel %vm48_vm0, %v219_v37, %v218_v36 }
  0x1c   :  { %168 = vrot.lane.b32.xlu1 %v167_v38, %s229_s0  ;;  %157 = vrot.lane.b32.xlu0 %v156_v39, %s229_s0 }
  0x76   :  { %v72_v40 = vpop.permute.xlu1 %71  }
  0x77   :  { %198 = vst.msk [vmem:[%s437_s1 + $0x10] sm:$0xff] %vm52_vm2, %v72_v40  }
  0x78   :  { %v51_v41 = vpop.permute.xlu0 %50  }
  0x79   :  { %53 = vst.msk [vmem:[%s437_s1] sm:$0xff] %vm52_vm2, %v51_v41  }
  0x7a   :  { %v83_v42 = vpop.permute.xlu1 %82  }
  0x7b   :  { %201 = vst.msk [vmem:[%s437_s1 + $0x18] sm:$0xff] %vm52_vm2, %v83_v42  }
  0x7c   :  { %v61_v43 = vpop.permute.xlu0 %60  }
  0x7d   :  { %195 = vst.msk [vmem:[%s437_s1 + $0x8] sm:$0xff] %vm52_vm2, %v61_v43  }
  0x7e   :  { %v104_v44 = vpop.permute.xlu1 %103  }
  0x7f   :  { %206 = vst.msk [vmem:[%s437_s1 + $0x8] sm:$0xff] %vm95_vm3, %v104_v44  }
  0x80   :  { %v94_v45 = vpop.permute.xlu0 %93  }
  0x81   :  { %96 = vst.msk [vmem:[%s437_s1] sm:$0xff] %vm95_vm3, %v94_v45  }
  0x82   :  { %v126_v46 = vpop.permute.xlu1 %125  }
  0x83   :  { %212 = vst.msk [vmem:[%s437_s1 + $0x18] sm:$0xff] %vm95_vm3, %v126_v46  }
  0x84   :  { %v115_v47 = vpop.permute.xlu0 %114  }
  0x85   :  { %209 = vst.msk [vmem:[%s437_s1 + $0x10] sm:$0xff] %vm95_vm3, %v115_v47  }
  0x8a   :  { %v147_v48 = vpop.permute.xlu1 %146   ;;  %v137_v49 = vpop.permute.xlu0 %136  }
  0x8b   :  { %217 = vst.msk [vmem:[%s437_s1 + $0x8] sm:$0xff] %vm138_vm4, %v147_v48   ;;  %139 = vst.msk [vmem:[%s437_s1] sm:$0xff] %vm138_vm4, %v137_v49  }
  0x8e   :  { %v169_v50 = vpop.permute.xlu1 %168   ;;  %v158_v51 = vpop.permute.xlu0 %157  }
  0x8f   :  { %223 = vst.msk [vmem:[%s437_s1 + $0x18] sm:$0xff] %vm138_vm4, %v169_v50   ;;  %220 = vst.msk [vmem:[%s437_s1 + $0x10] sm:$0xff] %vm138_vm4, %v158_v51  }

// kernel: starvector2_forward.2
= control target key start
LH: loop header
LB: loop body
LE: loop exit
PB: predicated region body
PF: predicated region fallthrough
CT: control target
= control target key end

     0   :  { %vm222_vm0 = vcmask 1043456   ;;  %v796_v44 = vmov 0   ;;  %s1032_s1 = inlined_call_operand.vmem [shape: bf16[256,128], index: 1, kind: input, shape index: {}]   ;;  %s1033_s0 = inlined_call_operand.vmem [shape: f32[4,256], index: 0, kind: input, shape index: {}]   ;;  %s1034_s2 = inlined_call_operand.vmem [shape: f32[1,128], index: 2, kind: input, shape index: {}]   ;;  %s1035_s5 = inlined_call_operand.vmem [shape: bf16[128,256], index: 5, kind: input, shape index: {}]   ;;  %s1036_s3 = inlined_call_operand.vmem [shape: f32[1,128], index: 3, kind: input, shape index: {}]   ;;  %s1037_s4 = inlined_call_operand.vmem [shape: f32[1,128], index: 4, kind: input, shape index: {}]   ;;  %s1038_s7 = inlined_call_operand.vmem [shape: bf16[256,128], index: 7, kind: input, shape index: {}]   ;;  %s1039_s6 = inlined_call_operand.vmem [shape: f32[1,256], index: 6, kind: input, shape index: {}]   ;;  %s1040_s8 = inlined_call_operand.vmem [shape: f32[1,128], index: 8, kind: input, shape index: {}]   ;;  %s1041_s9 = inlined_call_operand.vmem [shape: f32[1,128], index: 9, kind: input, shape index: {}]   ;;  %s1042_s10 = inlined_call_operand.vmem [shape: f32[1,128], index: 10, kind: input, shape index: {}]   ;;  %s1043_s11 = inlined_call_operand.vmem [shape: f32[4,128], index: 11, kind: output, shape index: {}]  }
   0x1   :  { %v727_v0 = vld [vmem:[%s1032_s1 + $0x40] sm:$0xff]   ;;  %v729_v2 = vld [vmem:[%s1032_s1 + $0x48] sm:$0xff]   ;;  %v731_v4 = vld [vmem:[%s1032_s1 + $0x50] sm:$0xff]   ;;  %392 = vmatprep.mubr.bf16.mxu1 %v796_v44 }
   0x2   :  { %v728_v1 = vld [vmem:[%s1032_s1] sm:$0xff]   ;;  %682 = vmatprep.subr.bf16.mxu0 %v727_v0  ;;  %v730_v3 = vld [vmem:[%s1032_s1 + $0x8] sm:$0xff]   ;;  %v732_v5 = vld [vmem:[%s1032_s1 + $0x10] sm:$0xff]  }
   0x3   :  { %683 = vmatpush3.bf16.msra.mxu0 %v728_v1  ;;  %v733_v6 = vld [vmem:[%s1032_s1 + $0x58] sm:$0xff]   ;;  %v735_v8 = vld [vmem:[%s1032_s1 + $0x60] sm:$0xff]   ;;  %v737_v10 = vld [vmem:[%s1032_s1 + $0x68] sm:$0xff]  }
   0x4   :  { %684 = vmatprep.subr.bf16.mxu0 %v729_v2  ;;  %v734_v7 = vld [vmem:[%s1032_s1 + $0x18] sm:$0xff]   ;;  %v736_v9 = vld [vmem:[%s1032_s1 + $0x20] sm:$0xff]   ;;  %v738_v13 = vld [vmem:[%s1032_s1 + $0x28] sm:$0xff]  }
   0x5   :  { %v39_v11 = vld [vmem:[%s1033_s0] sm:$0xff]  ;;  %v739_v15 = vld [vmem:[%s1032_s1 + $0x70] sm:$0xff]   ;;  %v741_v17 = vld [vmem:[%s1032_s1 + $0x78] sm:$0xff]  }
   0x6   :  { %v41_v12 = vcombine.high %v39_v11, %v39_v11  ;;  %v740_v16 = vld [vmem:[%s1032_s1 + $0x30] sm:$0xff]   ;;  %v742_v18 = vld [vmem:[%s1032_s1 + $0x38] sm:$0xff]   ;;  %v43_v19 = vpack.c.bf16 %v39_v11, %v39_v11  ;;  %v626_v22 = vld [vmem:[%s1034_s2] ss:$0 sm:$0xff] }
   0x7   :  { %685 = vmatpush3.bf16.msra.mxu0 %v730_v3  ;;  %v744_v28 = vld [vmem:[%s1035_s5 + $0x4] ss:$8 sps:$4 sm:$0xff]   ;;  %v746_v29 = vld [vmem:[%s1035_s5] ss:$8 sps:$4 sm:$0xff]   ;;  %v747_v30 = vld [vmem:[%s1035_s5 + $0x14] ss:$8 sps:$4 sm:$0xff]  }
   0x8   :  { %686 = vmatprep.subr.bf16.mxu0 %v731_v4  ;;  %v44_v14 = vpack.c.bf16 %v41_v12, %v41_v12  ;;  %360 = vmatprep.subr.bf16.mxu1 %v744_v28  ;;  %v749_v31 = vld [vmem:[%s1035_s5 + $0x10] ss:$8 sps:$4 sm:$0xff]   ;;  %v750_v32 = vld [vmem:[%s1035_s5 + $0x24] ss:$8 sps:$4 sm:$0xff]   ;;  %v752_v38 = vld [vmem:[%s1035_s5 + $0x20] ss:$8 sps:$4 sm:$0xff]   ;;  %v270_v12 = vlaneseq }
   0x9   :  { %361 = vmatpush1.bf16.msra.mxu1 %v746_v29  ;;  %v753_v39 = vld [vmem:[%s1035_s5 + $0x34] ss:$8 sps:$4 sm:$0xff]   ;;  %v755_v40 = vld [vmem:[%s1035_s5 + $0x30] ss:$8 sps:$4 sm:$0xff]   ;;  %v756_v41 = vld [vmem:[%s1035_s5 + $0x44] ss:$8 sps:$4 sm:$0xff]  }
   0xa   :  { %212 = vmatprep.mubr.bf16.mxu0 %v44_v14  ;;  %362 = vmatprep.subr.bf16.mxu1 %v747_v30  ;;  %v758_v42 = vld [vmem:[%s1035_s5 + $0x40] ss:$8 sps:$4 sm:$0xff]   ;;  %v759_v43 = vld [vmem:[%s1035_s5 + $0x54] ss:$8 sps:$4 sm:$0xff]   ;;  %v761_v45 = vld [vmem:[%s1035_s5 + $0x50] ss:$8 sps:$4 sm:$0xff]  }
   0xb   :  { %687 = vmatpush3.bf16.msra.mxu0 %v732_v5  ;;  %v762_v46 = vld [vmem:[%s1035_s5 + $0x64] ss:$8 sps:$4 sm:$0xff]   ;;  %v764_v47 = vld [vmem:[%s1035_s5 + $0x60] ss:$8 sps:$4 sm:$0xff]   ;;  %v765_v48 = vld [vmem:[%s1035_s5 + $0x74] ss:$8 sps:$4 sm:$0xff]  }
   0xc   :  { %688 = vmatprep.subr.bf16.mxu0 %v733_v6  ;;  %v767_v49 = vld [vmem:[%s1035_s5 + $0x70] ss:$8 sps:$4 sm:$0xff]   ;;  %v643_v54 = vld [vmem:[%s1036_s3] ss:$0 sm:$0xff]  ;;  %v770_v62 = vld [vmem:[%s1038_s7 + $0x48] sm:$0xff]  }
   0xd   :  { %363 = vmatpush1.bf16.msra.mxu1 %v749_v31  ;;  %v644_v56 = vld [vmem:[%s1037_s4] ss:$0 sm:$0xff]  ;;  %v771_v63 = vld [vmem:[%s1038_s7 + $0x8] sm:$0xff]   ;;  %v772_v0 = vld [vmem:[%s1038_s7 + $0x50] sm:$0xff]  }
   0xe   :  { %364 = vmatprep.subr.bf16.mxu1 %v750_v32  ;;  %v768_v60 = vld [vmem:[%s1038_s7 + $0x40] sm:$0xff]   ;;  %v773_v1 = vld [vmem:[%s1038_s7 + $0x10] sm:$0xff]   ;;  %v774_v2 = vld [vmem:[%s1038_s7 + $0x58] sm:$0xff]  }
   0xf   :  { %689 = vmatpush3.bf16.msra.mxu0 %v734_v7  ;;  %v769_v61 = vld [vmem:[%s1038_s7] sm:$0xff]   ;;  %v775_v3 = vld [vmem:[%s1038_s7 + $0x18] sm:$0xff]   ;;  %v778_v6 = vld [vmem:[%s1038_s7 + $0x68] sm:$0xff]  }
  0x10   :  { %690 = vmatprep.subr.bf16.mxu0 %v735_v8  ;;  %v776_v4 = vld [vmem:[%s1038_s7 + $0x60] sm:$0xff]   ;;  %v779_v7 = vld [vmem:[%s1038_s7 + $0x28] sm:$0xff]   ;;  %v780_v8 = vld [vmem:[%s1038_s7 + $0x70] sm:$0xff]  }
  0x11   :  { %365 = vmatpush1.bf16.msra.mxu1 %v752_v38  ;;  %v777_v5 = vld [vmem:[%s1038_s7 + $0x20] sm:$0xff]   ;;  %v783_v11 = vld [vmem:[%s1038_s7 + $0x38] sm:$0xff]  }
  0x12   :  { %366 = vmatprep.subr.bf16.mxu1 %v753_v39  ;;  %v663_v39 = vld [vmem:[%s1040_s8] ss:$0 sm:$0xff] }
  0x13   :  { %691 = vmatpush3.bf16.msra.mxu0 %v736_v9  ;;  %v781_v9 = vld [vmem:[%s1038_s7 + $0x30] sm:$0xff]  }
  0x14   :  { %692 = vmatprep.subr.bf16.mxu0 %v737_v10  ;;  %v782_v10 = vld [vmem:[%s1038_s7 + $0x78] sm:$0xff]  }
  0x15   :  { %367 = vmatpush1.bf16.msra.mxu1 %v755_v40 }
  0x16   :  { %368 = vmatprep.subr.bf16.mxu1 %v756_v41 }
  0x17   :  { %693 = vmatpush3.bf16.msra.mxu0 %v738_v13  ;;  %v271_v13 = vshrl.u32 %v270_v12, 7 }
  0x18   :  { %694 = vmatprep.subr.bf16.mxu0 %v739_v15  ;;  %v268_v15 = vld [vmem:[%s1039_s6] sm:$0x3] }
  0x19   :  { %369 = vmatpush1.bf16.msra.mxu1 %v758_v42  ;;  %v272_v14 = vsub.s32 0, %v271_v13 }
  0x1a   :  { %370 = vmatprep.subr.bf16.mxu1 %v759_v43 }
  0x1b   :  { %695 = vmatpush3.bf16.msra.mxu0 %v740_v16  ;;  %v276_v16 = vsub.s32 1, %v271_v13 }
  0x1c   :  { %696 = vmatprep.subr.bf16.mxu0 %v741_v17  ;;  %v273_v17 = vrot.slane %v268_v15, %v272_v14 }
  0x1d   :  { %371 = vmatpush1.bf16.msra.mxu1 %v761_v45 }
  0x1e   :  { %372 = vmatprep.subr.bf16.mxu1 %v762_v46 }
  0x1f   :  { %697 = vmatpush3.bf16.msra.mxu0 %v742_v18  ;;  %v277_v18 = vrot.slane %v268_v15, %v276_v16 }
  0x20   :  { %704 = vmatprep.subr.bf16.mxu0 %v768_v60 }
  0x21   :  { %373 = vmatpush1.bf16.msra.mxu1 %v764_v47 }
  0x22   :  { %213 = vmatmul.mubr.bf16.vlgmr.msra.gmra.mrb[0].mxu0 %v43_v19  ;;  %374 = vmatprep.subr.bf16.mxu1 %v765_v48 }
  0x23   :  { %705 = vmatpush3.bf16.msra.mxu0 %v769_v61 }
  0x24   :  { %706 = vmatprep.subr.bf16.mxu0 %v770_v62 }
  0x25   :  { %375 = vmatpush1.bf16.msra.mxu1 %v767_v49 }
  0x27   :  { %707 = vmatpush3.bf16.msra.mxu0 %v771_v63 }
  0x28   :  { %708 = vmatprep.subr.bf16.mxu0 %v772_v0 }
  0x2b   :  { %709 = vmatpush3.bf16.msra.mxu0 %v773_v1 }
  0x2c   :  { %710 = vmatprep.subr.bf16.mxu0 %v774_v2 }
  0x2f   :  { %711 = vmatpush3.bf16.msra.mxu0 %v775_v3 }
  0x30   :  { %712 = vmatprep.subr.bf16.mxu0 %v776_v4 }
  0x33   :  { %713 = vmatpush3.bf16.msra.mxu0 %v777_v5 }
  0x34   :  { %714 = vmatprep.subr.bf16.mxu0 %v778_v6 }
  0x37   :  { %715 = vmatpush3.bf16.msra.mxu0 %v779_v7 }
  0x38   :  { %716 = vmatprep.subr.bf16.mxu0 %v780_v8 }
  0x3b   :  { %717 = vmatpush3.bf16.msra.mxu0 %v781_v9 }
  0x3c   :  { %718 = vmatprep.subr.bf16.mxu0 %v782_v10 }
  0x3f   :  { %719 = vmatpush3.bf16.msra.mxu0 %v783_v11 }
  0xf5   :  { %v698_v20 = vpop.f32.mrb[0].mxu0 }
  0xf6   :  { %v699_v21 = vpop.f32.mrb[1].mxu0 }
  0xf7   :  { %v700_v23 = vadd.f32 %v699_v21, %v698_v20  ;;  %v701_v24 = vpop.f32.mrb[2].mxu0 }
  0xf8   :  { %v702_v25 = vpop.f32.mrb[3].mxu0 }
  0xf9   :  { %v215_v26 = vadd.f32 %v700_v23, %v626_v22 }
  0xfb   :  { %v223_v27 = vsel %vm222_vm0, %v215_v26, 0.0 }
  0xfc   :  { %224 = vadd.xlane.f32.xlu0 %v223_v27 }
 0x189   :  { %v225_v33 = vpop.xlane.xlu0 %224 }
 0x18a   :  { %v227_v34 = vmul.f32 0.0078125, %v225_v33 }
 0x18c   :  { %v228_v35 = vsub.f32 %v215_v26, %v227_v34 }
 0x18e   :  { %v229_v36 = vmul.f32 %v228_v35, %v228_v35 }
 0x190   :  { %v230_v37 = vsel %vm222_vm0, %v229_v36, 0.0 }
 0x191   :  { %231 = vadd.xlane.f32.xlu0 %v230_v37 }
 0x21e   :  { %v232_v50 = vpop.xlane.xlu0 %231 }
 0x21f   :  { %v233_v51 = vmul.f32 0.0078125, %v232_v50 }
 0x221   :  { %v234_v52 = vadd.f32 1e-05, %v233_v51 }
 0x223   :  { %784 = vrsqrt.f32 %v234_v52 }
 0x22d   :  { %v785_v53 = vpop.eup %784 }
 0x22e   :  { %v236_v55 = vmul.f32 %v785_v53, %v228_v35 }
 0x230   :  { %v243_v57 = vmul.f32 %v643_v54, %v236_v55  ;;  %v680_v54 = vld [vmem:[%s1041_s9] ss:$0 sm:$0xff] }
 0x232   :  { %v250_v58 = vadd.f32 %v644_v56, %v243_v57  ;;  %v681_v56 = vld [vmem:[%s1042_s10] ss:$0 sm:$0xff] }
 0x234   :  { %v251_v59 = vpack.c.bf16 %v250_v58, %v250_v58 }
 0x236   :  { %393 = vmatmul.mubr.bf16.vlgmr.msra.gmra.mrb[0].mxu1 %v251_v59 }
 0x309   :  { %v394_v19 = vpop.f32.mrb[0].mxu1 }
 0x30a   :  { %v395_v20 = vadd.f32 %v394_v19, %v273_v17  ;;  %v396_v21 = vpop.f32.mrb[1].mxu1 }
 0x30b   :  { %v397_v22 = vadd.f32 %v396_v21, %v277_v18  ;;  %v398_v23 = vpop.f32.mrb[2].mxu1 }
 0x30c   :  { %v661_v24 = vmul.f32 -1.442695, %v395_v20  ;;  %v399_v25 = vpop.f32.mrb[3].mxu1 }
 0x30d   :  { %v662_v26 = vmul.f32 -1.442695, %v397_v22 }
 0x30e   :  { %786 = vpow2.f32 %v661_v24 }
 0x30f   :  { %788 = vpow2.f32 %v662_v26 }
 0x318   :  { %v787_v27 = vpop.eup %786 }
 0x319   :  { %v789_v28 = vpop.eup %788  ;;  %v407_v29 = vadd.f32 1.0, %v787_v27 }
 0x31a   :  { %v408_v30 = vadd.f32 1.0, %v789_v28 }
 0x31b   :  { %790 = vrcp.f32 %v407_v29 }
 0x31c   :  { %792 = vrcp.f32 %v408_v30 }
 0x325   :  { %v791_v31 = vpop.eup %790 }
 0x326   :  { %v793_v32 = vpop.eup %792  ;;  %v413_v33 = vmul.f32 %v791_v31, %v395_v20 }
 0x327   :  { %v414_v34 = vmul.f32 %v793_v32, %v397_v22 }
 0x328   :  { %v415_v36 = vpack.c.bf16 %v413_v33, %v413_v33 }
 0x329   :  { %v416_v35 = vpack.c.bf16 %v414_v34, %v414_v34 }
 0x32b   :  { %584 = vmatprep.mubr.bf16.mxu0 %v416_v35 }
 0x32c   :  { %585 = vmatmul.mubr.bf16.vlgmr.msra.gmra.mrb[4].mxu0 %v415_v36 }
 0x3ff   :  { %v720_v37 = vpop.f32.mrb[4].mxu0 }
 0x400   :  { %v721_v38 = vpop.f32.mrb[5].mxu0 }
 0x401   :  { %v722_v40 = vadd.f32 %v721_v38, %v720_v37  ;;  %v723_v41 = vpop.f32.mrb[6].mxu0 }
 0x402   :  { %v724_v42 = vpop.f32.mrb[7].mxu0 }
 0x403   :  { %v587_v43 = vadd.f32 %v722_v40, %v663_v39 }
 0x405   :  { %v594_v44 = vsel %vm222_vm0, %v587_v43, 0.0 }
 0x406   :  { %595 = vadd.xlane.f32.xlu1 %v594_v44 }
 0x493   :  { %v596_v45 = vpop.xlane.xlu1 %595 }
 0x494   :  { %v597_v46 = vmul.f32 0.0078125, %v596_v45 }
 0x496   :  { %v598_v47 = vsub.f32 %v587_v43, %v597_v46 }
 0x498   :  { %v599_v48 = vmul.f32 %v598_v47, %v598_v47 }
 0x49a   :  { %v600_v49 = vsel %vm222_vm0, %v599_v48, 0.0 }
 0x49b   :  { %601 = vadd.xlane.f32.xlu1 %v600_v49 }
 0x528   :  { %v602_v50 = vpop.xlane.xlu1 %601 }
 0x529   :  { %v603_v51 = vmul.f32 0.0078125, %v602_v50 }
 0x52b   :  { %v604_v52 = vadd.f32 1e-05, %v603_v51 }
 0x52d   :  { %794 = vrsqrt.f32 %v604_v52 }
 0x537   :  { %v795_v53 = vpop.eup %794 }
 0x538   :  { %v606_v55 = vmul.f32 %v795_v53, %v598_v47 }
 0x53a   :  { %v613_v57 = vmul.f32 %v680_v54, %v606_v55 }
 0x53c   :  { %v620_v58 = vadd.f32 %v681_v56, %v613_v57 }
 0x53e   :  { %621 = vst [vmem:[%s1043_s11] sm:$0xf] %v620_v58 }

// kernel: starvector2_forward.3
= control target key start
LH: loop header
LB: loop body
LE: loop exit
PB: predicated region body
PF: predicated region fallthrough
CT: control target
= control target key end

     0   :  { %s4053_s0 = inlined_call_operand.vmem [shape: f32[16,128], index: 0, kind: input, shape index: {}]   ;;  %s4054_s1 = inlined_call_operand.vmem [shape: f32[16,256], index: 1, kind: input, shape index: {}]   ;;  %s4055_s2 = inlined_call_operand.vmem [shape: f32[16,256], index: 2, kind: input, shape index: {}]   ;;  %s4056_s3 = inlined_call_operand.vmem [shape: f32[2,1,128], index: 3, kind: input, shape index: {}]   ;;  %s4057_s4 = inlined_call_operand.vmem [shape: f32[2,1,128], index: 4, kind: input, shape index: {}]   ;;  %s4058_s5 = inlined_call_operand.vmem [shape: bf16[2,128,384], index: 5, kind: input, shape index: {}]   ;;  %s4059_s6 = inlined_call_operand.vmem [shape: f32[2,1,384], index: 6, kind: input, shape index: {}]   ;;  %s4060_s7 = inlined_call_operand.vmem [shape: bf16[2,128,128], index: 7, kind: input, shape index: {}]   ;;  %s4061_s8 = inlined_call_operand.vmem [shape: f32[2,1,128], index: 8, kind: input, shape index: {}]   ;;  %s4062_s9 = inlined_call_operand.vmem [shape: f32[2,1,128], index: 9, kind: input, shape index: {}]   ;;  %s4063_s10 = inlined_call_operand.vmem [shape: f32[2,1,128], index: 10, kind: input, shape index: {}]   ;;  %s4064_s11 = inlined_call_operand.vmem [shape: bf16[2,128,512], index: 11, kind: input, shape index: {}]   ;;  %s4065_s12 = inlined_call_operand.vmem [shape: f32[2,1,512], index: 12, kind: input, shape index: {}]   ;;  %s4066_s13 = inlined_call_operand.vmem [shape: bf16[2,512,128], index: 13, kind: input, shape index: {}]   ;;  %s4067_s14 = inlined_call_operand.vmem [shape: f32[2,1,128], index: 14, kind: input, shape index: {}]   ;;  %s4068_s15 = inlined_call_operand.vmem [shape: f32[1,128], index: 15, kind: input, shape index: {}]   ;;  %s4069_s16 = inlined_call_operand.vmem [shape: f32[1,128], index: 16, kind: input, shape index: {}]   ;;  %s4070_s17 = inlined_call_operand.hbm [shape: f32[16,128], index: 17, kind: output, shape index: {}]  }
   0x1   :  { %4076 = sst [smem:[#allocation7_spill]] %s4053_s0 }
   0x2   :  { %4077 = sst [smem:[#allocation8_spill]] %s4054_s1 }
   0x3   :  { %4078 = sst [smem:[#allocation9_spill]] %s4055_s2 }
   0x4   :  { %4079 = sst [smem:[#allocation10_spill]] %s4058_s5 }
   0x5   :  { %4080 = sst [smem:[#allocation11_spill]] %s4060_s7 }
   0x6   :  { %4081 = sst [smem:[#allocation12_spill]] %s4068_s15 }
   0x7   :  { %4082 = sst [smem:[#allocation13_spill]] %s4069_s16 }
   0x8   :  { %4083 = sst [smem:[#allocation14_spill]] %s4070_s17 }
   0x9   :  { %22 = vsyncpa [#allocation4], 0  ;;  %s3523_s24 = smov 0  }
   0xa LB: > { %4084 = sst [smem:[#allocation6_spill]] %s3420_s24  ;;  %s3529_s25 = sadd.s32 4294967295, %s3420_s24   ;;  %s3420_s24 = sphi %s3523_s24, %s28_s24  }
   0xb   : > { %p2860_p0 = scmp.ge.s32.totalorder %s3420_s24, 1  ;;  %p579_p1 = scmp.lt.s32.totalorder %s3420_s24, 3 }
   0xd   : > { %p580_p2 = pnand %p2860_p0, %p579_p1 }
   0xe   : > { %p667_p3 = scmp.lt.s32.totalorder (!%p580_p2), %s3529_s25, 1  ;;  %s4085_s7 = sld [smem:[#allocation11_spill]] (!%p580_p2) }
   0xf   : > { %583 = sbr.rel (%p580_p2) target bundleno = 2998 (0xbb6), region = 88  ;;  %s4086_s5 = sld [smem:[#allocation10_spill]] (!%p580_p2) }
  0x10   : > { %p2869_p4 = scmp.ne.s32.totalorder (!%p580_p2), %s3529_s25, 0 }
  0x16   : > { %s3535_s26 = scalar_select %p667_p3, %s3529_s25, 1 }
  0x17   : > { %717 = sbr.rel (%p2869_p4) target bundleno = 38 (0x26), region = 92 }
  0x18   : > { %s3175_s19 = smul.u32 192, %s3535_s26  ;;  %s2991_s1 = sshll.u32 %s3535_s26, 6 }
  0x19   : > { %s3176_s20 = smul.u32 3, %s3535_s26  ;;  %s3551_s23 = scalar_lea.vmem %s4085_s7, %s2991_s1 }
  0x1a   : > { %s3556_s24 = scalar_lea.vmem %s4086_s5, %s3175_s19  ;;  %s2992_s27 = sshll.u32 %s3535_s26, 8 }
  0x1b   : > { %s3565_s18 = scalar_lea.vmem %s4059_s6, %s3176_s20  ;;  %s3579_s5 = scalar_lea.vmem %s4064_s11, %s2992_s27 }
  0x1c   : > { %s2866_s17 = sshll.u32 %s3535_s26, 2  ;;  %s3590_s2 = scalar_lea.vmem %s4066_s13, %s2992_s27 }
  0x1d   : > { %s3585_s20 = scalar_lea.vmem %s4065_s12, %s2866_s17  ;;  %s712_s22 = scalar_lea.vmem %s4067_s14, %s3535_s26 }
  0x1e   : > { %s4087_s7 = sld [smem:[#allocation7_spill]] }
  0x24   : > { %v718_v0 = vld [vmem:[%s4087_s7] sm:$0xff]  ;;  %v719_v1 = vld [vmem:[%s4087_s7 + $0x8] sm:$0xff] }
  0x25   : > { %720 = vst [vmem:[#allocation2] sm:$0xff] %v718_v0  ;;  %721 = vst [vmem:[#allocation2 + $0x8] sm:$0xff] %v719_v1 }
  0x26 PF: > { %v3202_v4 = vld [vmem:[%s3556_s24 + $0x4] ss:$12 sps:$4 sm:$0xff]   ;;  %v3204_v5 = vld [vmem:[%s3556_s24] ss:$12 sps:$4 sm:$0xff]   ;;  %v3422_v6 = vmov 0.0   ;;  %v3423_v32 = vmov 0   ;;  %s4088_s27 = scalar_lea.vmem %s4056_s3, %s3535_s26  ;;  %s4089_s0 = scalar_lea.vmem %s4057_s4, %s3535_s26  ;;  %v800_v55 = vlaneseq }
  0x27   : > { %3075 = vmatprep.subr.bf16.mxu1 %v3422_v6  ;;  %v3205_v7 = vld [vmem:[%s3556_s24 + $0x8] ss:$12 sps:$4 sm:$0xff]   ;;  %943 = vmatprep.subr.bf16.mxu0 %v3202_v4  ;;  %v3208_v17 = vld [vmem:[%s3556_s24 + $0x18] ss:$12 sps:$4 sm:$0xff]   ;;  %v3209_v18 = vld [vmem:[%s3556_s24 + $0x20] ss:$12 sps:$4 sm:$0xff]   ;;  %s4097_s15 = scalar_lea.vmem %s4062_s9, %s3535_s26  ;;  %s4098_s16 = scalar_lea.vmem %s4063_s10, %s3535_s26 }
  0x28   : > { %v3206_v8 = vld [vmem:[%s3556_s24 + $0x1c] ss:$12 sps:$4 sm:$0xff]   ;;  %944 = vmatpush1.bf16.msra.mxu0 %v3204_v5  ;;  %3076 = vmatpush3.bf16.msra.mxu1 %v3205_v7  ;;  %v3210_v19 = vld [vmem:[%s3556_s24 + $0x34] ss:$12 sps:$4 sm:$0xff]   ;;  %v3213_v21 = vld [vmem:[%s3556_s24 + $0x38] ss:$12 sps:$4 sm:$0xff]  }
  0x29   : > { %945 = vmatprep.subr.bf16.mxu0 %v3206_v8  ;;  %3077 = vmatprep.subr.bf16.mxu1 %v3422_v6  ;;  %v3212_v20 = vld [vmem:[%s3556_s24 + $0x30] ss:$12 sps:$4 sm:$0xff]   ;;  %v3214_v22 = vld [vmem:[%s3556_s24 + $0x4c] ss:$12 sps:$4 sm:$0xff]   ;;  %v3216_v23 = vld [vmem:[%s3556_s24 + $0x48] ss:$12 sps:$4 sm:$0xff]  }
  0x2a   : > { %v3217_v24 = vld [vmem:[%s3556_s24 + $0x50] ss:$12 sps:$4 sm:$0xff]   ;;  %v3220_v26 = vld [vmem:[%s3556_s24 + $0x60] ss:$12 sps:$4 sm:$0xff]   ;;  %v3221_v27 = vld [vmem:[%s3556_s24 + $0x68] ss:$12 sps:$4 sm:$0xff]   ;;  %975 = vmatprep.mubr.bf16.mxu0 %v3423_v32 }
  0x2b   : > { %v3218_v25 = vld [vmem:[%s3556_s24 + $0x64] ss:$12 sps:$4 sm:$0xff]   ;;  %v3222_v28 = vld [vmem:[%s3556_s24 + $0x7c] ss:$12 sps:$4 sm:$0xff]   ;;  %v3225_v30 = vld [vmem:[%s3556_s24 + $0x80] ss:$12 sps:$4 sm:$0xff]  }
  0x2c   : > { %v722_v2 = vld [vmem:[#allocation2] sm:$0xff]  ;;  %v723_v3 = vld [vmem:[#allocation2 + $0x8] sm:$0xff]  ;;  %946 = vmatpush1.bf16.msra.mxu0 %v3208_v17  ;;  %3078 = vmatpush3.bf16.msra.mxu1 %v3209_v18  ;;  %vm3424_vm0 = vmmov 0   ;;  %v3228_v33 = vld [vmem:[%s3556_s24 + $0x90] ss:$12 sps:$4 sm:$0xff]   ;;  %v3664_v56 = vshrl.u32 %v800_v55, 7 }
  0x2d   : > { %726 = vadd.xlane.f32.xlu0 %v722_v2  ;;  %3079 = vmatprep.subr.bf16.mxu1 %v3422_v6  ;;  %v3224_v29 = vld [vmem:[%s3556_s24 + $0x78] ss:$12 sps:$4 sm:$0xff]   ;;  %v3226_v31 = vld [vmem:[%s3556_s24 + $0x94] ss:$12 sps:$4 sm:$0xff]   ;;  %v3233_v37 = vld [vmem:[%s3556_s24 + $0xb0] ss:$12 sps:$4 sm:$0xff]  }
  0x2e   : > { %947 = vmatprep.subr.bf16.mxu0 %v3210_v19  ;;  %3091 = vmatprep.mubr.msk.bf16.mxu1 %vm3424_vm0, %v3422_v6  ;;  %v3229_v34 = vld [vmem:[%s3556_s24 + $0x98] ss:$12 sps:$4 sm:$0xff]   ;;  %v3232_v36 = vld [vmem:[%s3556_s24 + $0xa8] ss:$12 sps:$4 sm:$0xff]   ;;  %v2870_v46 = vld [vmem:[%s4088_s27] ss:$0 sm:$0xff] }
  0x2f   : > { %v3230_v35 = vld [vmem:[%s3556_s24 + $0xac] ss:$12 sps:$4 sm:$0xff]   ;;  %v2871_v50 = vld [vmem:[%s4089_s0] ss:$0 sm:$0xff]  ;;  %v802_v57 = vsub.s32 0, %v3664_v56  ;;  %v806_v59 = vsub.s32 1, %v3664_v56 }
  0x30   : > { %948 = vmatpush1.bf16.msra.mxu0 %v3212_v20  ;;  %3080 = vmatpush3.bf16.msra.mxu1 %v3213_v21  ;;  %v798_v58 = vld [vmem:[%s3565_s18] sm:$0x7]  ;;  %v810_v60 = vsub.s32 2, %v3664_v56  ;;  %s3425_s18 = smov 112   ;;  %s3426_s30 = smov 16   ;;  %v3682_v18 = vand.u32 127, %v800_v55 }
  0x31   : > { %728 = vadd.xlane.f32.xlu0 %v723_v3  ;;  %3081 = vmatprep.subr.bf16.mxu1 %v3422_v6  ;;  %v803_v61 = vrot.slane %v798_v58, %v802_v57  ;;  %v807_v62 = vrot.slane %v798_v58, %v806_v59  ;;  %s4094_s19 = sld [smem:[#allocation9_spill]]  ;;  %s4095_s27 = sld [smem:[#allocation8_spill]]  ;;  %vm1141_vm5 = vcmask 261120   ;;  %vm1355_vm7 = vcmask 130048  }
  0x32   : > { %949 = vmatprep.subr.bf16.mxu0 %v3214_v22  ;;  %v811_v63 = vrot.slane %v798_v58, %v810_v60  ;;  %v1029_v20 = vadd.s32 128, %v3682_v18  ;;  %vm1077_vm1 = vcmp.lt.s32.totalorder %v3682_v18, 112  ;;  %v1034_v22 = vand.u32 31, %v3682_v18  ;;  %s3427_s21 = smov 96   ;;  %s3428_s17 = smov 64  }
  0x33   : > { %vm1064_vm2 = vcmp.lt.s32.totalorder %v3682_v18, 16  ;;  %s3429_s29 = smov 32   ;;  %vm1341_vm6 = vcmp.ge.s32.totalorder %v3664_v56, %v3682_v18  ;;  %p2984_p5 = scmp.ne.s32.totalorder %s3529_s25, 1 }
  0x34   : > { %950 = vmatpush1.bf16.msra.mxu0 %v3216_v23  ;;  %3082 = vmatpush3.bf16.msra.mxu1 %v3217_v24  ;;  %v1041_v23 = vand.u32 31, %v1029_v20  ;;  %vm3692_vm3 = vcmp.lt.s32.totalorder %v1034_v22, 16  ;;  %v1340_v22 = vadd.s32 8, %v3664_v56  ;;  %s4099_s24 = sld [smem:[#allocation12_spill]] (!%p2984_p5) }
  0x35   : > { %3083 = vmatprep.subr.bf16.mxu1 %v3422_v6  ;;  %951 = vmatprep.subr.bf16.mxu0 %v3218_v25 }
  0x36   : > { %vm3696_vm4 = vcmp.lt.s32.totalorder %v1041_v23, 16  ;;  %vm1342_vm8 = vcmp.ge.s32.totalorder %v1340_v22, %v3682_v18 }
  0x38   : > { %952 = vmatpush1.bf16.msra.mxu0 %v3220_v26  ;;  %3084 = vmatpush3.bf16.msra.mxu1 %v3221_v27 }
  0x39   : > { %953 = vmatprep.subr.bf16.mxu0 %v3222_v28  ;;  %3085 = vmatprep.subr.bf16.mxu1 %v3422_v6 }
  0x3c   : > { %954 = vmatpush1.bf16.msra.mxu0 %v3224_v29  ;;  %3086 = vmatpush3.bf16.msra.mxu1 %v3225_v30 }
  0x3d   : > { %955 = vmatprep.subr.bf16.mxu0 %v3226_v31  ;;  %3087 = vmatprep.subr.bf16.mxu1 %v3422_v6 }
  0x40   : > { %956 = vmatpush1.bf16.msra.mxu0 %v3228_v33  ;;  %3088 = vmatpush3.bf16.msra.mxu1 %v3229_v34 }
  0x41   : > { %957 = vmatprep.subr.bf16.mxu0 %v3230_v35  ;;  %3089 = vmatprep.subr.bf16.mxu1 %v3422_v6 }
  0x44   : > { %958 = vmatpush1.bf16.msra.mxu0 %v3232_v36  ;;  %3090 = vmatpush3.bf16.msra.mxu1 %v3233_v37 }
  0x45   : > { %3095 = vmatprep.subr.bf16.mxu0 %v3422_v6  ;;  %3101 = vmatprep.subr.bf16.mxu1 %v3422_v6 }
  0xba   : > { %v727_v9 = vpop.xlane.xlu0 %726 }
  0xbb   : > { %v731_v10 = vmul.f32 0.0078125, %v727_v9 }
  0xbd   : > { %v3609_v11 = vsub.f32 %v722_v2, %v731_v10 }
  0xbe   : > { %v729_v12 = vpop.xlane.xlu0 %728 }
  0xbf   : > { %v732_v13 = vmul.f32 0.0078125, %v729_v12  ;;  %v735_v14 = vmul.f32 %v3609_v11, %v3609_v11 }
  0xc1   : > { %v3613_v15 = vsub.f32 %v723_v3, %v732_v13  ;;  %737 = vadd.xlane.f32.xlu1 %v735_v14 }
  0xc3   : > { %v736_v16 = vmul.f32 %v3613_v15, %v3613_v15 }
  0xc5   : > { %739 = vadd.xlane.f32.xlu1 %v736_v16 }
 0x14e   : > { %v738_v38 = vpop.xlane.xlu1 %737 }
 0x14f   : > { %v741_v39 = vmul.f32 0.0078125, %v738_v38  ;;  %v1102_v38 = vld [vmem:[%s4094_s19] sm:$0xff] }
 0x151   : > { %v743_v40 = vadd.f32 1e-05, %v741_v39  ;;  %v1103_v39 = vld [vmem:[%s4094_s19 + $0x8] sm:$0xff] }
 0x152   : > { %v740_v41 = vpop.xlane.xlu1 %739 }
 0x153   : > { %3322 = vrsqrt.f32 %v743_v40  ;;  %v742_v42 = vmul.f32 0.0078125, %v740_v41 }
 0x155   : > { %v744_v43 = vadd.f32 1e-05, %v742_v42  ;;  %v1094_v42 = vld [vmem:[%s4095_s27] sm:$0xff] }
 0x157   : > { %3324 = vrsqrt.f32 %v744_v43  ;;  %v1095_v43 = vld [vmem:[%s4095_s27 + $0x8] sm:$0xff] }
 0x15d   : > { %v3323_v44 = vpop.eup %3322 }
 0x15e   : > { %v747_v45 = vmul.f32 %v3323_v44, %v3609_v11  ;;  %v1096_v44 = vld [vmem:[%s4095_s27 + $0x10] sm:$0xff] }
 0x160   : > { %v755_v49 = vmul.f32 %v2870_v46, %v747_v45  ;;  %v1097_v45 = vld [vmem:[%s4095_s27 + $0x18] sm:$0xff] }
 0x161   : > { %v3325_v47 = vpop.eup %3324 }
 0x162   : > { %v748_v48 = vmul.f32 %v3325_v47, %v3613_v15  ;;  %v763_v52 = vadd.f32 %v2871_v50, %v755_v49  ;;  %v1105_v49 = vld [vmem:[%s4094_s19 + $0x18] sm:$0xff] }
 0x164   : > { %v756_v51 = vmul.f32 %v2870_v46, %v748_v48  ;;  %v1104_v48 = vld [vmem:[%s4094_s19 + $0x10] sm:$0xff] }
 0x166   : > { %v764_v53 = vadd.f32 %v2871_v50, %v756_v51 }
 0x168   : > { %v765_v54 = vpack.c.bf16 %v764_v53, %v763_v52 }
 0x16a   : > { %976 = vmatmul.mubr.bf16.vlgmr.msra.gmra.mrb[0].mxu0 %v765_v54  ;;  %3092 = vmatmul.mubr.bf16.vlgmr.msra.gmra.mrb[0].mxu1 %v765_v54 }
 0x16b   : > { %3097 = vmatprep.mubr.msk.bf16.mxu0 %vm3424_vm0, %v3422_v6  ;;  %3103 = vmatprep.mubr.msk.bf16.mxu1 %vm3424_vm0, %v3422_v6 }
 0x23d   : > { %v977_v0 = vpop.f32.mrb[0].mxu0  ;;  %v1020_v1 = vpop.f32.mrb[0].mxu1 }
 0x23e   : > { %v3676_v2 = vadd.f32 %v977_v0, %v803_v61  ;;  %v979_v3 = vpop.f32.mrb[1].mxu0  ;;  %v3093_v4 = vpop.f32.mrb[1].mxu1  ;;  %v1021_v9 = vadd.f32 %v1020_v1, %v811_v63 }
 0x23f   : > { %v980_v5 = vadd.f32 %v979_v3, %v807_v62  ;;  %v981_v7 = vpop.f32.mrb[2].mxu0  ;;  %v1023_v8 = vpop.f32.mrb[2].mxu1 }
 0x240   : > { %v1024_v10 = vadd.f32 %v1023_v8, %v811_v63  ;;  %v983_v11 = vpop.f32.mrb[3].mxu0  ;;  %v3094_v12 = vpop.f32.mrb[3].mxu1  ;;  %1069 = vrot.lane.b32.xlu0 %v3676_v2, %s3425_s18  ;;  %v982_v14 = vadd.f32 %v981_v7, %v803_v61  ;;  %v1098_v55 = vmul.f32 %v1094_v42, %v3676_v2 }
 0x241   : > { %1073 = vrot.lane.b32.xlu1 %v980_v5, %s3425_s18  ;;  %v984_v15 = vadd.f32 %v983_v11, %v807_v62  ;;  %v1099_v58 = vmul.f32 %v1095_v43, %v980_v5 }
 0x242   : > { %v3679_v13 = vpack.c.bf16 %v1024_v10, %v1021_v9  ;;  %v1100_v63 = vmul.f32 %v1096_v44, %v982_v14 }
 0x243   : > { %v1101_v0 = vmul.f32 %v1097_v45, %v984_v15 }
 0x244   : > { %1056 = vrot.lane.b32.xlu0 %v3676_v2, %s3426_s30 }
 0x245   : > { %1071 = vrot.lane.b32.xlu1 %v982_v14, %s3425_s18 }
 0x248   : > { %1060 = vrot.lane.b32.xlu0 %v980_v5, %s3426_s30 }
 0x249   : > { %1058 = vrot.lane.b32.xlu1 %v982_v14, %s3426_s30 }
 0x24d   : > { %1075 = vrot.lane.b32.xlu1 %v984_v15, %s3425_s18  ;;  %s4096_s18 = scalar_lea.vmem %s4061_s8, %s3535_s26 }
 0x251   : > { %1062 = vrot.lane.b32.xlu1 %v984_v15, %s3426_s30 }
 0x2b2   : > { %v1070_v16 = vpop.permute.xlu0 %1069 }
 0x2b3   : > { %v1074_v17 = vpop.permute.xlu1 %1073 }
 0x2b4   : > { %v1078_v26 = vsel %vm1077_vm1, %v1070_v16, %v1074_v17  ;;  %v1080_v27 = vsel %vm1077_vm1, %v1074_v17, %v1070_v16 }
 0x2b5   : > { %v1082_v33 = vsub.f32 0.0, %v1078_v26  ;;  %v1083_v34 = vsub.f32 0.0, %v1080_v27 }
 0x2b6   : > { %v1057_v19 = vpop.permute.xlu0 %1056 }
 0x2b7   : > { %v1072_v21 = vpop.permute.xlu1 %1071 }
 0x2ba   : > { %v1061_v24 = vpop.permute.xlu0 %1060 }
 0x2bb   : > { %v1059_v25 = vpop.permute.xlu1 %1058  ;;  %v1065_v30 = vsel %vm1064_vm2, %v1057_v19, %v1061_v24  ;;  %v1067_v31 = vsel %vm1064_vm2, %v1061_v24, %v1057_v19 }
 0x2bc   : > { %v1090_v40 = vsel %vm3692_vm3, %v1082_v33, %v1067_v31  ;;  %v1091_v41 = vsel %vm3696_vm4, %v1083_v34, %v1065_v30 }
 0x2bd   : > { %v1106_v51 = vmul.f32 %v1102_v38, %v1090_v40  ;;  %v1107_v52 = vmul.f32 %v1103_v39, %v1091_v41 }
 0x2bf   : > { %v1076_v35 = vpop.permute.xlu1 %1075  ;;  %v1110_v4 = vadd.f32 %v1106_v51, %v1098_v55  ;;  %v1111_v7 = vadd.f32 %v1107_v52, %v1099_v58 }
 0x2c0   : > { %v1079_v36 = vsel %vm1077_vm1, %v1072_v21, %v1076_v35  ;;  %v1081_v37 = vsel %vm1077_vm1, %v1076_v35, %v1072_v21 }
 0x2c1   : > { %v1084_v46 = vsub.f32 0.0, %v1079_v36  ;;  %v1085_v47 = vsub.f32 0.0, %v1081_v37 }
 0x2c3   : > { %v1063_v50 = vpop.permute.xlu1 %1062 }
 0x2c4   : > { %v1066_v53 = vsel %vm1064_vm2, %v1059_v25, %v1063_v50  ;;  %v1068_v54 = vsel %vm1064_vm2, %v1063_v50, %v1059_v25 }
 0x2c5   : > { %v1092_v61 = vsel %vm3692_vm3, %v1084_v46, %v1068_v54  ;;  %v1093_v62 = vsel %vm3696_vm4, %v1085_v47, %v1066_v53 }
 0x2c6   : > { %v1108_v1 = vmul.f32 %v1104_v48, %v1092_v61  ;;  %v1109_v3 = vmul.f32 %v1105_v49, %v1093_v62 }
 0x2c8   : > { %v1112_v8 = vadd.f32 %v1108_v1, %v1100_v63  ;;  %v1113_v9 = vadd.f32 %v1109_v3, %v1101_v0 }
 0x2ca   : > { %v1115_v10 = vpack.c.bf16 %v1113_v9, %v1111_v7  ;;  %v1114_v11 = vpack.c.bf16 %v1112_v8, %v1110_v4 }
 0x2cc   : > { %1125 = vrot.lane.b32.xlu0 %v1115_v10, %s3427_s21  ;;  %1118 = vrot.lane.b32.xlu1 %v1114_v11, %s3427_s21  ;;  %v1146_v2 = vsel %vm1141_vm5, %v1115_v10, 0 }
 0x2cd   : > { %3096 = vmatpush3.bf16.xpose.msra.mxu0 %v1146_v2 }
 0x2ce   : > { %3107 = vmatprep.subr.bf16.mxu0 %v3422_v6 }
 0x2d0   : > { %1127 = vrot.lane.b32.xlu0 %v1115_v10, %s3428_s17  ;;  %1129 = vrot.lane.b32.xlu1 %v1115_v10, %s3429_s29 }
 0x2d4   : > { %1120 = vrot.lane.b32.xlu0 %v1114_v11, %s3428_s17  ;;  %1122 = vrot.lane.b32.xlu1 %v1114_v11, %s3429_s29 }
 0x2d5   : > { %3098 = vmatmul.mubr.msk.bf16.vlgmr.msra.gmra.mrb[4].mxu0 %vm1141_vm5, %v1114_v11 }
 0x2d6   : > { %3109 = vmatprep.mubr.msk.bf16.mxu0 %vm3424_vm0, %v3422_v6 }
 0x33e   : > { %v1126_v5 = vpop.permute.xlu0 %1125  ;;  %v1119_v12 = vpop.permute.xlu1 %1118 }
 0x33f   : > { %v1193_v14 = vsel %vm1141_vm5, %v1126_v5, 0 }
 0x340   : > { %3102 = vmatpush3.bf16.xpose.msra.mxu1 %v1193_v14 }
 0x341   : > { %3113 = vmatprep.subr.bf16.mxu1 %v3422_v6 }
 0x342   : > { %v1128_v15 = vpop.permute.xlu0 %1127  ;;  %v1130_v17 = vpop.permute.xlu1 %1129 }
 0x343   : > { %v1240_v16 = vsel %vm1141_vm5, %v1128_v15, 0  ;;  %v1287_v19 = vsel %vm1141_vm5, %v1130_v17, 0 }
 0x344   : > { %3108 = vmatpush3.bf16.xpose.msra.mxu0 %v1240_v16 }
 0x345   : > { %3119 = vmatprep.subr.bf16.mxu0 %v3422_v6 }
 0x346   : > { %v1121_v20 = vpop.permute.xlu0 %1120  ;;  %v1123_v21 = vpop.permute.xlu1 %1122 }
 0x347   : > { %3104 = vmatmul.mubr.msk.bf16.vlgmr.msra.gmra.mrb[4].mxu1 %vm1141_vm5, %v1119_v12 }
 0x348   : > { %3114 = vmatpush3.bf16.xpose.msra.mxu1 %v1287_v19  ;;  %3115 = vmatprep.mubr.msk.bf16.mxu1 %vm3424_vm0, %v3422_v6 }
 0x349   : > { %3125 = vmatprep.subr.bf16.mxu1 %v3422_v6 }
 0x34b   : > { %3110 = vmatmul.mubr.msk.bf16.vlgmr.msra.gmra.mrb[8].mxu0 %vm1141_vm5, %v1121_v20 }
 0x34c   : > { %3120 = vmatpush3.bf16.msra.mxu0 %v3679_v13  ;;  %3121 = vmatprep.mubr.msk.bf16.mxu0 %vm3424_vm0, %v3422_v6 }
 0x34d   : > { %3131 = vmatprep.subr.bf16.mxu0 %v3422_v6 }
 0x34f   : > { %3116 = vmatmul.mubr.msk.bf16.vlgmr.msra.gmra.mrb[8].mxu1 %vm1141_vm5, %v1123_v21 }
 0x350   : > { %3127 = vmatprep.mubr.msk.bf16.mxu1 %vm3424_vm0, %v3422_v6 }
 0x3a8   : > { %v1182_v23 = vpop.f32.mrb[4].mxu0 }
 0x3a9   : > { %v1330_v24 = vmul.f32 0.17677669, %v1182_v23  ;;  %v3099_v25 = vpop.f32.mrb[5].mxu0 }
 0x3aa   : > { %v1185_v26 = vpop.f32.mrb[6].mxu0 }
 0x3ab   : > { %v1331_v27 = vmul.f32 0.17677669, %v1185_v26  ;;  %v3100_v28 = vpop.f32.mrb[7].mxu0  ;;  %v1347_v29 = vsel %vm1341_vm6, %v1330_v24, -1e+30 }
 0x3ac   : > { %v1356_v30 = vsel %vm1355_vm7, %v1347_v29, -inf }
 0x3ad   : > { %1357 = vmax.xlane.f32.xlu0 %v1356_v30  ;;  %v1348_v31 = vsel %vm1342_vm8, %v1331_v27, -1e+30 }
 0x3ae   : > { %v1359_v33 = vsel %vm1355_vm7, %v1348_v31, -inf }
 0x3af   : > { %1360 = vmax.xlane.f32.xlu1 %v1359_v33 }
 0x41a   : > { %v1229_v34 = vpop.f32.mrb[4].mxu1 }
 0x41b   : > { %v1332_v35 = vmul.f32 0.17677669, %v1229_v34  ;;  %v3105_v36 = vpop.f32.mrb[5].mxu1 }
 0x41c   : > { %v1232_v37 = vpop.f32.mrb[6].mxu1 }
 0x41d   : > { %v1333_v38 = vmul.f32 0.17677669, %v1232_v37  ;;  %v3106_v39 = vpop.f32.mrb[7].mxu1  ;;  %v1349_v40 = vsel %vm1341_vm6, %v1332_v35, -1e+30 }
 0x41e   : > { %v1276_v41 = vpop.f32.mrb[8].mxu0  ;;  %v1362_v42 = vsel %vm1355_vm7, %v1349_v40, -inf }
 0x41f   : > { %v1334_v43 = vmul.f32 0.17677669, %v1276_v41  ;;  %1363 = vmax.xlane.f32.xlu0 %v1362_v42  ;;  %v3111_v44 = vpop.f32.mrb[9].mxu0  ;;  %v1350_v45 = vsel %vm1342_vm8, %v1333_v38, -1e+30 }
 0x420   : > { %v1279_v46 = vpop.f32.mrb[10].mxu0  ;;  %v1365_v50 = vsel %vm1355_vm7, %v1350_v45, -inf }
 0x421   : > { %v1335_v47 = vmul.f32 0.17677669, %v1279_v46  ;;  %v3112_v48 = vpop.f32.mrb[11].mxu0  ;;  %v1351_v51 = vsel %vm1341_vm6, %v1334_v43, -1e+30 }
 0x422   : > { %v1323_v49 = vpop.f32.mrb[8].mxu1  ;;  %v1368_v63 = vsel %vm1355_vm7, %v1351_v51, -inf }
 0x423   : > { %v1336_v52 = vmul.f32 0.17677669, %v1323_v49  ;;  %v3117_v53 = vpop.f32.mrb[9].mxu1  ;;  %1366 = vmax.xlane.f32.xlu0 %v1365_v50  ;;  %v1352_v54 = vsel %vm1342_vm8, %v1335_v47, -1e+30 }
 0x424   : > { %v1326_v55 = vpop.f32.mrb[10].mxu1  ;;  %v1371_v58 = vsel %vm1355_vm7, %v1352_v54, -inf }
 0x425   : > { %v1337_v61 = vmul.f32 0.17677669, %v1326_v55  ;;  %v3118_v62 = vpop.f32.mrb[11].mxu1  ;;  %1372 = vmax.xlane.f32.xlu1 %v1371_v58  ;;  %v1353_v1 = vsel %vm1341_vm6, %v1336_v52, -1e+30 }
 0x426   : > { %v1374_v4 = vsel %vm1355_vm7, %v1353_v1, -inf }
 0x427   : > { %1369 = vmax.xlane.f32.xlu0 %v1368_v63  ;;  %v3800_v0 = vsel %vm1342_vm8, %v1337_v61, -1e+30 }
 0x428   : > { %v1377_v3 = vsel %vm1355_vm7, %v3800_v0, -inf }
 0x429   : > { %1378 = vmax.xlane.f32.xlu1 %v1377_v3 }
 0x42b   : > { %1375 = vmax.xlane.f32.xlu0 %v1374_v4 }
 0x43a   : > { %v1358_v7 = vpop.xlane.xlu0 %1357 }
 0x43b   : > { %v1380_v8 = vsub.f32 %v1347_v29, %v1358_v7 }
 0x43c   : > { %v1361_v9 = vpop.xlane.xlu1 %1360 }
 0x43d   : > { %v1388_v10 = vmul.f32 1.442695, %v1380_v8  ;;  %v1381_v11 = vsub.f32 %v1348_v31, %v1361_v9 }
 0x43f   : > { %3326 = vpow2.f32 %v1388_v10  ;;  %v1390_v2 = vmul.f32 1.442695, %v1381_v11 }
 0x441   : > { %3328 = vpow2.f32 %v1390_v2  ;;  %v3236_v2 = vld [vmem:[%s3551_s23 + $0x10] sm:$0xff]  }
 0x449   : > { %v3327_v5 = vpop.eup %3326 }
 0x44a   : > { %v1404_v12 = vsel %vm1355_vm7, %v3327_v5, 0.0 }
 0x44b   : > { %v3329_v18 = vpop.eup %3328  ;;  %1405 = vadd.xlane.f32.xlu0 %v1404_v12 }
 0x44c   : > { %v1407_v14 = vsel %vm1355_vm7, %v3329_v18, 0.0 }
 0x44d   : > { %1408 = vadd.xlane.f32.xlu1 %v1407_v14 }
 0x4ac   : > { %v1364_v15 = vpop.xlane.xlu0 %1363 }
 0x4ad   : > { %v1382_v16 = vsub.f32 %v1349_v40, %v1364_v15 }
 0x4af   : > { %v1392_v17 = vmul.f32 1.442695, %v1382_v16 }
 0x4b0   : > { %v1367_v19 = vpop.xlane.xlu0 %1366 }
 0x4b1   : > { %3330 = vpow2.f32 %v1392_v17  ;;  %v1383_v20 = vsub.f32 %v1350_v45, %v1367_v19  ;;  %v3234_v19 = vld [vmem:[%s3551_s23] sm:$0xff]  }
 0x4b2   : > { %v1373_v21 = vpop.xlane.xlu1 %1372 }
 0x4b3   : > { %v1394_v22 = vmul.f32 1.442695, %v1383_v20  ;;  %v1385_v23 = vsub.f32 %v1352_v54, %v1373_v21  ;;  %v3235_v21 = vld [vmem:[%s3551_s23 + $0x8] sm:$0xff]  }
 0x4b4   : > { %v1370_v24 = vpop.xlane.xlu0 %1369 }
 0x4b5   : > { %3332 = vpow2.f32 %v1394_v22  ;;  %v1398_v25 = vmul.f32 1.442695, %v1385_v23  ;;  %v1384_v26 = vsub.f32 %v1351_v51, %v1370_v24  ;;  %v3237_v22 = vld [vmem:[%s3551_s23 + $0x18] sm:$0xff]  }
 0x4b6   : > { %v1379_v42 = vpop.xlane.xlu1 %1378 }
 0x4b7   : > { %3334 = vpow2.f32 %v1398_v25  ;;  %v1396_v27 = vmul.f32 1.442695, %v1384_v26  ;;  %v1387_v46 = vsub.f32 %v3800_v0, %v1379_v42  ;;  %v3240_v26 = vld [vmem:[%s3551_s23 + $0x30] sm:$0xff]  }
 0x4b8   : > { %v1376_v28 = vpop.xlane.xlu0 %1375 }
 0x4b9   : > { %3336 = vpow2.f32 %v1396_v27  ;;  %v1386_v29 = vsub.f32 %v1353_v1, %v1376_v28  ;;  %v1402_v50 = vmul.f32 1.442695, %v1387_v46 }
 0x4bb   : > { %v3331_v30 = vpop.eup %3330  ;;  %v1400_v31 = vmul.f32 1.442695, %v1386_v29  ;;  %v3241_v29 = vld [vmem:[%s3551_s23 + $0x38] sm:$0xff]  }
 0x4bc   : > { %v1410_v33 = vsel %vm1355_vm7, %v3331_v30, 0.0 }
 0x4bd   : > { %3338 = vpow2.f32 %v1400_v31  ;;  %1411 = vadd.xlane.f32.xlu0 %v1410_v33 }
 0x4bf   : > { %v3333_v34 = vpop.eup %3332 }
 0x4c0   : > { %v1413_v35 = vsel %vm1355_vm7, %v3333_v34, 0.0 }
 0x4c1   : > { %v3335_v36 = vpop.eup %3334  ;;  %1414 = vadd.xlane.f32.xlu1 %v1413_v35 }
 0x4c2   : > { %v1419_v39 = vsel %vm1355_vm7, %v3335_v36, 0.0 }
 0x4c3   : > { %v3337_v37 = vpop.eup %3336 }
 0x4c4   : > { %v1416_v38 = vsel %vm1355_vm7, %v3337_v37, 0.0 }
 0x4c5   : > { %1417 = vadd.xlane.f32.xlu0 %v1416_v38  ;;  %1420 = vadd.xlane.f32.xlu1 %v1419_v39  ;;  %v3239_v39 = vld [vmem:[%s3551_s23 + $0x28] sm:$0xff]  }
 0x4c7   : > { %v3814_v40 = vpop.eup %3338 }
 0x4c8   : > { %v1422_v41 = vsel %vm1355_vm7, %v3814_v40, 0.0 }
 0x4c9   : > { %1423 = vadd.xlane.f32.xlu0 %v1422_v41 }
 0x4d6   : > { %1135 = vrot.lane.b32.xlu1 %v3679_v13, %s3428_s17 }
 0x4d8   : > { %v1406_v43 = vpop.xlane.xlu0 %1405 }
 0x4d9   : > { %3340 = vrcp.f32 %v1406_v43 }
 0x4da   : > { %v1409_v44 = vpop.xlane.xlu1 %1408 }
 0x4db   : > { %3342 = vrcp.f32 %v1409_v44 }
 0x4dc   : > { %3344 = vpow2.f32 %v1402_v50 }
 0x4df   : > { %1132 = vrot.lane.b32.xlu0 %v3679_v13, %s3427_s21 }
 0x4e3   : > { %v3341_v45 = vpop.eup %3340 }
 0x4e4   : > { %v1436_v48 = vmul.f32 %v3341_v45, %v3327_v5 }
 0x4e5   : > { %v3343_v47 = vpop.eup %3342 }
 0x4e6   : > { %v1437_v49 = vmul.f32 %v3343_v47, %v3329_v18  ;;  %v3345_v52 = vpop.eup %3344 }
 0x4e7   : > { %v1425_v53 = vsel %vm1355_vm7, %v3345_v52, 0.0 }
 0x4e8   : > { %v1444_v51 = vpack.c.bf16 %v1437_v49, %v1436_v48 }
 0x4ea   : > { %3122 = vmatmul.mubr.msk.bf16.vlgmr.msra.gmra.mrb[12].mxu0 %vm1355_vm7, %v1444_v51 }
 0x4eb   : > { %3133 = vmatprep.mubr.msk.bf16.mxu0 %vm3424_vm0, %v3422_v6 }
 0x4fa   : > { %1426 = vadd.xlane.f32.xlu1 %v1425_v53 }
 0x50b   : > { %1138 = vrot.lane.b32.xlu1 %v3679_v13, %s3429_s29  ;;  %s4100_s29 = sld [smem:[#allocation13_spill]] (!%p2984_p5) }
 0x54a   : > { %v1412_v54 = vpop.xlane.xlu0 %1411 }
 0x54b   : > { %3346 = vrcp.f32 %v1412_v54 }
 0x54e   : > { %v1415_v55 = vpop.xlane.xlu1 %1414 }
 0x54f   : > { %3348 = vrcp.f32 %v1415_v55 }
 0x552   : > { %v1418_v58 = vpop.xlane.xlu0 %1417  ;;  %v1421_v61 = vpop.xlane.xlu1 %1420 }
 0x553   : > { %3350 = vrcp.f32 %v1418_v58 }
 0x554   : > { %3352 = vrcp.f32 %v1421_v61 }
 0x555   : > { %v3347_v0 = vpop.eup %3346 }
 0x556   : > { %v1424_v62 = vpop.xlane.xlu0 %1423  ;;  %v1136_v63 = vpop.permute.xlu1 %1135  ;;  %v1438_v3 = vmul.f32 %v3347_v0, %v3331_v30 }
 0x557   : > { %3132 = vmatpush3.bf16.msra.mxu0 %v1136_v63  ;;  %3354 = vrcp.f32 %v1424_v62 }
 0x558   : > { %3143 = vmatprep.subr.bf16.mxu0 %v3422_v6 }
 0x559   : > { %v3349_v1 = vpop.eup %3348 }
 0x55a   : > { %v1439_v4 = vmul.f32 %v3349_v1, %v3333_v34  ;;  %v1133_v7 = vpop.permute.xlu0 %1132  ;;  %v3238_v34 = vld [vmem:[%s3551_s23 + $0x20] sm:$0xff]  }
 0x55b   : > { %3126 = vmatpush3.bf16.msra.mxu1 %v1133_v7 }
 0x55c   : > { %v1445_v13 = vpack.c.bf16 %v1439_v4, %v1438_v3  ;;  %3137 = vmatprep.subr.bf16.mxu1 %v3422_v6 }
 0x55d   : > { %v3351_v8 = vpop.eup %3350 }
 0x55e   : > { %v3353_v9 = vpop.eup %3352  ;;  %v1440_v10 = vmul.f32 %v3351_v8, %v3337_v37  ;;  %3128 = vmatmul.mubr.msk.bf16.vlgmr.msra.gmra.mrb[12].mxu1 %vm1355_vm7, %v1445_v13  ;;  %v2916_v8 = vld [vmem:[%s4096_s18] ss:$0 sm:$0xff] }
 0x55f   : > { %v1441_v11 = vmul.f32 %v3353_v9, %v3335_v36  ;;  %3139 = vmatprep.mubr.msk.bf16.mxu1 %vm3424_vm0, %v3422_v6  ;;  %v3378_v9 = vld [vmem:[#allocation2] sm:$0xff] }
 0x561   : > { %v1446_v5 = vpack.c.bf16 %v1441_v11, %v1440_v10  ;;  %v3355_v14 = vpop.eup %3354 }
 0x562   : > { %v1442_v16 = vmul.f32 %v3355_v14, %v3814_v40 }
 0x563   : > { %3134 = vmatmul.mubr.msk.bf16.vlgmr.msra.gmra.mrb[16].mxu0 %vm1355_vm7, %v1446_v5  ;;  %v3379_v5 = vld [vmem:[#allocation2 + $0x8] sm:$0xff] }
 0x564   : > { %3144 = vmatpush3.bf16.msra.mxu0 %v3236_v2  ;;  %3147 = vmatprep.mubr.msk.bf16.mxu0 %vm3424_vm0, %v3422_v6 }
 0x565   : > { %3145 = vmatprep.subr.bf16.mxu0 %v3422_v6 }
 0x568   : > { %3146 = vmatpush3.bf16.msra.mxu0 %v3237_v22  ;;  %v3248_v22 = vld [vmem:[%s3579_s5 + $0x20] ss:$16 sps:$4 sm:$0xff]  }
 0x569   : > { %3159 = vmatprep.subr.bf16.mxu0 %v3422_v6 }
 0x587   : > { %v1427_v12 = vpop.xlane.xlu1 %1426 }
 0x588   : > { %3356 = vrcp.f32 %v1427_v12 }
 0x58b   : > { %v1139_v18 = vpop.permute.xlu1 %1138 }
 0x58c   : > { %3138 = vmatpush3.bf16.msra.mxu1 %v1139_v18 }
 0x58d   : > { %3151 = vmatprep.subr.bf16.mxu1 %v3422_v6 }
 0x592   : > { %v3357_v15 = vpop.eup %3356 }
 0x593   : > { %v1443_v17 = vmul.f32 %v3357_v15, %v3345_v52  ;;  %v3242_v15 = vld [vmem:[%s3579_s5] ss:$16 sps:$4 sm:$0xff]  }
 0x595   : > { %v1447_v20 = vpack.c.bf16 %v1443_v17, %v1442_v16  ;;  %v3244_v16 = vld [vmem:[%s3579_s5 + $0x4] ss:$16 sps:$4 sm:$0xff]   ;;  %v3245_v17 = vld [vmem:[%s3579_s5 + $0x8] ss:$16 sps:$4 sm:$0xff]  }
 0x597   : > { %3140 = vmatmul.mubr.msk.bf16.vlgmr.msra.gmra.mrb[16].mxu1 %vm1355_vm7, %v1447_v20  ;;  %v3250_v20 = vld [vmem:[%s3579_s5 + $0x24] ss:$16 sps:$4 sm:$0xff]  }
 0x598   : > { %3152 = vmatpush3.bf16.msra.mxu1 %v3234_v19  ;;  %3155 = vmatprep.mubr.msk.bf16.mxu1 %vm3424_vm0, %v3422_v6  ;;  %v3247_v19 = vld [vmem:[%s3579_s5 + $0xc] ss:$16 sps:$4 sm:$0xff]  }
 0x599   : > { %3153 = vmatprep.subr.bf16.mxu1 %v3422_v6 }
 0x59c   : > { %3154 = vmatpush3.bf16.msra.mxu1 %v3235_v21  ;;  %v3253_v21 = vld [vmem:[%s3579_s5 + $0x2c] ss:$16 sps:$4 sm:$0xff]  }
 0x59d   : > { %3167 = vmatprep.subr.bf16.mxu1 %v3422_v6 }
 0x5bd   : > { %v1485_v23 = vpop.f32.mrb[12].mxu0 }
 0x5be   : > { %v3123_v24 = vpop.f32.mrb[13].mxu0 }
 0x5bf   : > { %v1488_v25 = vpop.f32.mrb[14].mxu0 }
 0x5c0   : > { %v1640_v27 = vpack.c.bf16 %v1488_v25, %v1485_v23  ;;  %v3124_v28 = vpop.f32.mrb[15].mxu0  ;;  %v3251_v23 = vld [vmem:[%s3579_s5 + $0x28] ss:$16 sps:$4 sm:$0xff]  }
 0x5c2   : > { %3156 = vmatmul.mubr.msk.bf16.vlgmr.msra.gmra.mrb[20].mxu1 %vm1141_vm5, %v1640_v27 }
 0x5c3   : > { %3168 = vmatpush3.bf16.msra.mxu1 %v3240_v26  ;;  %3171 = vmatprep.mubr.msk.bf16.mxu1 %vm3424_vm0, %v3422_v6 }
 0x5c4   : > { %3169 = vmatprep.subr.bf16.mxu1 %v3422_v6 }
 0x5c7   : > { %3170 = vmatpush3.bf16.msra.mxu1 %v3241_v29 }
 0x5c8   : > { %2181 = vmatprep.subr.bf16.mxu1 %v3247_v19  ;;  %v3294_v19 = vld [vmem:[%s3590_s2 + $0x48] sm:$0xff]  }
 0x631   : > { %v1529_v30 = vpop.f32.mrb[12].mxu1 }
 0x632   : > { %v3129_v31 = vpop.f32.mrb[13].mxu1 }
 0x633   : > { %v1532_v33 = vpop.f32.mrb[14].mxu1 }
 0x634   : > { %v1641_v35 = vpack.c.bf16 %v1532_v33, %v1529_v30  ;;  %v3130_v36 = vpop.f32.mrb[15].mxu1  ;;  %v3256_v33 = vld [vmem:[%s3579_s5 + $0x44] ss:$16 sps:$4 sm:$0xff]  }
 0x635   : > { %v3257_v36 = vld [vmem:[%s3579_s5 + $0x48] ss:$16 sps:$4 sm:$0xff]  }
 0x636   : > { %v1573_v37 = vpop.f32.mrb[16].mxu0  ;;  %3148 = vmatmul.mubr.msk.bf16.vlgmr.msra.gmra.mrb[20].mxu0 %vm1141_vm5, %v1641_v35  ;;  %v3254_v35 = vld [vmem:[%s3579_s5 + $0x40] ss:$16 sps:$4 sm:$0xff]  }
 0x637   : > { %v3135_v38 = vpop.f32.mrb[17].mxu0  ;;  %3160 = vmatpush3.bf16.msra.mxu0 %v3238_v34  ;;  %3163 = vmatprep.mubr.msk.bf16.mxu0 %vm3424_vm0, %v3422_v6  ;;  %v3259_v34 = vld [vmem:[%s3579_s5 + $0x4c] ss:$16 sps:$4 sm:$0xff]  }
 0x638   : > { %v1576_v40 = vpop.f32.mrb[18].mxu0  ;;  %3161 = vmatprep.subr.bf16.mxu0 %v3422_v6  ;;  %v3265_v38 = vld [vmem:[%s3579_s5 + $0x6c] ss:$16 sps:$4 sm:$0xff]  }
 0x639   : > { %v1642_v41 = vpack.c.bf16 %v1576_v40, %v1573_v37  ;;  %v3136_v42 = vpop.f32.mrb[19].mxu0  ;;  %v3262_v37 = vld [vmem:[%s3579_s5 + $0x64] ss:$16 sps:$4 sm:$0xff]   ;;  %v3263_v40 = vld [vmem:[%s3579_s5 + $0x68] ss:$16 sps:$4 sm:$0xff]  }
 0x63a   : > { %v3271_v42 = vld [vmem:[%s3579_s5 + $0x8c] ss:$16 sps:$4 sm:$0xff]  }
 0x63b   : > { %3162 = vmatpush3.bf16.msra.mxu0 %v3239_v39  ;;  %v3260_v39 = vld [vmem:[%s3579_s5 + $0x60] ss:$16 sps:$4 sm:$0xff]  }
 0x63c   : > { %2138 = vmatprep.subr.bf16.mxu0 %v3244_v16  ;;  %v3292_v16 = vld [vmem:[%s3590_s2] sm:$0xff]  }
 0x63e   : > { %3164 = vmatmul.mubr.msk.bf16.vlgmr.msra.gmra.mrb[24].mxu0 %vm1141_vm5, %v1642_v41  ;;  %v3268_v41 = vld [vmem:[%s3579_s5 + $0x84] ss:$16 sps:$4 sm:$0xff]  }
 0x63f   : > { %2170 = vmatprep.mubr.bf16.mxu0 %v3423_v32  ;;  %2139 = vmatpush1.bf16.msra.mxu0 %v3242_v15  ;;  %v3291_v15 = vld [vmem:[%s3590_s2 + $0xc0] sm:$0xff]  }
 0x640   : > { %2140 = vmatprep.subr.bf16.mxu0 %v3250_v20  ;;  %v3295_v20 = vld [vmem:[%s3590_s2 + $0xc8] sm:$0xff]  }
 0x643   : > { %2141 = vmatpush1.bf16.msra.mxu0 %v3248_v22  ;;  %v3297_v22 = vld [vmem:[%s3590_s2 + $0x88] sm:$0xff]  }
 0x644   : > { %2142 = vmatprep.subr.bf16.mxu0 %v3256_v33  ;;  %v3307_v33 = vld [vmem:[%s3590_s2 + $0xe0] sm:$0xff]  }
 0x647   : > { %2143 = vmatpush1.bf16.msra.mxu0 %v3254_v35  ;;  %v3309_v35 = vld [vmem:[%s3590_s2 + $0xa0] sm:$0xff]  }
 0x648   : > { %2144 = vmatprep.subr.bf16.mxu0 %v3262_v37  ;;  %v3311_v37 = vld [vmem:[%s3590_s2 + $0xe8] sm:$0xff]  }
 0x64b   : > { %2145 = vmatpush1.bf16.msra.mxu0 %v3260_v39  ;;  %v3313_v39 = vld [vmem:[%s3590_s2 + $0xa8] sm:$0xff]  }
 0x64c   : > { %2146 = vmatprep.subr.bf16.mxu0 %v3268_v41  ;;  %v3315_v41 = vld [vmem:[%s3590_s2 + $0xf0] sm:$0xff]  }
 0x66a   : > { %v1617_v43 = vpop.f32.mrb[16].mxu1 }
 0x66b   : > { %v3141_v44 = vpop.f32.mrb[17].mxu1 }
 0x66c   : > { %v1620_v45 = vpop.f32.mrb[18].mxu1  ;;  %v3269_v44 = vld [vmem:[%s3579_s5 + $0x88] ss:$16 sps:$4 sm:$0xff]  }
 0x66d   : > { %v1643_v46 = vpack.c.bf16 %v1620_v45, %v1617_v43  ;;  %v3142_v47 = vpop.f32.mrb[19].mxu1  ;;  %v3266_v43 = vld [vmem:[%s3579_s5 + $0x80] ss:$16 sps:$4 sm:$0xff]   ;;  %v3274_v45 = vld [vmem:[%s3579_s5 + $0xa4] ss:$16 sps:$4 sm:$0xff]  }
 0x66e   : > { %2147 = vmatpush1.bf16.msra.mxu0 %v3266_v43  ;;  %v3272_v47 = vld [vmem:[%s3579_s5 + $0xa0] ss:$16 sps:$4 sm:$0xff]  }
 0x66f   : > { %3172 = vmatmul.mubr.msk.bf16.vlgmr.msra.gmra.mrb[24].mxu1 %vm1141_vm5, %v1643_v46  ;;  %v3277_v46 = vld [vmem:[%s3579_s5 + $0xac] ss:$16 sps:$4 sm:$0xff]   ;;  %2148 = vmatprep.subr.bf16.mxu0 %v3274_v45  ;;  %v3317_v43 = vld [vmem:[%s3590_s2 + $0xb0] sm:$0xff]  }
 0x670   : > { %2213 = vmatprep.mubr.bf16.mxu1 %v3423_v32  ;;  %2182 = vmatpush1.bf16.msra.mxu1 %v3245_v17  ;;  %v3293_v17 = vld [vmem:[%s3590_s2 + $0x80] sm:$0xff]   ;;  %v3319_v45 = vld [vmem:[%s3590_s2 + $0xf8] sm:$0xff]  }
 0x671   : > { %2183 = vmatprep.subr.bf16.mxu1 %v3253_v21  ;;  %v3296_v21 = vld [vmem:[%s3590_s2 + $0x8] sm:$0xff]  }
 0x672   : > { %2149 = vmatpush1.bf16.msra.mxu0 %v3272_v47  ;;  %v3321_v47 = vld [vmem:[%s3590_s2 + $0xb8] sm:$0xff]  }
 0x674   : > { %2184 = vmatpush1.bf16.msra.mxu1 %v3251_v23  ;;  %v3298_v23 = vld [vmem:[%s3590_s2 + $0x50] sm:$0xff]  }
 0x675   : > { %2185 = vmatprep.subr.bf16.mxu1 %v3259_v34  ;;  %v3308_v34 = vld [vmem:[%s3590_s2 + $0x20] sm:$0xff]  }
 0x678   : > { %2186 = vmatpush1.bf16.msra.mxu1 %v3257_v36  ;;  %v3310_v36 = vld [vmem:[%s3590_s2 + $0x68] sm:$0xff]  }
 0x679   : > { %2187 = vmatprep.subr.bf16.mxu1 %v3265_v38  ;;  %v3312_v38 = vld [vmem:[%s3590_s2 + $0x28] sm:$0xff]  }
 0x67c   : > { %2188 = vmatpush1.bf16.msra.mxu1 %v3263_v40  ;;  %v3314_v40 = vld [vmem:[%s3590_s2 + $0x70] sm:$0xff]  }
 0x67d   : > { %2189 = vmatprep.subr.bf16.mxu1 %v3271_v42  ;;  %v3316_v42 = vld [vmem:[%s3590_s2 + $0x30] sm:$0xff]  }
 0x680   : > { %2190 = vmatpush1.bf16.msra.mxu1 %v3269_v44  ;;  %v3318_v44 = vld [vmem:[%s3590_s2 + $0x78] sm:$0xff]  }
 0x681   : > { %2191 = vmatprep.subr.bf16.mxu1 %v3277_v46  ;;  %v3320_v46 = vld [vmem:[%s3590_s2 + $0x38] sm:$0xff]  }
 0x695   : > { %v1749_v48 = vpop.f32.mrb[20].mxu1 }
 0x696   : > { %v3157_v49 = vpop.f32.mrb[21].mxu1 }
 0x697   : > { %v1752_v50 = vpop.f32.mrb[22].mxu1  ;;  %v3280_v49 = vld [vmem:[%s3579_s5 + $0xc4] ss:$16 sps:$4 sm:$0xff]  }
 0x698   : > { %v3158_v6 = vpop.f32.mrb[23].mxu1  ;;  %2150 = vmatprep.subr.bf16.mxu0 %v3280_v49  ;;  %v1972_v49 = vsub.s32 3, %v3664_v56 }
 0x699   : > { %v3278_v6 = vld [vmem:[%s3579_s5 + $0xc0] ss:$16 sps:$4 sm:$0xff]  }
 0x69a   : > { %2151 = vmatpush1.bf16.msra.mxu0 %v3278_v6 }
 0x709   : > { %v1693_v51 = vpop.f32.mrb[20].mxu0 }
 0x70a   : > { %v1750_v52 = vadd.f32 %v1749_v48, %v1693_v51  ;;  %v3149_v53 = vpop.f32.mrb[21].mxu0  ;;  %v3275_v48 = vld [vmem:[%s3579_s5 + $0xa8] ss:$16 sps:$4 sm:$0xff]  }
 0x70b   : > { %v1696_v54 = vpop.f32.mrb[22].mxu0  ;;  %2192 = vmatpush1.bf16.msra.mxu1 %v3275_v48  ;;  %v3281_v51 = vld [vmem:[%s3579_s5 + $0xc8] ss:$16 sps:$4 sm:$0xff]   ;;  %v3289_v53 = vld [vmem:[%s3579_s5 + $0xec] ss:$16 sps:$4 sm:$0xff]  }
 0x70c   : > { %v1753_v55 = vadd.f32 %v1752_v50, %v1696_v54  ;;  %v3150_v58 = vpop.f32.mrb[23].mxu0  ;;  %v3283_v50 = vld [vmem:[%s3579_s5 + $0xcc] ss:$16 sps:$4 sm:$0xff]   ;;  %v3284_v54 = vld [vmem:[%s3579_s5 + $0xe0] ss:$16 sps:$4 sm:$0xff]  }
 0x70d   : > { %2193 = vmatprep.subr.bf16.mxu1 %v3283_v50  ;;  %v1956_v48 = vld [vmem:[%s3585_s20] sm:$0xf] }
 0x70e   : > { %v1961_v50 = vrot.slane %v1956_v48, %v802_v57  ;;  %v1969_v6 = vrot.slane %v1956_v48, %v810_v60 }
 0x70f   : > { %2194 = vmatpush1.bf16.msra.mxu1 %v3281_v51  ;;  %v1965_v51 = vrot.slane %v1956_v48, %v806_v59 }
 0x710   : > { %2195 = vmatprep.subr.bf16.mxu1 %v3289_v53 }
 0x711   : > { %v1805_v61 = vpop.f32.mrb[24].mxu0 }
 0x712   : > { %v1812_v62 = vadd.f32 %v1805_v61, %v1750_v52  ;;  %v3165_v63 = vpop.f32.mrb[25].mxu0  ;;  %v3286_v52 = vld [vmem:[%s3579_s5 + $0xe4] ss:$16 sps:$4 sm:$0xff]  }
 0x713   : > { %v1808_v0 = vpop.f32.mrb[26].mxu0  ;;  %2152 = vmatprep.subr.bf16.mxu0 %v3286_v52  ;;  %v1973_v52 = vrot.slane %v1956_v48, %v1972_v49 }
 0x714   : > { %v1813_v1 = vadd.f32 %v1808_v0, %v1753_v55  ;;  %v3166_v3 = vpop.f32.mrb[27].mxu0  ;;  %v3287_v55 = vld [vmem:[%s3579_s5 + $0xe8] ss:$16 sps:$4 sm:$0xff]   ;;  %2153 = vmatpush1.bf16.msra.mxu0 %v3284_v54 }
 0x715   : > { %2196 = vmatpush1.bf16.msra.mxu1 %v3287_v55 }
 0x716   : > { %3053 = vmatprep.subr.bf16.mxu1 %v3291_v15 }
 0x742   : > { %v1863_v4 = vpop.f32.mrb[24].mxu1 }
 0x743   : > { %v1870_v32 = vadd.f32 %v1863_v4, %v1812_v62  ;;  %v3173_v7 = vpop.f32.mrb[25].mxu1 }
 0x744   : > { %v1866_v13 = vpop.f32.mrb[26].mxu1 }
 0x745   : > { %v1872_v10 = vadd.f32 %v3378_v9, %v1870_v32  ;;  %v1871_v11 = vadd.f32 %v1866_v13, %v1813_v1  ;;  %v3174_v2 = vpop.f32.mrb[27].mxu1  ;;  %v2917_v32 = vld [vmem:[%s4097_s15] ss:$0 sm:$0xff] }
 0x746   : > { %v2918_v9 = vld [vmem:[%s4098_s16] ss:$0 sm:$0xff] }
 0x747   : > { %v1873_v12 = vadd.f32 %v3379_v5, %v1871_v11  ;;  %v3871_v18 = vadd.f32 %v2916_v8, %v1872_v10 }
 0x749   : > { %1885 = vadd.xlane.f32.xlu1 %v3871_v18  ;;  %v3874_v14 = vadd.f32 %v2916_v8, %v1873_v12  ;;  %v3290_v12 = vld [vmem:[%s3590_s2 + $0x40] sm:$0xff]  }
 0x74a   : > { %3031 = vmatprep.subr.bf16.mxu0 %v3290_v12 }
 0x74b   : > { %1887 = vadd.xlane.f32.xlu0 %v3874_v14 }
 0x7d6   : > { %v1886_v24 = vpop.xlane.xlu1 %1885 }
 0x7d7   : > { %v1889_v25 = vmul.f32 0.0078125, %v1886_v24  ;;  %v3299_v24 = vld [vmem:[%s3590_s2 + $0xd0] sm:$0xff]  }
 0x7d8   : > { %v1888_v26 = vpop.xlane.xlu0 %1887 }
 0x7d9   : > { %v3886_v27 = vsub.f32 %v3871_v18, %v1889_v25  ;;  %v1890_v28 = vmul.f32 0.0078125, %v1888_v26  ;;  %v3300_v25 = vld [vmem:[%s3590_s2 + $0x10] sm:$0xff]  }
 0x7da   : > { %v3301_v26 = vld [vmem:[%s3590_s2 + $0x90] sm:$0xff]  }
 0x7db   : > { %v3889_v29 = vsub.f32 %v3874_v14, %v1890_v28  ;;  %v1893_v30 = vmul.f32 %v3886_v27, %v3886_v27  ;;  %v3303_v28 = vld [vmem:[%s3590_s2 + $0xd8] sm:$0xff]  }
 0x7dd   : > { %1895 = vadd.xlane.f32.xlu0 %v1893_v30  ;;  %v1894_v31 = vmul.f32 %v3889_v29, %v3889_v29  ;;  %v3305_v30 = vld [vmem:[%s3590_s2 + $0x98] sm:$0xff]  }
 0x7e1   : > { %1897 = vadd.xlane.f32.xlu0 %v1894_v31  ;;  %v3306_v31 = vld [vmem:[%s3590_s2 + $0x60] sm:$0xff]  }
 0x86a   : > { %v1896_v58 = vpop.xlane.xlu0 %1895 }
 0x86b   : > { %v1899_v61 = vmul.f32 0.0078125, %v1896_v58 }
 0x86d   : > { %v1901_v62 = vadd.f32 1e-05, %v1899_v61 }
 0x86e   : > { %v1898_v63 = vpop.xlane.xlu0 %1897 }
 0x86f   : > { %3358 = vrsqrt.f32 %v1901_v62  ;;  %v1900_v0 = vmul.f32 0.0078125, %v1898_v63 }
 0x871   : > { %v1902_v1 = vadd.f32 1e-05, %v1900_v0 }
 0x873   : > { %3360 = vrsqrt.f32 %v1902_v1 }
 0x879   : > { %v3359_v3 = vpop.eup %3358 }
 0x87a   : > { %v1905_v4 = vmul.f32 %v3359_v3, %v3886_v27  ;;  %v3302_v27 = vld [vmem:[%s3590_s2 + $0x58] sm:$0xff]  }
 0x87c   : > { %v1913_v8 = vmul.f32 %v2917_v32, %v1905_v4 }
 0x87d   : > { %v3361_v7 = vpop.eup %3360 }
 0x87e   : > { %v1906_v13 = vmul.f32 %v3361_v7, %v3889_v29  ;;  %v1921_v11 = vadd.f32 %v2918_v9, %v1913_v8  ;;  %v3304_v29 = vld [vmem:[%s3590_s2 + $0x18] sm:$0xff]  }
 0x880   : > { %v1914_v10 = vmul.f32 %v2917_v32, %v1906_v13 }
 0x882   : > { %v1922_v2 = vadd.f32 %v2918_v9, %v1914_v10 }
 0x884   : > { %v1923_v5 = vpack.c.bf16 %v1922_v2, %v1921_v11 }
 0x886   : > { %2171 = vmatmul.mubr.bf16.vlgmr.msra.gmra.mrb[28].mxu0 %v1923_v5  ;;  %2214 = vmatmul.mubr.bf16.vlgmr.msra.gmra.mrb[28].mxu1 %v1923_v5 }
 0x887   : > { %3032 = vmatpush3.bf16.msra.mxu0 %v3292_v16  ;;  %3054 = vmatpush3.bf16.msra.mxu1 %v3293_v17 }
 0x888   : > { %3033 = vmatprep.subr.bf16.mxu0 %v3294_v19  ;;  %3055 = vmatprep.subr.bf16.mxu1 %v3295_v20 }
 0x88b   : > { %3034 = vmatpush3.bf16.msra.mxu0 %v3296_v21  ;;  %3056 = vmatpush3.bf16.msra.mxu1 %v3297_v22 }
 0x88c   : > { %3035 = vmatprep.subr.bf16.mxu0 %v3298_v23  ;;  %3057 = vmatprep.subr.bf16.mxu1 %v3299_v24 }
 0x88f   : > { %3036 = vmatpush3.bf16.msra.mxu0 %v3300_v25  ;;  %3058 = vmatpush3.bf16.msra.mxu1 %v3301_v26 }
 0x890   : > { %3037 = vmatprep.subr.bf16.mxu0 %v3302_v27  ;;  %3059 = vmatprep.subr.bf16.mxu1 %v3303_v28 }
 0x893   : > { %3038 = vmatpush3.bf16.msra.mxu0 %v3304_v29  ;;  %3060 = vmatpush3.bf16.msra.mxu1 %v3305_v30 }
 0x894   : > { %3039 = vmatprep.subr.bf16.mxu0 %v3306_v31  ;;  %3061 = vmatprep.subr.bf16.mxu1 %v3307_v33 }
 0x897   : > { %3040 = vmatpush3.bf16.msra.mxu0 %v3308_v34  ;;  %3062 = vmatpush3.bf16.msra.mxu1 %v3309_v35 }
 0x898   : > { %3041 = vmatprep.subr.bf16.mxu0 %v3310_v36  ;;  %3063 = vmatprep.subr.bf16.mxu1 %v3311_v37 }
 0x89b   : > { %3042 = vmatpush3.bf16.msra.mxu0 %v3312_v38  ;;  %3064 = vmatpush3.bf16.msra.mxu1 %v3313_v39 }
 0x89c   : > { %3043 = vmatprep.subr.bf16.mxu0 %v3314_v40  ;;  %3065 = vmatprep.subr.bf16.mxu1 %v3315_v41 }
 0x89f   : > { %3044 = vmatpush3.bf16.msra.mxu0 %v3316_v42  ;;  %3066 = vmatpush3.bf16.msra.mxu1 %v3317_v43 }
 0x8a0   : > { %3045 = vmatprep.subr.bf16.mxu0 %v3318_v44  ;;  %3067 = vmatprep.subr.bf16.mxu1 %v3319_v45 }
 0x8a3   : > { %3046 = vmatpush3.bf16.msra.mxu0 %v3320_v46  ;;  %3068 = vmatpush3.bf16.msra.mxu1 %v3321_v47 }
 0x959   : > { %v2172_v53 = vpop.f32.mrb[28].mxu0  ;;  %v2215_v54 = vpop.f32.mrb[28].mxu1 }
 0x95a   : > { %v3971_v55 = vadd.f32 %v2172_v53, %v1961_v50  ;;  %v3973_v58 = vadd.f32 %v2215_v54, %v1969_v6  ;;  %v2174_v61 = vpop.f32.mrb[29].mxu0  ;;  %v2217_v62 = vpop.f32.mrb[29].mxu1 }
 0x95b   : > { %v3975_v63 = vadd.f32 %v2174_v61, %v1965_v51  ;;  %v3977_v0 = vadd.f32 %v2217_v62, %v1973_v52  ;;  %v2176_v57 = vpop.f32.mrb[30].mxu0  ;;  %v2219_v1 = vpop.f32.mrb[30].mxu1 }
 0x95c   : > { %v2232_v60 = vmul.f32 0.044715, %v3971_v55  ;;  %v2234_v56 = vmul.f32 0.044715, %v3973_v58  ;;  %v2177_v59 = vadd.f32 %v2176_v57, %v1961_v50  ;;  %v2220_v3 = vadd.f32 %v2219_v1, %v1969_v6  ;;  %v2178_v4 = vpop.f32.mrb[31].mxu0  ;;  %v2221_v32 = vpop.f32.mrb[31].mxu1 }
 0x95d   : > { %v2233_v7 = vmul.f32 0.044715, %v3975_v63  ;;  %v2235_v13 = vmul.f32 0.044715, %v3977_v0  ;;  %v3983_v8 = vadd.f32 %v2178_v4, %v1965_v51  ;;  %v3985_v9 = vadd.f32 %v2221_v32, %v1973_v52 }
 0x95e   : > { %v2240_v10 = vmul.f32 %v2232_v60, %v3971_v55  ;;  %v2242_v11 = vmul.f32 %v2234_v56, %v3973_v58  ;;  %v2236_v2 = vmul.f32 0.044715, %v2177_v59  ;;  %v2238_v5 = vmul.f32 0.044715, %v2220_v3 }
 0x95f   : > { %v2241_v12 = vmul.f32 %v2233_v7, %v3975_v63  ;;  %v2243_v15 = vmul.f32 %v2235_v13, %v3977_v0  ;;  %v2237_v16 = vmul.f32 0.044715, %v3983_v8  ;;  %v2239_v17 = vmul.f32 0.044715, %v3985_v9 }
 0x960   : > { %v2248_v19 = vmul.f32 %v2240_v10, %v3971_v55  ;;  %v2250_v20 = vmul.f32 %v2242_v11, %v3973_v58  ;;  %v2244_v21 = vmul.f32 %v2236_v2, %v2177_v59  ;;  %v2246_v22 = vmul.f32 %v2238_v5, %v2220_v3 }
 0x961   : > { %v2249_v23 = vmul.f32 %v2241_v12, %v3975_v63  ;;  %v2251_v24 = vmul.f32 %v2243_v15, %v3977_v0  ;;  %v2245_v25 = vmul.f32 %v2237_v16, %v3983_v8  ;;  %v2247_v26 = vmul.f32 %v2239_v17, %v3985_v9 }
 0x962   : > { %v2256_v27 = vadd.f32 %v2248_v19, %v3971_v55  ;;  %v2258_v28 = vadd.f32 %v2250_v20, %v3973_v58  ;;  %v2252_v29 = vmul.f32 %v2244_v21, %v2177_v59  ;;  %v2254_v30 = vmul.f32 %v2246_v22, %v2220_v3 }
 0x963   : > { %v2253_v31 = vmul.f32 %v2245_v25, %v3983_v8  ;;  %v2255_v33 = vmul.f32 %v2247_v26, %v3985_v9  ;;  %v2257_v38 = vadd.f32 %v2249_v23, %v3975_v63  ;;  %v2259_v42 = vadd.f32 %v2251_v24, %v3977_v0 }
 0x964   : > { %v2264_v34 = vmul.f32 0.7978846, %v2256_v27  ;;  %v2266_v35 = vmul.f32 0.7978846, %v2258_v28  ;;  %v2260_v36 = vadd.f32 %v2252_v29, %v2177_v59  ;;  %v2262_v37 = vadd.f32 %v2254_v30, %v2220_v3 }
 0x965   : > { %v2261_v39 = vadd.f32 %v2253_v31, %v3983_v8  ;;  %v2265_v43 = vmul.f32 0.7978846, %v2257_v38  ;;  %v2263_v45 = vadd.f32 %v2255_v33, %v3985_v9  ;;  %v2267_v46 = vmul.f32 0.7978846, %v2259_v42 }
 0x966   : > { %3362 = vtanh.f32 %v2264_v34  ;;  %v2268_v40 = vmul.f32 0.7978846, %v2260_v36  ;;  %v2270_v41 = vmul.f32 0.7978846, %v2262_v37  ;;  %v2224_v53 = vmul.f32 0.5, %v3971_v55 }
 0x967   : > { %3364 = vtanh.f32 %v2266_v35  ;;  %v2269_v44 = vmul.f32 0.7978846, %v2261_v39  ;;  %v2271_v47 = vmul.f32 0.7978846, %v2263_v45  ;;  %v2228_v54 = vmul.f32 0.5, %v2177_v59 }
 0x968   : > { %3366 = vtanh.f32 %v2268_v40  ;;  %v2226_v57 = vmul.f32 0.5, %v3973_v58  ;;  %v2230_v1 = vmul.f32 0.5, %v2220_v3  ;;  %v2225_v4 = vmul.f32 0.5, %v3975_v63 }
 0x969   : > { %3368 = vtanh.f32 %v2270_v41  ;;  %v2229_v11 = vmul.f32 0.5, %v3983_v8  ;;  %v2227_v59 = vmul.f32 0.5, %v3977_v0  ;;  %v2231_v15 = vmul.f32 0.5, %v3985_v9  ;;  %v2951_v0 = vld [vmem:[%s712_s22] ss:$0 sm:$0xff] }
 0x96a   : > { %3370 = vtanh.f32 %v2265_v43 }
 0x96b   : > { %3372 = vtanh.f32 %v2269_v44 }
 0x96c   : > { %3374 = vtanh.f32 %v2267_v46 }
 0x96d   : > { %3376 = vtanh.f32 %v2271_v47 }
 0x970   : > { %v3363_v48 = vpop.eup %3362 }
 0x971   : > { %v3365_v49 = vpop.eup %3364  ;;  %v2280_v50 = vadd.f32 1.0, %v3363_v48 }
 0x972   : > { %v3367_v6 = vpop.eup %3366  ;;  %v2282_v51 = vadd.f32 1.0, %v3365_v49 }
 0x973   : > { %v3369_v52 = vpop.eup %3368  ;;  %v2284_v61 = vadd.f32 1.0, %v3367_v6  ;;  %v2288_v7 = vmul.f32 %v2280_v50, %v2224_v53  ;;  %v2985_v53 = vld [vmem:[%s4099_s24] ss:$0 sm:$0xff] (!%p2984_p5) }
 0x974   : > { %v3371_v62 = vpop.eup %3370  ;;  %v2286_v60 = vadd.f32 1.0, %v3369_v52  ;;  %v2290_v5 = vmul.f32 %v2282_v51, %v2226_v57 }
 0x975   : > { %v3373_v56 = vpop.eup %3372  ;;  %v2281_v32 = vadd.f32 1.0, %v3371_v62  ;;  %v2292_v13 = vmul.f32 %v2284_v61, %v2228_v54  ;;  %v2986_v61 = vld [vmem:[%s4100_s29] ss:$0 sm:$0xff] (!%p2984_p5) }
 0x976   : > { %v3375_v10 = vpop.eup %3374  ;;  %v2285_v2 = vadd.f32 1.0, %v3373_v56  ;;  %v2294_v12 = vmul.f32 %v2286_v60, %v2230_v1 }
 0x977   : > { %v3377_v55 = vpop.eup %3376  ;;  %v2283_v58 = vadd.f32 1.0, %v3375_v10  ;;  %v2296_v3 = vpack.c.bf16 %v2292_v13, %v2288_v7  ;;  %v2289_v16 = vmul.f32 %v2281_v32, %v2225_v4 }
 0x978   : > { %v2293_v17 = vmul.f32 %v2285_v2, %v2229_v11  ;;  %v2287_v63 = vadd.f32 1.0, %v3377_v55  ;;  %v2298_v19 = vpack.c.bf16 %v2294_v12, %v2290_v5 }
 0x979   : > { %v2291_v21 = vmul.f32 %v2283_v58, %v2227_v59 }
 0x97a   : > { %v2297_v20 = vpack.c.bf16 %v2293_v17, %v2289_v16  ;;  %v2295_v22 = vmul.f32 %v2287_v63, %v2231_v15 }
 0x97c   : > { %2595 = vmatprep.mubr.bf16.mxu0 %v2297_v20  ;;  %v2299_v8 = vpack.c.bf16 %v2295_v22, %v2291_v21 }
 0x97d   : > { %2596 = vmatmul.mubr.bf16.vlgmr.msra.gmra.mrb[32].mxu0 %v2296_v3 }
 0x97e   : > { %2636 = vmatprep.mubr.bf16.mxu1 %v2299_v8 }
 0x97f   : > { %2637 = vmatmul.mubr.bf16.vlgmr.msra.gmra.mrb[32].mxu1 %v2298_v19 }
 0xa50   : > { %v3047_v23 = vpop.f32.mrb[32].mxu0 }
 0xa51   : > { %v3048_v9 = vpop.f32.mrb[33].mxu0 }
 0xa52   : > { %v3069_v24 = vpop.f32.mrb[32].mxu1  ;;  %v3049_v25 = vadd.f32 %v3048_v9, %v3047_v23  ;;  %v3050_v26 = vpop.f32.mrb[34].mxu0 }
 0xa53   : > { %v3070_v27 = vpop.f32.mrb[33].mxu1  ;;  %v3051_v28 = vpop.f32.mrb[35].mxu0 }
 0xa54   : > { %v2598_v29 = vadd.f32 %v3049_v25, %v2951_v0  ;;  %v3071_v30 = vadd.f32 %v3070_v27, %v3069_v24  ;;  %v3072_v31 = vpop.f32.mrb[34].mxu1  ;;  %v3052_v33 = vadd.f32 %v3051_v28, %v3050_v26 }
 0xa55   : > { %v3073_v34 = vpop.f32.mrb[35].mxu1 }
 0xa56   : > { %v2639_v35 = vadd.f32 %v3071_v30, %v2598_v29  ;;  %v2601_v36 = vadd.f32 %v3052_v33, %v2951_v0  ;;  %v3074_v37 = vadd.f32 %v3073_v34, %v3072_v31  ;;  %2652 = sbr.rel (%p2984_p5) target bundleno = 2966 (0xb96), region = 96 }
 0xa58   : > { %v2645_v38 = vadd.f32 %v2639_v35, %v3871_v18  ;;  %v2642_v39 = vadd.f32 %v3074_v37, %v2601_v36 }
 0xa5a   : > { %2647 = vst [vmem:[#allocation2] sm:$0xff] %v2645_v38  ;;  %v2646_v40 = vadd.f32 %v2642_v39, %v3874_v14  ;;  %2655 = vadd.xlane.f32.xlu0 (!%p2984_p5), %v2645_v38 }
 0xa5c   : > { %2648 = vst [vmem:[#allocation2 + $0x8] sm:$0xff] %v2646_v40 }
 0xa5e   : > { %2657 = vadd.xlane.f32.xlu0 %v2646_v40 }
 0xae7   : > { %v2656_v41 = vpop.xlane.xlu0 %2655 }
 0xae8   : > { %v2659_v42 = vmul.f32 0.0078125, %v2656_v41 }
 0xaea   : > { %v2661_v43 = vsub.f32 %v2645_v38, %v2659_v42 }
 0xaeb   : > { %v2658_v44 = vpop.xlane.xlu0 %2657 }
 0xaec   : > { %v2660_v45 = vmul.f32 0.0078125, %v2658_v44  ;;  %v2663_v46 = vmul.f32 %v2661_v43, %v2661_v43 }
 0xaee   : > { %v2662_v47 = vsub.f32 %v2646_v40, %v2660_v45  ;;  %2665 = vadd.xlane.f32.xlu1 %v2663_v46 }
 0xaf0   : > { %v2664_v48 = vmul.f32 %v2662_v47, %v2662_v47 }
 0xaf2   : > { %2667 = vadd.xlane.f32.xlu1 %v2664_v48 }
 0xb7b   : > { %v2666_v18 = vpop.xlane.xlu1 %2665 }
 0xb7c   : > { %v2669_v49 = vmul.f32 0.0078125, %v2666_v18 }
 0xb7e   : > { %v2671_v50 = vadd.f32 1e-05, %v2669_v49 }
 0xb7f   : > { %v2668_v14 = vpop.xlane.xlu1 %2667 }
 0xb80   : > { %3380 = vrsqrt.f32 %v2671_v50  ;;  %v2670_v6 = vmul.f32 0.0078125, %v2668_v14 }
 0xb82   : > { %v2672_v51 = vadd.f32 1e-05, %v2670_v6 }
 0xb84   : > { %3382 = vrsqrt.f32 %v2672_v51 }
 0xb8a   : > { %v3381_v52 = vpop.eup %3380 }
 0xb8b   : > { %v2675_v54 = vmul.f32 %v3381_v52, %v2661_v43 }
 0xb8d   : > { %v2683_v62 = vmul.f32 %v2985_v53, %v2675_v54 }
 0xb8e   : > { %v3383_v57 = vpop.eup %3382 }
 0xb8f   : > { %v2691_v1 = vadd.f32 %v2986_v61, %v2683_v62  ;;  %v2676_v60 = vmul.f32 %v3383_v57, %v2662_v47 }
 0xb91   : > { %2693 = vst [vmem:[#allocation3] sm:$0xff] %v2691_v1  ;;  %v2684_v56 = vmul.f32 %v2985_v53, %v2676_v60 }
 0xb93   : > { %v2692_v4 = vadd.f32 %v2986_v61, %v2684_v56 }
 0xb95   : > { %2694 = vst [vmem:[#allocation3 + $0x8] sm:$0xff] %v2692_v4 }
 0xb96 PF: > { %p3181_p6 = scmp.eq.s32.totalorder %s3529_s25, 1  ;;  %s3430_s23 = smov [#allocation3]  }
 0xb97   : > { %s2701_s0 = sshll.u32 %s3430_s23, 4  ;;  %s2702_s0 = int_to_ptr.vmem [resolvable:$true] %s2701_s0 }
 0xb98   : > { %s3384_s18 = scalar_lea.vmem %s2702_s0, 256  ;;  %p3391_p10 = scmp.lt.s32.totalorder %s2702_s0, %s2702_s0 }
 0xb99   : > { %p3385_p7 = scmp.ne.s32.totalorder %s2702_s0, %s3384_s18  ;;  %p3392_p11 = scmp.lt.s32.totalorder %s3384_s18, %s3384_s18 }
 0xb9b   : > { %p3386_p8 = pnand %p3385_p7, %p3181_p6  ;;  %p3393_p12 = por %p3392_p11, %p3391_p10 }
 0xb9d   : > { %p3387_p9 = pneg %p3386_p8 }
 0xb9f   : > { %p3394_p13 = pnand %p3393_p12, %p3387_p9 }
 0xba1   : > { %3397 = shalt.err (!%p3394_p13)
}
 0xba2   : > { %s4101_s15 = sld [smem:[#allocation14_spill]] }
 0xba8   : > { %s3398_s1 = scalar_lea.hbm %s4101_s15, 256 }
 0xba9   : > { %p3399_p0 = scmp.ne.s32.totalorder %s4101_s15, %s3398_s1  ;;  %p3404_p3 = scmp.lt.u32.totalorder %s3398_s1, %s4101_s15 }
 0xbab   : > { %p3400_p1 = pnand %p3399_p0, %p3181_p6 }
 0xbad   : > { %p3401_p2 = pneg %p3400_p1 }
 0xbaf   : > { %p3406_p4 = pnand %p3404_p3, %p3401_p2 }
 0xbb1   : > { %3409 = shalt.err (!%p3406_p4)
}
 0xbb2   : > { %s3431_s26 = smov 128   ;;  %s3432_s22 = smov 8  }
 0xbb3   : > { %3178 = dma.vmem_to_hbm [thread:$0]  (%p3181_p6), %s2702_s0, 256, %s4101_s15, [#allocation4], %s3431_s26, %s3431_s26, %s3432_s22  }
 0xbb4   : > { %3415 = dma.done.wait (%p3181_p6), [#allocation4], 256  }
 0xbb5   : > { %3417 = vsyncadd (%p3181_p6), [#allocation4], 4294967040 }
 0xbb6 PF: > { %s4102_s17 = sld [smem:[#allocation6_spill]] }
 0xbbc   : > { %s28_s24 = sadd.s32 1, %s4102_s17  }
 0xbbd   : > { %p25_p5 = scmp.ge.s32.totalorder %s28_s24, 4  }
 0xbbf   :  { %27 = sbr.rel (!%p25_p5) target bundleno = 10 (0xa), region = 156 }
 0xbc6   :  { %2717 = vsyncpa [#allocation4], 1 }
 0xbc7   :  { %2719 = vsyncpa [#allocation4 + $0x1], 1 }

</bundles_post_ra>
